<compile_context>
chip_gen: v5e
topology: v5e:2x2
jax: 0.10.0
libtpu: 0.0.40
codegen_flags: <defaults>
</compile_context>

<pallas_src>
import jax
import jax.numpy as jnp
from jax.experimental import pallas as pl
from jax.experimental.pallas import tpu as pltpu

# ----- module hyper-parameters (from the PyTorch source) -----
COND_CHANNELS = 80
INNER_CHANNELS = 32
CONV_IN_CHANNELS = INNER_CHANNELS            # 32
CONV_KERNEL_SIZE = 3
CONV_OUT_CHANNELS = 2 * INNER_CHANNELS       # 64
NUM_CONV_LAYERS = 4
KPNET_HIDDEN = 64
KPNET_CONV_SIZE = 3
INPUT_KERNEL_SIZE = 5
NUM_RESIDUAL_CONVS = 6
L_W = CONV_IN_CHANNELS * CONV_OUT_CHANNELS * CONV_KERNEL_SIZE * NUM_CONV_LAYERS  # 24576
L_B = CONV_OUT_CHANNELS * NUM_CONV_LAYERS                                        # 256
KC = KPNET_CONV_SIZE * KPNET_HIDDEN                                              # 192
LEAKY_SLOPE = 0.1


def _leaky(x):
  return jnp.where(x >= 0, x, LEAKY_SLOPE * x)


# ---------------------------------------------------------------------------
# Kernel 1: fused input_conv + residual chain + residual add + bias_conv,
# and construction of the bf16 im2col LHS for kernel_conv.
# One grid step per batch element; weights stay VMEM-resident (constant
# index_map); intermediate activations never touch HBM.
# ---------------------------------------------------------------------------
def _fused_small_kernel(x_ref, w0_ref, w1_ref, w3_ref,
                        lhs_ref, b_ref, xpad_ref, hpad_ref):
  """x_ref   : (1, L, 80)  f32  conditioning (NLC).
     w0_ref  : (5, 80, 64) bf16 input_conv weight   (tap, Cin, Cout).
     w1_ref  : (3, 64, 64) bf16 residual conv weight (tap, Cin, Cout).
     w3_ref  : (192, 256)  bf16 bias_conv weight, im2col layout (k*64+c, Cout).
     lhs_ref : (1, L, 192) bf16 out: im2col(h) — consumed by kernel 2.
     b_ref   : (1, L, 256) f32  out: bias_conv(h) (NLC).
     xpad_ref: (L+4, 80)   bf16 scratch, zero boundary rows -> 'same' pad (k=5).
     hpad_ref: (L+2, 64)   bf16 scratch, zero boundary rows -> 'same' pad (k=3).
  """
  L = x_ref.shape[1]

  # Zero only the boundary rows, every grid step (cheap: a few row stores), so
  # megacore sharding of the batch axis never sees an un-initialised scratch.
  xpad_ref[pl.ds(0, 2), :] = jnp.zeros((2, COND_CHANNELS), xpad_ref.dtype)
  xpad_ref[pl.ds(L + 2, 2), :] = jnp.zeros((2, COND_CHANNELS), xpad_ref.dtype)
  hpad_ref[pl.ds(0, 1), :] = jnp.zeros((1, KPNET_HIDDEN), hpad_ref.dtype)
  hpad_ref[pl.ds(L + 1, 1), :] = jnp.zeros((1, KPNET_HIDDEN), hpad_ref.dtype)

  # In-kernel 'same' padding of the conditioning (no XLA jnp.pad pass).
  xpad_ref[pl.ds(2, L), :] = x_ref[0].astype(xpad_ref.dtype)

  # input_conv: Conv1d(80->64, k=5, pad=2, bias=False) + LeakyReLU(0.1).
  # bf16 operands, f32 accumulation on the MXU.
  h0 = jnp.zeros((L, KPNET_HIDDEN), jnp.float32)
  for k in range(INPUT_KERNEL_SIZE):
    h0 = h0 + jnp.dot(xpad_ref[pl.ds(k, L), :], w0_ref[k],
                      preferred_element_type=jnp.float32)
  h0 = _leaky(h0)

  # residual_conv: 6 x (Conv1d(64->64,k=3,pad=1,bias=False) + LeakyReLU(0.1));
  # Dropout(p=0.0) is the identity.  Weight taps are read at their use sites.
  r = h0
  for _ in range(NUM_RESIDUAL_CONVS):
    hpad_ref[pl.ds(1, L), :] = r.astype(hpad_ref.dtype)
    acc = jnp.zeros((L, KPNET_HIDDEN), jnp.float32)
    for k in range(KPNET_CONV_SIZE):
      acc = acc + jnp.dot(hpad_ref[pl.ds(k, L), :], w1_ref[k],
                          preferred_element_type=jnp.float32)
    r = _leaky(acc)

  h = h0 + r                                   # c = c + residual_conv(c)

  # im2col(h) (k=3, 'same' pad) is both kernel 2's LHS and bias_conv's LHS.
  hpad_ref[pl.ds(1, L), :] = h.astype(hpad_ref.dtype)
  lhs = jnp.concatenate(
      [hpad_ref[pl.ds(k, L), :] for k in range(KPNET_CONV_SIZE)], axis=-1)  # (L,192) bf16
  lhs_ref[0] = lhs

  # bias_conv: Conv1d(64->256, k=3, pad=1, bias=False) as a single 192-deep
  # matmul; the (192,256) weight is loaded right here, not hoisted earlier.
  b_ref[0] = jnp.dot(lhs, w3_ref[...],
                     preferred_element_type=jnp.float32).astype(b_ref.dtype)


def _fused_small_convs(x_nlc, w0_kio, w1_kio, w3_cat):
  B, L, _ = x_nlc.shape
  return pl.pallas_call(
      _fused_small_kernel,
      out_shape=(jax.ShapeDtypeStruct((B, L, KC), jnp.bfloat16),
                 jax.ShapeDtypeStruct((B, L, L_B), jnp.float32)),
      grid=(B,),
      in_specs=[
          pl.BlockSpec((1, L, COND_CHANNELS), lambda b: (b, 0, 0)),
          # Constant index_map -> weights DMA'd once and stay VMEM-resident.
          pl.BlockSpec((INPUT_KERNEL_SIZE, COND_CHANNELS, KPNET_HIDDEN),
                       lambda b: (0, 0, 0)),
          pl.BlockSpec((KPNET_CONV_SIZE, KPNET_HIDDEN, KPNET_HIDDEN),
                       lambda b: (0, 0, 0)),
          pl.BlockSpec((KC, L_B), lambda b: (0, 0)),
      ],
      out_specs=[
          pl.BlockSpec((1, L, KC), lambda b: (b, 0, 0)),
          pl.BlockSpec((1, L, L_B), lambda b: (b, 0, 0)),
      ],
      scratch_shapes=[
          pltpu.VMEM((L + INPUT_KERNEL_SIZE - 1, COND_CHANNELS), jnp.bfloat16),
          pltpu.VMEM((L + KPNET_CONV_SIZE - 1, KPNET_HIDDEN), jnp.bfloat16),
      ],
      compiler_params=pltpu.CompilerParams(
          dimension_semantics=("parallel",),
          vmem_limit_bytes=48 * 1024 * 1024),
      # TODO(synk): for very long cond_length (L >~ 8k) add an L-tile grid axis
      # with a halo (receptive field is 9 frames per side) instead of whole-L blocks.
  )(x_nlc, w0_kio, w1_kio, w3_cat)


# ---------------------------------------------------------------------------
# Kernel 2: kernel_conv as a weight-stationary matmul.
# grid = (N-tiles, batch, M-tiles) with the weight axis OUTERMOST: the weight
# tile's index_map depends only on j, so the ~9.4 MB bf16 weight is streamed
# from HBM exactly once while the output stays tiled in both N and M.
# The dot contracts the last dims of both operands, so the (tn, tm) result is
# already transposed and is stored straight into the (B, l_w, L) NCL output.
# ---------------------------------------------------------------------------
def _kernel_conv_kernel(lhs_ref, w_ref, o_ref):
  """lhs_ref: (1, tm, 192) bf16, w_ref: (tn, 192) bf16, o_ref: (1, tn, tm) f32."""
  res = jax.lax.dot_general(
      w_ref[...], lhs_ref[0],
      dimension_numbers=(((1,), (1,)), ((), ())),   # contract the 192 im2col dim
      preferred_element_type=jnp.float32)           # (tn, tm)
  o_ref[0] = res.astype(o_ref.dtype)


def _pick_m_tile(L):
  # Output block's last dim must be a multiple of 128 (lane tile) or equal L.
  for tm in (512, 384, 256, 128):
    if L % tm == 0:
      return tm
  # TODO(synk): pad L to a multiple of 128 to M-tile ragged sequence lengths.
  return L


def _kernel_conv(lhs, w2_t, L, *, tn=2048):
  B = lhs.shape[0]
  tm = _pick_m_tile(L)
  n_m = L // tm
  n_n = L_W // tn
  cost = pl.CostEstimate(
      flops=2 * B * L * KC * L_W,
      transcendentals=0,
      bytes_accessed=w2_t.size * 2 + n_n * lhs.size * 2 + B * L_W * L * 4,
  )
  return pl.pallas_call(
      _kernel_conv_kernel,
      out_shape=jax.ShapeDtypeStruct((B, L_W, L), jnp.float32),
      grid=(n_n, B, n_m),                                   # weight axis outermost
      in_specs=[
          pl.BlockSpec((1, tm, KC), lambda j, b, m: (b, m, 0)),
          pl.BlockSpec((tn, KC), lambda j, b, m: (j, 0)),   # resident across (b, m)
      ],
      out_specs=pl.BlockSpec((1, tn, tm), lambda j, b, m: (b, j, m)),
      compiler_params=pltpu.CompilerParams(
          dimension_semantics=("parallel", "parallel", "parallel"),
          vmem_limit_bytes=48 * 1024 * 1024),
      cost_estimate=cost,
      # TODO(synk): optional int8 (v5e/v6e) / fp8-e4m3 (v7x) weight path with
      # per-output-channel scales would halve the dominant weight stream again.
  )(lhs, w2_t)


# ---------------------------------------------------------------------------
# Parameter preparation (done ONCE, outside the jitted forward).
# PyTorch Conv1d weights are (Cout, Cin, K); the kernels consume:
#   w0, w1 : (K, Cin, Cout)                    bf16 (VMEM-resident small convs)
#   w3     : (K*Cin, Cout)  im2col-flattened   bf16
#   w2     : (Cout, K*Cin)  im2col-flattened   bf16 (streamed, output-major so
#            kernel 2 writes the k output already transposed / NCL)
# ---------------------------------------------------------------------------
def prepare_params(w0, w1, w2, w3):
  w0_kio = jnp.transpose(w0, (2, 1, 0)).astype(jnp.bfloat16)             # (5, 80, 64)
  w1_kio = jnp.transpose(w1, (2, 1, 0)).astype(jnp.bfloat16)             # (3, 64, 64)
  w3_cat = (jnp.transpose(w3, (2, 1, 0))                                 # (3, 64, 256)
            .reshape(KC, L_B).astype(jnp.bfloat16))                      # (192, 256)
  w2_t = (jnp.transpose(w2, (0, 2, 1))                                   # (24576, 3, 64)
          .reshape(L_W, KC).astype(jnp.bfloat16))                        # (24576, 192)
  return w0_kio, w1_kio, w3_cat, w2_t


@jax.jit
def kernel_predictor_forward(c_ncl, w0_kio, w1_kio, w3_cat, w2_t):
  """Forward pass of KernelPredictor.

  Args:
    c_ncl: (batch, cond_channels, cond_length) float32 (PyTorch layout).
  Returns:
    kernels: (B, conv_layers, conv_in_ch, conv_out_ch, conv_kernel_size, L)
    bias:    (B, conv_layers, conv_out_ch, L)
  """
  B, _, L = c_ncl.shape
  x = jnp.transpose(c_ncl, (0, 2, 1))            # NCL -> NLC (small tensor)

  # Fused small convs: bias output + bf16 im2col LHS for kernel_conv.
  lhs, b = _fused_small_convs(x, w0_kio, w1_kio, w3_cat)

  # kernel_conv: weight streamed once, output written directly in NCL layout.
  k_ncl = _kernel_conv(lhs, w2_t, L)             # (B, 24576, L) f32, no XLA transpose

  kernels = k_ncl.reshape(B, NUM_CONV_LAYERS, CONV_IN_CHANNELS,
                          CONV_OUT_CHANNELS, CONV_KERNEL_SIZE, L)
  bias = jnp.transpose(b, (0, 2, 1)).reshape(    # b is 96x smaller than k
      B, NUM_CONV_LAYERS, CONV_OUT_CHANNELS, L)
  return kernels, bias


def make_params(key):
  """Deterministic synthetic weights matching the PyTorch module's shapes."""
  k0, k1, k2, k3 = jax.random.split(key, 4)
  w0 = jax.random.normal(k0, (KPNET_HIDDEN, COND_CHANNELS, INPUT_KERNEL_SIZE),
                         jnp.float32) * 0.05
  w1 = jax.random.normal(k1, (KPNET_HIDDEN, KPNET_HIDDEN, KPNET_CONV_SIZE),
                         jnp.float32) * 0.05
  w2 = jax.random.normal(k2, (L_W, KPNET_HIDDEN, KPNET_CONV_SIZE),
                         jnp.float32) * 0.02
  w3 = jax.random.normal(k3, (L_B, KPNET_HIDDEN, KPNET_CONV_SIZE),
                         jnp.float32) * 0.05
  return w0, w1, w2, w3


if __name__ == "__main__":
  key = jax.random.PRNGKey(0)
  pkey, ckey = jax.random.split(key)
  w0, w1, w2, w3 = make_params(pkey)
  w0_kio, w1_kio, w3_cat, w2_t = prepare_params(w0, w1, w2, w3)

  batch, cond_length = 2, 8
  c = jax.random.normal(ckey, (batch, COND_CHANNELS, cond_length), jnp.float32)

  kernels, bias = kernel_predictor_forward(c, w0_kio, w1_kio, w3_cat, w2_t)
  jax.block_until_ready((kernels, bias))

  assert kernels.shape == (batch, NUM_CONV_LAYERS, CONV_IN_CHANNELS,
                           CONV_OUT_CHANNELS, CONV_KERNEL_SIZE, cond_length)
  assert bias.shape == (batch, NUM_CONV_LAYERS, CONV_OUT_CHANNELS, cond_length)
  assert bool(jnp.all(jnp.isfinite(kernels))) and bool(jnp.all(jnp.isfinite(bias)))

  # Pure-JAX (f32, HIGHEST precision) reference.  Loose tolerance because all
  # matmul operands inside the kernels are intentionally bf16 (f32 accumulation).
  def _conv1d(x_ncl, w, p):
    return jax.lax.conv_general_dilated(
        x_ncl, w, window_strides=(1,), padding=[(p, p)],
        dimension_numbers=("NCH", "OIH", "NCH"),
        precision=jax.lax.Precision.HIGHEST)

  h_r = jax.nn.leaky_relu(_conv1d(c, w0, 2), LEAKY_SLOPE)
  r_r = h_r
  for _ in range(NUM_RESIDUAL_CONVS):
    r_r = jax.nn.leaky_relu(_conv1d(r_r, w1, 1), LEAKY_SLOPE)
  h_r = h_r + r_r
  k_r = _conv1d(h_r, w2, 1).reshape(batch, NUM_CONV_LAYERS, CONV_IN_CHANNELS,
                                    CONV_OUT_CHANNELS, CONV_KERNEL_SIZE,
                                    cond_length)
  b_r = _conv1d(h_r, w3, 1).reshape(batch, NUM_CONV_LAYERS, CONV_OUT_CHANNELS,
                                    cond_length)

  def _nrm_err(a, ref):
    return float(jnp.max(jnp.abs(a - ref)) / (jnp.max(jnp.abs(ref)) + 1e-8))

  assert _nrm_err(bias, b_r) < 5e-2, _nrm_err(bias, b_r)
  assert _nrm_err(kernels, k_r) < 5e-2, _nrm_err(kernels, k_r)

  print("KERNEL_OK")
</pallas_src>

<mosaic_0001>
module attributes {stable_mosaic.version = 11 : i64} {
  func.func @_kernel_conv_kernel(%arg0: i32, %arg1: i32, %arg2: i32, %arg3: memref<1x8x192xbf16, #tpu.memory_space<vmem>>, %arg4: memref<2048x192xbf16, #tpu.memory_space<vmem>>, %arg5: memref<1x2048x8xf32, #tpu.memory_space<vmem>>) attributes {dimension_semantics = [#tpu.dimension_semantics<parallel>, #tpu.dimension_semantics<parallel>, #tpu.dimension_semantics<parallel>], iteration_bounds = array<i64: 12, 2, 1>, scalar_prefetch = 0 : i64, scratch_operands = 0 : i64, tpu.core_type = #tpu.core_type<tc>, window_params = [{transform_indices = @transform_0, window_bounds = array<i64: 1, 8, 192>}, {transform_indices = @transform_1, window_bounds = array<i64: 2048, 192>}, {transform_indices = @transform_2, window_bounds = array<i64: 1, 2048, 8>}]} {
    %c0 = arith.constant 0 : index
    %c0_0 = arith.constant 0 : index
    %0 = vector.load %arg4[%c0, %c0_0] : memref<2048x192xbf16, #tpu.memory_space<vmem>>, vector<2048x192xbf16>
    %c0_1 = arith.constant 0 : index
    %c0_2 = arith.constant 0 : index
    %c0_3 = arith.constant 0 : index
    %1 = vector.load %arg3[%c0_1, %c0_2, %c0_3] : memref<1x8x192xbf16, #tpu.memory_space<vmem>>, vector<1x8x192xbf16>
    %2 = vector.shape_cast %1 : vector<1x8x192xbf16> to vector<8x192xbf16>
    %cst = arith.constant dense<0.000000e+00> : vector<2048x8xf32>
    %3 = tpu.matmul %0, %2, %cst {dimension_numbers = #tpu.dot_dimension_numbers<[1], [1], [0], [0], [0, 0, 1, 0], [], []>} : vector<2048x192xbf16>, vector<8x192xbf16>, vector<2048x8xf32> -> vector<2048x8xf32>
    %c0_4 = arith.constant 0 : index
    %c0_5 = arith.constant 0 : index
    %c0_6 = arith.constant 0 : index
    %4 = vector.load %arg5[%c0_4, %c0_5, %c0_6] : memref<1x2048x8xf32, #tpu.memory_space<vmem>>, vector<1x2048x8xf32>
    %5 = vector.shape_cast %4 : vector<1x2048x8xf32> to vector<2048x8xf32>
    %6 = vector.shape_cast %3 : vector<2048x8xf32> to vector<1x2048x8xf32>
    tpu.vector_store %arg5[%c0_4, %c0_5, %c0_6], %6 {strides = array<i32>} : memref<1x2048x8xf32, #tpu.memory_space<vmem>>, vector<1x2048x8xf32>,
    return
  }
  func.func @transform_0(%arg0: i32, %arg1: i32, %arg2: i32) -> (i32, i32, i32) {
    %c0_i32 = arith.constant 0 : i32
    %c0_i32_0 = arith.constant 0 : i32
    return %arg1, %arg2, %c0_i32 : i32, i32, i32
  }
  func.func @transform_1(%arg0: i32, %arg1: i32, %arg2: i32) -> (i32, i32) {
    %c0_i32 = arith.constant 0 : i32
    %c0_i32_0 = arith.constant 0 : i32
    return %arg0, %c0_i32 : i32, i32
  }
  func.func @transform_2(%arg0: i32, %arg1: i32, %arg2: i32) -> (i32, i32, i32) {
    %c0_i32 = arith.constant 0 : i32
    return %arg1, %arg0, %arg2 : i32, i32, i32
  }
}

module attributes {stable_mosaic.version = 11 : i64} {
  func.func @_fused_small_kernel(%arg0: i32, %arg1: memref<1x8x80xf32, #tpu.memory_space<vmem>>, %arg2: memref<5x80x64xbf16, #tpu.memory_space<vmem>>, %arg3: memref<3x64x64xbf16, #tpu.memory_space<vmem>>, %arg4: memref<192x256xbf16, #tpu.memory_space<vmem>>, %arg5: memref<1x8x192xbf16, #tpu.memory_space<vmem>>, %arg6: memref<1x8x256xf32, #tpu.memory_space<vmem>>, %arg7: memref<12x80xbf16, #tpu.memory_space<vmem>>, %arg8: memref<10x64xbf16, #tpu.memory_space<vmem>>) attributes {dimension_semantics = [#tpu.dimension_semantics<parallel>], iteration_bounds = array<i64: 2>, scalar_prefetch = 0 : i64, scratch_operands = 2 : i64, tpu.core_type = #tpu.core_type<tc>, window_params = [{transform_indices = @transform_0, window_bounds = array<i64: 1, 8, 80>}, {pipeline_mode = #tpu.pipeline_mode<synchronous>, transform_indices = @transform_1, window_bounds = array<i64: 5, 80, 64>}, {pipeline_mode = #tpu.pipeline_mode<synchronous>, transform_indices = @transform_2, window_bounds = array<i64: 3, 64, 64>}, {pipeline_mode = #tpu.pipeline_mode<synchronous>, transform_indices = @transform_3, window_bounds = array<i64: 192, 256>}, {transform_indices = @transform_4, window_bounds = array<i64: 1, 8, 192>}, {transform_indices = @transform_5, window_bounds = array<i64: 1, 8, 256>}]} {
    %cst = arith.constant 0.000000e+00 : bf16
    %0 = vector.broadcast %cst : bf16 to vector<2x80xbf16>
    %c0 = arith.constant 0 : index
    %c0_0 = arith.constant 0 : index
    %1 = vector.load %arg7[%c0, %c0_0] : memref<12x80xbf16, #tpu.memory_space<vmem>>, vector<2x80xbf16>
    tpu.vector_store %arg7[%c0, %c0_0], %0 {strides = array<i32>} : memref<12x80xbf16, #tpu.memory_space<vmem>>, vector<2x80xbf16>,
    %cst_1 = arith.constant 0.000000e+00 : bf16
    %2 = vector.broadcast %cst_1 : bf16 to vector<2x80xbf16>
    %c10 = arith.constant 10 : index
    %c0_2 = arith.constant 0 : index
    %3 = vector.load %arg7[%c10, %c0_2] : memref<12x80xbf16, #tpu.memory_space<vmem>>, vector<2x80xbf16>
    tpu.vector_store %arg7[%c10, %c0_2], %2 {strides = array<i32>} : memref<12x80xbf16, #tpu.memory_space<vmem>>, vector<2x80xbf16>,
    %cst_3 = arith.constant 0.000000e+00 : bf16
    %4 = vector.broadcast %cst_3 : bf16 to vector<1x64xbf16>
    %c0_4 = arith.constant 0 : index
    %c0_5 = arith.constant 0 : index
    %5 = vector.load %arg8[%c0_4, %c0_5] : memref<10x64xbf16, #tpu.memory_space<vmem>>, vector<1x64xbf16>
    tpu.vector_store %arg8[%c0_4, %c0_5], %4 {strides = array<i32>} : memref<10x64xbf16, #tpu.memory_space<vmem>>, vector<1x64xbf16>,
    %cst_6 = arith.constant 0.000000e+00 : bf16
    %6 = vector.broadcast %cst_6 : bf16 to vector<1x64xbf16>
    %c9 = arith.constant 9 : index
    %c0_7 = arith.constant 0 : index
    %7 = vector.load %arg8[%c9, %c0_7] : memref<10x64xbf16, #tpu.memory_space<vmem>>, vector<1x64xbf16>
    tpu.vector_store %arg8[%c9, %c0_7], %6 {strides = array<i32>} : memref<10x64xbf16, #tpu.memory_space<vmem>>, vector<1x64xbf16>,
    %c0_8 = arith.constant 0 : index
    %c0_9 = arith.constant 0 : index
    %c0_10 = arith.constant 0 : index
    %8 = vector.load %arg1[%c0_8, %c0_9, %c0_10] : memref<1x8x80xf32, #tpu.memory_space<vmem>>, vector<1x8x80xf32>
    %9 = vector.shape_cast %8 : vector<1x8x80xf32> to vector<8x80xf32>
    %10 = arith.truncf %9 : vector<8x80xf32> to vector<8x80xbf16>
    %c2 = arith.constant 2 : index
    %c0_11 = arith.constant 0 : index
    %11 = vector.load %arg7[%c2, %c0_11] : memref<12x80xbf16, #tpu.memory_space<vmem>>, vector<8x80xbf16>
    tpu.vector_store %arg7[%c2, %c0_11], %10 {strides = array<i32>} : memref<12x80xbf16, #tpu.memory_space<vmem>>, vector<8x80xbf16>,
    %cst_12 = arith.constant 0.000000e+00 : f32
    %12 = vector.broadcast %cst_12 : f32 to vector<8x64xf32>
    %c0_13 = arith.constant 0 : index
    %c0_14 = arith.constant 0 : index
    %13 = vector.load %arg7[%c0_13, %c0_14] : memref<12x80xbf16, #tpu.memory_space<vmem>>, vector<8x80xbf16>
    %c0_15 = arith.constant 0 : index
    %c0_16 = arith.constant 0 : index
    %c0_17 = arith.constant 0 : index
    %14 = vector.load %arg2[%c0_15, %c0_16, %c0_17] : memref<5x80x64xbf16, #tpu.memory_space<vmem>>, vector<1x80x64xbf16>
    %15 = vector.shape_cast %14 : vector<1x80x64xbf16> to vector<80x64xbf16>
    %cst_18 = arith.constant dense<0.000000e+00> : vector<8x64xf32>
    %16 = tpu.matmul %13, %15, %cst_18 {dimension_numbers = #tpu.dot_dimension_numbers<[1], [0], [0], [1], [0, 0, 1, 1], [], []>} : vector<8x80xbf16>, vector<80x64xbf16>, vector<8x64xf32> -> vector<8x64xf32>
    %17 = arith.addf %12, %16 : vector<8x64xf32>
    %c1 = arith.constant 1 : index
    %c0_19 = arith.constant 0 : index
    %18 = vector.load %arg7[%c1, %c0_19] : memref<12x80xbf16, #tpu.memory_space<vmem>>, vector<8x80xbf16>
    %c1_20 = arith.constant 1 : index
    %c0_21 = arith.constant 0 : index
    %c0_22 = arith.constant 0 : index
    %19 = vector.load %arg2[%c1_20, %c0_21, %c0_22] : memref<5x80x64xbf16, #tpu.memory_space<vmem>>, vector<1x80x64xbf16>
    %20 = vector.shape_cast %19 : vector<1x80x64xbf16> to vector<80x64xbf16>
    %cst_23 = arith.constant dense<0.000000e+00> : vector<8x64xf32>
    %21 = tpu.matmul %18, %20, %cst_23 {dimension_numbers = #tpu.dot_dimension_numbers<[1], [0], [0], [1], [0, 0, 1, 1], [], []>} : vector<8x80xbf16>, vector<80x64xbf16>, vector<8x64xf32> -> vector<8x64xf32>
    %22 = arith.addf %17, %21 : vector<8x64xf32>
    %c2_24 = arith.constant 2 : index
    %c0_25 = arith.constant 0 : index
    %23 = vector.load %arg7[%c2_24, %c0_25] : memref<12x80xbf16, #tpu.memory_space<vmem>>, vector<8x80xbf16>
    %c2_26 = arith.constant 2 : index
    %c0_27 = arith.constant 0 : index
    %c0_28 = arith.constant 0 : index
    %24 = vector.load %arg2[%c2_26, %c0_27, %c0_28] : memref<5x80x64xbf16, #tpu.memory_space<vmem>>, vector<1x80x64xbf16>
    %25 = vector.shape_cast %24 : vector<1x80x64xbf16> to vector<80x64xbf16>
    %cst_29 = arith.constant dense<0.000000e+00> : vector<8x64xf32>
    %26 = tpu.matmul %23, %25, %cst_29 {dimension_numbers = #tpu.dot_dimension_numbers<[1], [0], [0], [1], [0, 0, 1, 1], [], []>} : vector<8x80xbf16>, vector<80x64xbf16>, vector<8x64xf32> -> vector<8x64xf32>
    %27 = arith.addf %22, %26 : vector<8x64xf32>
    %c3 = arith.constant 3 : index
    %c0_30 = arith.constant 0 : index
    %28 = vector.load %arg7[%c3, %c0_30] : memref<12x80xbf16, #tpu.memory_space<vmem>>, vector<8x80xbf16>
    %c3_31 = arith.constant 3 : index
    %c0_32 = arith.constant 0 : index
    %c0_33 = arith.constant 0 : index
    %29 = vector.load %arg2[%c3_31, %c0_32, %c0_33] : memref<5x80x64xbf16, #tpu.memory_space<vmem>>, vector<1x80x64xbf16>
    %30 = vector.shape_cast %29 : vector<1x80x64xbf16> to vector<80x64xbf16>
    %cst_34 = arith.constant dense<0.000000e+00> : vector<8x64xf32>
    %31 = tpu.matmul %28, %30, %cst_34 {dimension_numbers = #tpu.dot_dimension_numbers<[1], [0], [0], [1], [0, 0, 1, 1], [], []>} : vector<8x80xbf16>, vector<80x64xbf16>, vector<8x64xf32> -> vector<8x64xf32>
    %32 = arith.addf %27, %31 : vector<8x64xf32>
    %c4 = arith.constant 4 : index
    %c0_35 = arith.constant 0 : index
    %33 = vector.load %arg7[%c4, %c0_35] : memref<12x80xbf16, #tpu.memory_space<vmem>>, vector<8x80xbf16>
    %c4_36 = arith.constant 4 : index
    %c0_37 = arith.constant 0 : index
    %c0_38 = arith.constant 0 : index
    %34 = vector.load %arg2[%c4_36, %c0_37, %c0_38] : memref<5x80x64xbf16, #tpu.memory_space<vmem>>, vector<1x80x64xbf16>
    %35 = vector.shape_cast %34 : vector<1x80x64xbf16> to vector<80x64xbf16>
    %cst_39 = arith.constant dense<0.000000e+00> : vector<8x64xf32>
    %36 = tpu.matmul %33, %35, %cst_39 {dimension_numbers = #tpu.dot_dimension_numbers<[1], [0], [0], [1], [0, 0, 1, 1], [], []>} : vector<8x80xbf16>, vector<80x64xbf16>, vector<8x64xf32> -> vector<8x64xf32>
    %37 = arith.addf %32, %36 : vector<8x64xf32>
    %cst_40 = arith.constant 0.000000e+00 : f32
    %38 = vector.broadcast %cst_40 : f32 to vector<8x64xf32>
    %39 = arith.cmpf oge, %37, %38 : vector<8x64xf32>
    %cst_41 = arith.constant 1.000000e-01 : f32
    %40 = vector.broadcast %cst_41 : f32 to vector<8x64xf32>
    %41 = arith.mulf %40, %37 : vector<8x64xf32>
    %42 = arith.select %39, %37, %41 : vector<8x64xi1>, vector<8x64xf32>
    %43 = arith.truncf %42 : vector<8x64xf32> to vector<8x64xbf16>
    %c1_42 = arith.constant 1 : index
    %c0_43 = arith.constant 0 : index
    %44 = vector.load %arg8[%c1_42, %c0_43] : memref<10x64xbf16, #tpu.memory_space<vmem>>, vector<8x64xbf16>
    tpu.vector_store %arg8[%c1_42, %c0_43], %43 {strides = array<i32>} : memref<10x64xbf16, #tpu.memory_space<vmem>>, vector<8x64xbf16>,
    %cst_44 = arith.constant 0.000000e+00 : f32
    %45 = vector.broadcast %cst_44 : f32 to vector<8x64xf32>
    %c0_45 = arith.constant 0 : index
    %c0_46 = arith.constant 0 : index
    %46 = vector.load %arg8[%c0_45, %c0_46] : memref<10x64xbf16, #tpu.memory_space<vmem>>, vector<8x64xbf16>
    %c0_47 = arith.constant 0 : index
    %c0_48 = arith.constant 0 : index
    %c0_49 = arith.constant 0 : index
    %47 = vector.load %arg3[%c0_47, %c0_48, %c0_49] : memref<3x64x64xbf16, #tpu.memory_space<vmem>>, vector<1x64x64xbf16>
    %48 = vector.shape_cast %47 : vector<1x64x64xbf16> to vector<64x64xbf16>
    %cst_50 = arith.constant dense<0.000000e+00> : vector<8x64xf32>
    %49 = tpu.matmul %46, %48, %cst_50 {dimension_numbers = #tpu.dot_dimension_numbers<[1], [0], [0], [1], [0, 0, 1, 1], [], []>} : vector<8x64xbf16>, vector<64x64xbf16>, vector<8x64xf32> -> vector<8x64xf32>
    %50 = arith.addf %45, %49 : vector<8x64xf32>
    %c1_51 = arith.constant 1 : index
    %c0_52 = arith.constant 0 : index
    %51 = vector.load %arg8[%c1_51, %c0_52] : memref<10x64xbf16, #tpu.memory_space<vmem>>, vector<8x64xbf16>
    %c1_53 = arith.constant 1 : index
    %c0_54 = arith.constant 0 : index
    %c0_55 = arith.constant 0 : index
    %52 = vector.load %arg3[%c1_53, %c0_54, %c0_55] : memref<3x64x64xbf16, #tpu.memory_space<vmem>>, vector<1x64x64xbf16>
    %53 = vector.shape_cast %52 : vector<1x64x64xbf16> to vector<64x64xbf16>
    %cst_56 = arith.constant dense<0.000000e+00> : vector<8x64xf32>
    %54 = tpu.matmul %51, %53, %cst_56 {dimension_numbers = #tpu.dot_dimension_numbers<[1], [0], [0], [1], [0, 0, 1, 1], [], []>} : vector<8x64xbf16>, vector<64x64xbf16>, vector<8x64xf32> -> vector<8x64xf32>
    %55 = arith.addf %50, %54 : vector<8x64xf32>
    %c2_57 = arith.constant 2 : index
    %c0_58 = arith.constant 0 : index
    %56 = vector.load %arg8[%c2_57, %c0_58] : memref<10x64xbf16, #tpu.memory_space<vmem>>, vector<8x64xbf16>
    %c2_59 = arith.constant 2 : index
    %c0_60 = arith.constant 0 : index
    %c0_61 = arith.constant 0 : index
    %57 = vector.load %arg3[%c2_59, %c0_60, %c0_61] : memref<3x64x64xbf16, #tpu.memory_space<vmem>>, vector<1x64x64xbf16>
    %58 = vector.shape_cast %57 : vector<1x64x64xbf16> to vector<64x64xbf16>
    %cst_62 = arith.constant dense<0.000000e+00> : vector<8x64xf32>
    %59 = tpu.matmul %56, %58, %cst_62 {dimension_numbers = #tpu.dot_dimension_numbers<[1], [0], [0], [1], [0, 0, 1, 1], [], []>} : vector<8x64xbf16>, vector<64x64xbf16>, vector<8x64xf32> -> vector<8x64xf32>
    %60 = arith.addf %55, %59 : vector<8x64xf32>
    %cst_63 = arith.constant 0.000000e+00 : f32
    %61 = vector.broadcast %cst_63 : f32 to vector<8x64xf32>
    %62 = arith.cmpf oge, %60, %61 : vector<8x64xf32>
    %cst_64 = arith.constant 1.000000e-01 : f32
    %63 = vector.broadcast %cst_64 : f32 to vector<8x64xf32>
    %64 = arith.mulf %63, %60 : vector<8x64xf32>
    %65 = arith.select %62, %60, %64 : vector<8x64xi1>, vector<8x64xf32>
    %66 = arith.truncf %65 : vector<8x64xf32> to vector<8x64xbf16>
    %c1_65 = arith.constant 1 : index
    %c0_66 = arith.constant 0 : index
    %67 = vector.load %arg8[%c1_65, %c0_66] : memref<10x64xbf16, #tpu.memory_space<vmem>>, vector<8x64xbf16>
    tpu.vector_store %arg8[%c1_65, %c0_66], %66 {strides = array<i32>} : memref<10x64xbf16, #tpu.memory_space<vmem>>, vector<8x64xbf16>,
    %cst_67 = arith.constant 0.000000e+00 : f32
    %68 = vector.broadcast %cst_67 : f32 to vector<8x64xf32>
    %c0_68 = arith.constant 0 : index
    %c0_69 = arith.constant 0 : index
    %69 = vector.load %arg8[%c0_68, %c0_69] : memref<10x64xbf16, #tpu.memory_space<vmem>>, vector<8x64xbf16>
    %c0_70 = arith.constant 0 : index
    %c0_71 = arith.constant 0 : index
    %c0_72 = arith.constant 0 : index
    %70 = vector.load %arg3[%c0_70, %c0_71, %c0_72] : memref<3x64x64xbf16, #tpu.memory_space<vmem>>, vector<1x64x64xbf16>
    %71 = vector.shape_cast %70 : vector<1x64x64xbf16> to vector<64x64xbf16>
    %cst_73 = arith.constant dense<0.000000e+00> : vector<8x64xf32>
    %72 = tpu.matmul %69, %71, %cst_73 {dimension_numbers = #tpu.dot_dimension_numbers<[1], [0], [0], [1], [0, 0, 1, 1], [], []>} : vector<8x64xbf16>, vector<64x64xbf16>, vector<8x64xf32> -> vector<8x64xf32>
    %73 = arith.addf %68, %72 : vector<8x64xf32>
    %c1_74 = arith.constant 1 : index
    %c0_75 = arith.constant 0 : index
    %74 = vector.load %arg8[%c1_74, %c0_75] : memref<10x64xbf16, #tpu.memory_space<vmem>>, vector<8x64xbf16>
    %c1_76 = arith.constant 1 : index
    %c0_77 = arith.constant 0 : index
    %c0_78 = arith.constant 0 : index
    %75 = vector.load %arg3[%c1_76, %c0_77, %c0_78] : memref<3x64x64xbf16, #tpu.memory_space<vmem>>, vector<1x64x64xbf16>
    %76 = vector.shape_cast %75 : vector<1x64x64xbf16> to vector<64x64xbf16>
    %cst_79 = arith.constant dense<0.000000e+00> : vector<8x64xf32>
    %77 = tpu.matmul %74, %76, %cst_79 {dimension_numbers = #tpu.dot_dimension_numbers<[1], [0], [0], [1], [0, 0, 1, 1], [], []>} : vector<8x64xbf16>, vector<64x64xbf16>, vector<8x64xf32> -> vector<8x64xf32>
    %78 = arith.addf %73, %77 : vector<8x64xf32>
    %c2_80 = arith.constant 2 : index
    %c0_81 = arith.constant 0 : index
    %79 = vector.load %arg8[%c2_80, %c0_81] : memref<10x64xbf16, #tpu.memory_space<vmem>>, vector<8x64xbf16>
    %c2_82 = arith.constant 2 : index
    %c0_83 = arith.constant 0 : index
    %c0_84 = arith.constant 0 : index
    %80 = vector.load %arg3[%c2_82, %c0_83, %c0_84] : memref<3x64x64xbf16, #tpu.memory_space<vmem>>, vector<1x64x64xbf16>
    %81 = vector.shape_cast %80 : vector<1x64x64xbf16> to vector<64x64xbf16>
    %cst_85 = arith.constant dense<0.000000e+00> : vector<8x64xf32>
    %82 = tpu.matmul %79, %81, %cst_85 {dimension_numbers = #tpu.dot_dimension_numbers<[1], [0], [0], [1], [0, 0, 1, 1], [], []>} : vector<8x64xbf16>, vector<64x64xbf16>, vector<8x64xf32> -> vector<8x64xf32>
    %83 = arith.addf %78, %82 : vector<8x64xf32>
    %cst_86 = arith.constant 0.000000e+00 : f32
    %84 = vector.broadcast %cst_86 : f32 to vector<8x64xf32>
    %85 = arith.cmpf oge, %83, %84 : vector<8x64xf32>
    %cst_87 = arith.constant 1.000000e-01 : f32
    %86 = vector.broadcast %cst_87 : f32 to vector<8x64xf32>
    %87 = arith.mulf %86, %83 : vector<8x64xf32>
    %88 = arith.select %85, %83, %87 : vector<8x64xi1>, vector<8x64xf32>
    %89 = arith.truncf %88 : vector<8x64xf32> to vector<8x64xbf16>
    %c1_88 = arith.constant 1 : index
    %c0_89 = arith.constant 0 : index
    %90 = vector.load %arg8[%c1_88, %c0_89] : memref<10x64xbf16, #tpu.memory_space<vmem>>, vector<8x64xbf16>
    tpu.vector_store %arg8[%c1_88, %c0_89], %89 {strides = array<i32>} : memref<10x64xbf16, #tpu.memory_space<vmem>>, vector<8x64xbf16>,
    %cst_90 = arith.constant 0.000000e+00 : f32
    %91 = vector.broadcast %cst_90 : f32 to vector<8x64xf32>
    %c0_91 = arith.constant 0 : index
    %c0_92 = arith.constant 0 : index
    %92 = vector.load %arg8[%c0_91, %c0_92] : memref<10x64xbf16, #tpu.memory_space<vmem>>, vector<8x64xbf16>
    %c0_93 = arith.constant 0 : index
    %c0_94 = arith.constant 0 : index
    %c0_95 = arith.constant 0 : index
    %93 = vector.load %arg3[%c0_93, %c0_94, %c0_95] : memref<3x64x64xbf16, #tpu.memory_space<vmem>>, vector<1x64x64xbf16>
    %94 = vector.shape_cast %93 : vector<1x64x64xbf16> to vector<64x64xbf16>
    %cst_96 = arith.constant dense<0.000000e+00> : vector<8x64xf32>
    %95 = tpu.matmul %92, %94, %cst_96 {dimension_numbers = #tpu.dot_dimension_numbers<[1], [0], [0], [1], [0, 0, 1, 1], [], []>} : vector<8x64xbf16>, vector<64x64xbf16>, vector<8x64xf32> -> vector<8x64xf32>
    %96 = arith.addf %91, %95 : vector<8x64xf32>
    %c1_97 = arith.constant 1 : index
    %c0_98 = arith.constant 0 : index
    %97 = vector.load %arg8[%c1_97, %c0_98] : memref<10x64xbf16, #tpu.memory_space<vmem>>, vector<8x64xbf16>
    %c1_99 = arith.constant 1 : index
    %c0_100 = arith.constant 0 : index
    %c0_101 = arith.constant 0 : index
    %98 = vector.load %arg3[%c1_99, %c0_100, %c0_101] : memref<3x64x64xbf16, #tpu.memory_space<vmem>>, vector<1x64x64xbf16>
    %99 = vector.shape_cast %98 : vector<1x64x64xbf16> to vector<64x64xbf16>
    %cst_102 = arith.constant dense<0.000000e+00> : vector<8x64xf32>
    %100 = tpu.matmul %97, %99, %cst_102 {dimension_numbers = #tpu.dot_dimension_numbers<[1], [0], [0], [1], [0, 0, 1, 1], [], []>} : vector<8x64xbf16>, vector<64x64xbf16>, vector<8x64xf32> -> vector<8x64xf32>
    %101 = arith.addf %96, %100 : vector<8x64xf32>
    %c2_103 = arith.constant 2 : index
    %c0_104 = arith.constant 0 : index
    %102 = vector.load %arg8[%c2_103, %c0_104] : memref<10x64xbf16, #tpu.memory_space<vmem>>, vector<8x64xbf16>
    %c2_105 = arith.constant 2 : index
    %c0_106 = arith.constant 0 : index
    %c0_107 = arith.constant 0 : index
    %103 = vector.load %arg3[%c2_105, %c0_106, %c0_107] : memref<3x64x64xbf16, #tpu.memory_space<vmem>>, vector<1x64x64xbf16>
    %104 = vector.shape_cast %103 : vector<1x64x64xbf16> to vector<64x64xbf16>
    %cst_108 = arith.constant dense<0.000000e+00> : vector<8x64xf32>
    %105 = tpu.matmul %102, %104, %cst_108 {dimension_numbers = #tpu.dot_dimension_numbers<[1], [0], [0], [1], [0, 0, 1, 1], [], []>} : vector<8x64xbf16>, vector<64x64xbf16>, vector<8x64xf32> -> vector<8x64xf32>
    %106 = arith.addf %101, %105 : vector<8x64xf32>
    %cst_109 = arith.constant 0.000000e+00 : f32
    %107 = vector.broadcast %cst_109 : f32 to vector<8x64xf32>
    %108 = arith.cmpf oge, %106, %107 : vector<8x64xf32>
    %cst_110 = arith.constant 1.000000e-01 : f32
    %109 = vector.broadcast %cst_110 : f32 to vector<8x64xf32>
    %110 = arith.mulf %109, %106 : vector<8x64xf32>
    %111 = arith.select %108, %106, %110 : vector<8x64xi1>, vector<8x64xf32>
    %112 = arith.truncf %111 : vector<8x64xf32> to vector<8x64xbf16>
    %c1_111 = arith.constant 1 : index
    %c0_112 = arith.constant 0 : index
    %113 = vector.load %arg8[%c1_111, %c0_112] : memref<10x64xbf16, #tpu.memory_space<vmem>>, vector<8x64xbf16>
    tpu.vector_store %arg8[%c1_111, %c0_112], %112 {strides = array<i32>} : memref<10x64xbf16, #tpu.memory_space<vmem>>, vector<8x64xbf16>,
    %cst_113 = arith.constant 0.000000e+00 : f32
    %114 = vector.broadcast %cst_113 : f32 to vector<8x64xf32>
    %c0_114 = arith.constant 0 : index
    %c0_115 = arith.constant 0 : index
    %115 = vector.load %arg8[%c0_114, %c0_115] : memref<10x64xbf16, #tpu.memory_space<vmem>>, vector<8x64xbf16>
    %c0_116 = arith.constant 0 : index
    %c0_117 = arith.constant 0 : index
    %c0_118 = arith.constant 0 : index
    %116 = vector.load %arg3[%c0_116, %c0_117, %c0_118] : memref<3x64x64xbf16, #tpu.memory_space<vmem>>, vector<1x64x64xbf16>
    %117 = vector.shape_cast %116 : vector<1x64x64xbf16> to vector<64x64xbf16>
    %cst_119 = arith.constant dense<0.000000e+00> : vector<8x64xf32>
    %118 = tpu.matmul %115, %117, %cst_119 {dimension_numbers = #tpu.dot_dimension_numbers<[1], [0], [0], [1], [0, 0, 1, 1], [], []>} : vector<8x64xbf16>, vector<64x64xbf16>, vector<8x64xf32> -> vector<8x64xf32>
    %119 = arith.addf %114, %118 : vector<8x64xf32>
    %c1_120 = arith.constant 1 : index
    %c0_121 = arith.constant 0 : index
    %120 = vector.load %arg8[%c1_120, %c0_121] : memref<10x64xbf16, #tpu.memory_space<vmem>>, vector<8x64xbf16>
    %c1_122 = arith.constant 1 : index
    %c0_123 = arith.constant 0 : index
    %c0_124 = arith.constant 0 : index
    %121 = vector.load %arg3[%c1_122, %c0_123, %c0_124] : memref<3x64x64xbf16, #tpu.memory_space<vmem>>, vector<1x64x64xbf16>
    %122 = vector.shape_cast %121 : vector<1x64x64xbf16> to vector<64x64xbf16>
    %cst_125 = arith.constant dense<0.000000e+00> : vector<8x64xf32>
    %123 = tpu.matmul %120, %122, %cst_125 {dimension_numbers = #tpu.dot_dimension_numbers<[1], [0], [0], [1], [0, 0, 1, 1], [], []>} : vector<8x64xbf16>, vector<64x64xbf16>, vector<8x64xf32> -> vector<8x64xf32>
    %124 = arith.addf %119, %123 : vector<8x64xf32>
    %c2_126 = arith.constant 2 : index
    %c0_127 = arith.constant 0 : index
    %125 = vector.load %arg8[%c2_126, %c0_127] : memref<10x64xbf16, #tpu.memory_space<vmem>>, vector<8x64xbf16>
    %c2_128 = arith.constant 2 : index
    %c0_129 = arith.constant 0 : index
    %c0_130 = arith.constant 0 : index
    %126 = vector.load %arg3[%c2_128, %c0_129, %c0_130] : memref<3x64x64xbf16, #tpu.memory_space<vmem>>, vector<1x64x64xbf16>
    %127 = vector.shape_cast %126 : vector<1x64x64xbf16> to vector<64x64xbf16>
    %cst_131 = arith.constant dense<0.000000e+00> : vector<8x64xf32>
    %128 = tpu.matmul %125, %127, %cst_131 {dimension_numbers = #tpu.dot_dimension_numbers<[1], [0], [0], [1], [0, 0, 1, 1], [], []>} : vector<8x64xbf16>, vector<64x64xbf16>, vector<8x64xf32> -> vector<8x64xf32>
    %129 = arith.addf %124, %128 : vector<8x64xf32>
    %cst_132 = arith.constant 0.000000e+00 : f32
    %130 = vector.broadcast %cst_132 : f32 to vector<8x64xf32>
    %131 = arith.cmpf oge, %129, %130 : vector<8x64xf32>
    %cst_133 = arith.constant 1.000000e-01 : f32
    %132 = vector.broadcast %cst_133 : f32 to vector<8x64xf32>
    %133 = arith.mulf %132, %129 : vector<8x64xf32>
    %134 = arith.select %131, %129, %133 : vector<8x64xi1>, vector<8x64xf32>
    %135 = arith.truncf %134 : vector<8x64xf32> to vector<8x64xbf16>
    %c1_134 = arith.constant 1 : index
    %c0_135 = arith.constant 0 : index
    %136 = vector.load %arg8[%c1_134, %c0_135] : memref<10x64xbf16, #tpu.memory_space<vmem>>, vector<8x64xbf16>
    tpu.vector_store %arg8[%c1_134, %c0_135], %135 {strides = array<i32>} : memref<10x64xbf16, #tpu.memory_space<vmem>>, vector<8x64xbf16>,
    %cst_136 = arith.constant 0.000000e+00 : f32
    %137 = vector.broadcast %cst_136 : f32 to vector<8x64xf32>
    %c0_137 = arith.constant 0 : index
    %c0_138 = arith.constant 0 : index
    %138 = vector.load %arg8[%c0_137, %c0_138] : memref<10x64xbf16, #tpu.memory_space<vmem>>, vector<8x64xbf16>
    %c0_139 = arith.constant 0 : index
    %c0_140 = arith.constant 0 : index
    %c0_141 = arith.constant 0 : index
    %139 = vector.load %arg3[%c0_139, %c0_140, %c0_141] : memref<3x64x64xbf16, #tpu.memory_space<vmem>>, vector<1x64x64xbf16>
    %140 = vector.shape_cast %139 : vector<1x64x64xbf16> to vector<64x64xbf16>
    %cst_142 = arith.constant dense<0.000000e+00> : vector<8x64xf32>
    %141 = tpu.matmul %138, %140, %cst_142 {dimension_numbers = #tpu.dot_dimension_numbers<[1], [0], [0], [1], [0, 0, 1, 1], [], []>} : vector<8x64xbf16>, vector<64x64xbf16>, vector<8x64xf32> -> vector<8x64xf32>
    %142 = arith.addf %137, %141 : vector<8x64xf32>
    %c1_143 = arith.constant 1 : index
    %c0_144 = arith.constant 0 : index
    %143 = vector.load %arg8[%c1_143, %c0_144] : memref<10x64xbf16, #tpu.memory_space<vmem>>, vector<8x64xbf16>
    %c1_145 = arith.constant 1 : index
    %c0_146 = arith.constant 0 : index
    %c0_147 = arith.constant 0 : index
    %144 = vector.load %arg3[%c1_145, %c0_146, %c0_147] : memref<3x64x64xbf16, #tpu.memory_space<vmem>>, vector<1x64x64xbf16>
    %145 = vector.shape_cast %144 : vector<1x64x64xbf16> to vector<64x64xbf16>
    %cst_148 = arith.constant dense<0.000000e+00> : vector<8x64xf32>
    %146 = tpu.matmul %143, %145, %cst_148 {dimension_numbers = #tpu.dot_dimension_numbers<[1], [0], [0], [1], [0, 0, 1, 1], [], []>} : vector<8x64xbf16>, vector<64x64xbf16>, vector<8x64xf32> -> vector<8x64xf32>
    %147 = arith.addf %142, %146 : vector<8x64xf32>
    %c2_149 = arith.constant 2 : index
    %c0_150 = arith.constant 0 : index
    %148 = vector.load %arg8[%c2_149, %c0_150] : memref<10x64xbf16, #tpu.memory_space<vmem>>, vector<8x64xbf16>
    %c2_151 = arith.constant 2 : index
    %c0_152 = arith.constant 0 : index
    %c0_153 = arith.constant 0 : index
    %149 = vector.load %arg3[%c2_151, %c0_152, %c0_153] : memref<3x64x64xbf16, #tpu.memory_space<vmem>>, vector<1x64x64xbf16>
    %150 = vector.shape_cast %149 : vector<1x64x64xbf16> to vector<64x64xbf16>
    %cst_154 = arith.constant dense<0.000000e+00> : vector<8x64xf32>
    %151 = tpu.matmul %148, %150, %cst_154 {dimension_numbers = #tpu.dot_dimension_numbers<[1], [0], [0], [1], [0, 0, 1, 1], [], []>} : vector<8x64xbf16>, vector<64x64xbf16>, vector<8x64xf32> -> vector<8x64xf32>
    %152 = arith.addf %147, %151 : vector<8x64xf32>
    %cst_155 = arith.constant 0.000000e+00 : f32
    %153 = vector.broadcast %cst_155 : f32 to vector<8x64xf32>
    %154 = arith.cmpf oge, %152, %153 : vector<8x64xf32>
    %cst_156 = arith.constant 1.000000e-01 : f32
    %155 = vector.broadcast %cst_156 : f32 to vector<8x64xf32>
    %156 = arith.mulf %155, %152 : vector<8x64xf32>
    %157 = arith.select %154, %152, %156 : vector<8x64xi1>, vector<8x64xf32>
    %158 = arith.truncf %157 : vector<8x64xf32> to vector<8x64xbf16>
    %c1_157 = arith.constant 1 : index
    %c0_158 = arith.constant 0 : index
    %159 = vector.load %arg8[%c1_157, %c0_158] : memref<10x64xbf16, #tpu.memory_space<vmem>>, vector<8x64xbf16>
    tpu.vector_store %arg8[%c1_157, %c0_158], %158 {strides = array<i32>} : memref<10x64xbf16, #tpu.memory_space<vmem>>, vector<8x64xbf16>,
    %cst_159 = arith.constant 0.000000e+00 : f32
    %160 = vector.broadcast %cst_159 : f32 to vector<8x64xf32>
    %c0_160 = arith.constant 0 : index
    %c0_161 = arith.constant 0 : index
    %161 = vector.load %arg8[%c0_160, %c0_161] : memref<10x64xbf16, #tpu.memory_space<vmem>>, vector<8x64xbf16>
    %c0_162 = arith.constant 0 : index
    %c0_163 = arith.constant 0 : index
    %c0_164 = arith.constant 0 : index
    %162 = vector.load %arg3[%c0_162, %c0_163, %c0_164] : memref<3x64x64xbf16, #tpu.memory_space<vmem>>, vector<1x64x64xbf16>
    %163 = vector.shape_cast %162 : vector<1x64x64xbf16> to vector<64x64xbf16>
    %cst_165 = arith.constant dense<0.000000e+00> : vector<8x64xf32>
    %164 = tpu.matmul %161, %163, %cst_165 {dimension_numbers = #tpu.dot_dimension_numbers<[1], [0], [0], [1], [0, 0, 1, 1], [], []>} : vector<8x64xbf16>, vector<64x64xbf16>, vector<8x64xf32> -> vector<8x64xf32>
    %165 = arith.addf %160, %164 : vector<8x64xf32>
    %c1_166 = arith.constant 1 : index
    %c0_167 = arith.constant 0 : index
    %166 = vector.load %arg8[%c1_166, %c0_167] : memref<10x64xbf16, #tpu.memory_space<vmem>>, vector<8x64xbf16>
    %c1_168 = arith.constant 1 : index
    %c0_169 = arith.constant 0 : index
    %c0_170 = arith.constant 0 : index
    %167 = vector.load %arg3[%c1_168, %c0_169, %c0_170] : memref<3x64x64xbf16, #tpu.memory_space<vmem>>, vector<1x64x64xbf16>
    %168 = vector.shape_cast %167 : vector<1x64x64xbf16> to vector<64x64xbf16>
    %cst_171 = arith.constant dense<0.000000e+00> : vector<8x64xf32>
    %169 = tpu.matmul %166, %168, %cst_171 {dimension_numbers = #tpu.dot_dimension_numbers<[1], [0], [0], [1], [0, 0, 1, 1], [], []>} : vector<8x64xbf16>, vector<64x64xbf16>, vector<8x64xf32> -> vector<8x64xf32>
    %170 = arith.addf %165, %169 : vector<8x64xf32>
    %c2_172 = arith.constant 2 : index
    %c0_173 = arith.constant 0 : index
    %171 = vector.load %arg8[%c2_172, %c0_173] : memref<10x64xbf16, #tpu.memory_space<vmem>>, vector<8x64xbf16>
    %c2_174 = arith.constant 2 : index
    %c0_175 = arith.constant 0 : index
    %c0_176 = arith.constant 0 : index
    %172 = vector.load %arg3[%c2_174, %c0_175, %c0_176] : memref<3x64x64xbf16, #tpu.memory_space<vmem>>, vector<1x64x64xbf16>
    %173 = vector.shape_cast %172 : vector<1x64x64xbf16> to vector<64x64xbf16>
    %cst_177 = arith.constant dense<0.000000e+00> : vector<8x64xf32>
    %174 = tpu.matmul %171, %173, %cst_177 {dimension_numbers = #tpu.dot_dimension_numbers<[1], [0], [0], [1], [0, 0, 1, 1], [], []>} : vector<8x64xbf16>, vector<64x64xbf16>, vector<8x64xf32> -> vector<8x64xf32>
    %175 = arith.addf %170, %174 : vector<8x64xf32>
    %cst_178 = arith.constant 0.000000e+00 : f32
    %176 = vector.broadcast %cst_178 : f32 to vector<8x64xf32>
    %177 = arith.cmpf oge, %175, %176 : vector<8x64xf32>
    %cst_179 = arith.constant 1.000000e-01 : f32
    %178 = vector.broadcast %cst_179 : f32 to vector<8x64xf32>
    %179 = arith.mulf %178, %175 : vector<8x64xf32>
    %180 = arith.select %177, %175, %179 : vector<8x64xi1>, vector<8x64xf32>
    %181 = arith.addf %42, %180 : vector<8x64xf32>
    %182 = arith.truncf %181 : vector<8x64xf32> to vector<8x64xbf16>
    %c1_180 = arith.constant 1 : index
    %c0_181 = arith.constant 0 : index
    %183 = vector.load %arg8[%c1_180, %c0_181] : memref<10x64xbf16, #tpu.memory_space<vmem>>, vector<8x64xbf16>
    tpu.vector_store %arg8[%c1_180, %c0_181], %182 {strides = array<i32>} : memref<10x64xbf16, #tpu.memory_space<vmem>>, vector<8x64xbf16>,
    %c0_182 = arith.constant 0 : index
    %c0_183 = arith.constant 0 : index
    %184 = vector.load %arg8[%c0_182, %c0_183] : memref<10x64xbf16, #tpu.memory_space<vmem>>, vector<8x64xbf16>
    %c1_184 = arith.constant 1 : index
    %c0_185 = arith.constant 0 : index
    %185 = vector.load %arg8[%c1_184, %c0_185] : memref<10x64xbf16, #tpu.memory_space<vmem>>, vector<8x64xbf16>
    %c2_186 = arith.constant 2 : index
    %c0_187 = arith.constant 0 : index
    %186 = vector.load %arg8[%c2_186, %c0_187] : memref<10x64xbf16, #tpu.memory_space<vmem>>, vector<8x64xbf16>
    %187 = tpu.concatenate %184, %185, %186 in 1 : vector<8x64xbf16>, vector<8x64xbf16>, vector<8x64xbf16> -> vector<8x192xbf16>
    %c0_188 = arith.constant 0 : index
    %c0_189 = arith.constant 0 : index
    %c0_190 = arith.constant 0 : index
    %188 = vector.load %arg5[%c0_188, %c0_189, %c0_190] : memref<1x8x192xbf16, #tpu.memory_space<vmem>>, vector<1x8x192xbf16>
    %189 = vector.shape_cast %188 : vector<1x8x192xbf16> to vector<8x192xbf16>
    %190 = vector.shape_cast %187 : vector<8x192xbf16> to vector<1x8x192xbf16>
    tpu.vector_store %arg5[%c0_188, %c0_189, %c0_190], %190 {strides = array<i32>} : memref<1x8x192xbf16, #tpu.memory_space<vmem>>, vector<1x8x192xbf16>,
    %c0_191 = arith.constant 0 : index
    %c0_192 = arith.constant 0 : index
    %191 = vector.load %arg4[%c0_191, %c0_192] : memref<192x256xbf16, #tpu.memory_space<vmem>>, vector<192x256xbf16>
    %cst_193 = arith.constant dense<0.000000e+00> : vector<8x256xf32>
    %192 = tpu.matmul %187, %191, %cst_193 {dimension_numbers = #tpu.dot_dimension_numbers<[1], [0], [0], [1], [0, 0, 1, 1], [], []>} : vector<8x192xbf16>, vector<192x256xbf16>, vector<8x256xf32> -> vector<8x256xf32>
    %c0_194 = arith.constant 0 : index
    %c0_195 = arith.constant 0 : index
    %c0_196 = arith.constant 0 : index
    %193 = vector.load %arg6[%c0_194, %c0_195, %c0_196] : memref<1x8x256xf32, #tpu.memory_space<vmem>>, vector<1x8x256xf32>
    %194 = vector.shape_cast %193 : vector<1x8x256xf32> to vector<8x256xf32>
    %195 = vector.shape_cast %192 : vector<8x256xf32> to vector<1x8x256xf32>
    tpu.vector_store %arg6[%c0_194, %c0_195, %c0_196], %195 {strides = array<i32>} : memref<1x8x256xf32, #tpu.memory_space<vmem>>, vector<1x8x256xf32>,
    return
  }
  func.func @transform_0(%arg0: i32) -> (i32, i32, i32) {
    %c0_i32 = arith.constant 0 : i32
    %c0_i32_0 = arith.constant 0 : i32
    %c0_i32_1 = arith.constant 0 : i32
    return %arg0, %c0_i32, %c0_i32_0 : i32, i32, i32
  }
  func.func @transform_1(%arg0: i32) -> (i32, i32, i32) {
    %c0_i32 = arith.constant 0 : i32
    %c0_i32_0 = arith.constant 0 : i32
    %c0_i32_1 = arith.constant 0 : i32
    %c0_i32_2 = arith.constant 0 : i32
    return %c0_i32, %c0_i32_0, %c0_i32_1 : i32, i32, i32
  }
  func.func @transform_2(%arg0: i32) -> (i32, i32, i32) {
    %c0_i32 = arith.constant 0 : i32
    %c0_i32_0 = arith.constant 0 : i32
    %c0_i32_1 = arith.constant 0 : i32
    %c0_i32_2 = arith.constant 0 : i32
    return %c0_i32, %c0_i32_0, %c0_i32_1 : i32, i32, i32
  }
  func.func @transform_3(%arg0: i32) -> (i32, i32) {
    %c0_i32 = arith.constant 0 : i32
    %c0_i32_0 = arith.constant 0 : i32
    %c0_i32_1 = arith.constant 0 : i32
    return %c0_i32, %c0_i32_0 : i32, i32
  }
  func.func @transform_4(%arg0: i32) -> (i32, i32, i32) {
    %c0_i32 = arith.constant 0 : i32
    %c0_i32_0 = arith.constant 0 : i32
    %c0_i32_1 = arith.constant 0 : i32
    return %arg0, %c0_i32, %c0_i32_0 : i32, i32, i32
  }
  func.func @transform_5(%arg0: i32) -> (i32, i32, i32) {
    %c0_i32 = arith.constant 0 : i32
    %c0_i32_0 = arith.constant 0 : i32
    %c0_i32_1 = arith.constant 0 : i32
    return %arg0, %c0_i32, %c0_i32_0 : i32, i32, i32
  }
}

</mosaic_0001>

<bundles_post_ra>
// kernel: kernel_predictor_forward.2
= control target key start
LH: loop header
LB: loop body
LE: loop exit
PB: predicated region body
PF: predicated region fallthrough
CT: control target
= control target key end

     0   :  { %11 = vsyncpa [#allocation5], 0  ;;  %s3306_s0 = inlined_call_operand.hbm [shape: f32[2,8,80], index: 0, kind: input, shape index: {}]   ;;  %s3307_s1 = inlined_call_operand.vmem [shape: bf16[5,80,64], index: 1, kind: input, shape index: {}]   ;;  %s3308_s2 = inlined_call_operand.hbm [shape: bf16[3,64,64], index: 2, kind: input, shape index: {}]   ;;  %s3309_s3 = inlined_call_operand.hbm [shape: bf16[192,256], index: 3, kind: input, shape index: {}]   ;;  %s3310_s4 = inlined_call_operand.vmem [shape: bf16[2,8,192], index: 4, kind: output, shape index: {0}]   ;;  %s3311_s5 = inlined_call_operand.vmem [shape: f32[2,8,256], index: 5, kind: output, shape index: {1}]  }
   0x1   :  { %13 = vsyncpa [#allocation5 + $0x1], 0 }
   0x2   :  { %14 = vsyncpa [#allocation7], 0  ;;  %s3041_s18 = smov 0   ;;  %s3043_s19 = smov 0  }
   0x3   :  { %s3045_s20 = smov 0   ;;  %s3047_s21 = smov 0  }
   0x4 LB: > { %s180_s24 = sshll.u32 %s3308_s2, 4  ;;  %s3065_s25 = sadd.s32 4294967295, %s3001_s21   ;;  %s3001_s21 = sphi %s3047_s21, %s3322_s21   ;;  %s2997_s20 = sphi %s3045_s20, %s3321_s20   ;;  %s2993_s19 = sphi %s3043_s19, %s3320_s19   ;;  %s2989_s18 = sphi %s3041_s18, %s3319_s18   ;;  %s181_s24 = int_to_ptr.hbm [resolvable:$true] %s180_s24 }
   0x5   : > { %p2119_p0 = scmp.ge.s32.totalorder %s3001_s21, 1  ;;  %p41_p1 = scmp.eq.s32.totalorder %s3065_s25, 0 }
   0x6   : > { %p166_p2 = scmp.lt.s32.totalorder %s3001_s21, 3  ;;  %s3003_s27 = smov [#allocation6]  }
   0x7   : > { %s182_s28 = sshll.u32 %s3003_s27, 4  ;;  %s194_s6 = sshll.u32 %s3309_s3, 4  ;;  %s183_s28 = int_to_ptr.vmem [resolvable:$true] %s182_s28  ;;  %s195_s6 = int_to_ptr.hbm [resolvable:$true] %s194_s6 }
   0x8   : > { %p3070_p3 = pnand %p2119_p0, %p166_p2  ;;  %s3004_s7 = smov [#allocation8]  }
   0x9   : > { %s196_s8 = sshll.u32 %s3004_s7, 4  ;;  %s3005_s9 = smov 64   ;;  %s197_s8 = int_to_ptr.vmem [resolvable:$true] %s196_s8 }
   0xa   : > { %p2817_p4 = pneg %p3070_p3  ;;  %s3006_s10 = smov 4  }
   0xb   : > { %s3007_s11 = smov 128   ;;  %s3008_s12 = smov 8  }
   0xc   : > { %p2818_p5 = pnand %p2817_p4, %p41_p1  ;;  %s3082_s13 = sadd.s32 1, %s3001_s21  }
   0xd   : > { %s24_s14 = ssub.s32 %s3001_s21, %s3082_s13  ;;  %s27_s15 = sadd.s32 1, %s2997_s20 }
   0xe   : > { %2820 = dma.hbm_to_vmem [thread:$0]  (!%p2818_p5), %s181_s24, 1536, %s183_s28, [#allocation7], %s3005_s9, %s3005_s9, %s3006_s10  }
   0xf   : > { %2823 = dma.hbm_to_vmem [thread:$0]  (!%p2818_p5), %s195_s6, 3072, %s197_s8, [#allocation7], %s3007_s11, %s3007_s11, %s3008_s12  }
  0x10   : > { %p25_p6 = scmp.eq.s32.totalorder %s24_s14, 0  ;;  %p34_p7 = scmp.ne.s32.totalorder %s2997_s20, %s2993_s19 }
  0x11   : > { %p35_p8 = scmp.eq.s32.totalorder %s3001_s21, 0  ;;  %p40_p9 = scmp.ne.s32.totalorder %s2993_s19, %s2989_s18 }
  0x12   : > { %s3093_s16 = scalar_select %p25_p6, %s2997_s20, %s27_s15  }
  0x13   : > { %p3097_p10 = por %p41_p1, %p40_p9  ;;  %p2830_p11 = scmp.lt.s32.totalorder %s3001_s21, 2 }
  0x14   : > { %s210_s22 = sand.u32 1, %s2997_s20   ;;  %s2124_s23 = sshll.u32 %s3001_s21, 3 }
  0x15   : > { %p36_p12 = por %p35_p8, %p34_p7  ;;  %s2123_s24 = sshll.u32 %s210_s22, 3 }
  0x16   : > { %s218_s29 = scalar_lea.hbm %s3306_s0, %s2124_s23  ;;  %s214_s6 = scalar_lea.vmem [#allocation4], %s2123_s24 }
  0x17   : > { %s220_s30 = sshll.u32 %s218_s29, 4  ;;  %s222_s7 = sshll.u32 %s214_s6, 4  ;;  %s221_s30 = int_to_ptr.hbm [resolvable:$true] %s220_s30  ;;  %s223_s7 = int_to_ptr.vmem [resolvable:$true] %s222_s7 }
  0x18   : > { %p3107_p13 = pnand %p2830_p11, %p36_p12  ;;  %s211_s8 = scalar_lea.sflag [#allocation5], %s210_s22 }
  0x19   : > { %s2933_s9 = sshra.s32 %s221_s30, 4  ;;  %s2940_s12 = scalar_lea.hbm %s3306_s0, 16  ;;  %s2934_s9 = int_to_ptr.hbm [resolvable:$true] %s2933_s9 }
  0x1a   : > { %s2935_s21 = scalar_lea.hbm %s2934_s9, 8  ;;  %p2937_p2 = pneg %p3107_p13 }
  0x1b   : > { %p2936_p0 = scmp.ne.s32.totalorder %s2934_s9, %s2935_s21  ;;  %p2941_p6 = scmp.lt.s32.totalorder %s2934_s9, %s3306_s0 }
  0x1c   : > { %p2942_p7 = scmp.lt.s32.totalorder %s2940_s12, %s2935_s21 }
  0x1d   : > { %p2938_p4 = pnand %p2937_p2, %p2936_p0 }
  0x1e   : > { %p2943_p8 = por %p2942_p7, %p2941_p6 }
  0x1f   : > { %p2939_p5 = pneg %p2938_p4 }
  0x21   : > { %p2944_p9 = pnand %p2943_p8, %p2939_p5 }
  0x23   : > { %2947 = shalt.err (!%p2944_p9)
}
  0x24   : > { %2827 = dma.hbm_to_vmem [thread:$0]  (!%p3107_p13), %s221_s30, 128, %s223_s7, %s211_s8  }
  0x25   : > { %231 = sbr.rel (%p3070_p3) target bundleno = 1485 (0x5cd), region = 36  ;;  %s233_s22 = sand.u32 (!%p3070_p3), 1, %s2993_s19  }
  0x26   : > { %s2126_s23 = sshll.u32 (!%p3070_p3), %s233_s22, 3  ;;  %s234_s24 = scalar_lea.sflag (!%p3070_p3), [#allocation5], %s233_s22 }
  0x27   : > { %s237_s27 = scalar_lea.vmem (!%p3070_p3), [#allocation4], %s2126_s23 }
  0x2a   : > { %2980 = dma.done.wait (%p3097_p10), %s234_s24, 128  }
  0x2b   : > { %2982 = vsyncadd (%p3097_p10), %s234_s24, 4294967168 }
  0x2c   : > { %2984 = dma.done.wait (%p41_p1), [#allocation7], 4608  }
  0x2d   : > { %2986 = vsyncadd (%p41_p1), [#allocation7], 4294962688  ;;  %vm291_vm0 = vcmask 647168   ;;  %v3009_v0 = vmov 0   ;;  %vm293_vm1 = vcmask 648193   ;;  %v2700_v1 = vld [vmem:[%s3307_s1 + $0x70] sm:$0xff] }
  0x2e   : > { %292 = vst.msk [vmem:[#allocation2] sm:$0x1] %vm291_vm0, %v3009_v0  ;;  %v2695_v2 = vld [vmem:[%s3307_s1 + $0x48] sm:$0xff]  ;;  %v2690_v3 = vld [vmem:[%s3307_s1 + $0x20] sm:$0xff]  ;;  %v2705_v4 = vld [vmem:[%s3307_s1 + $0x98] sm:$0xff]  ;;  %496 = vmatpush.bf16.msra.mxu2 %v2700_v1  ;;  %vm313_vm2 = vcmask 650241  }
  0x2f   : > { %294 = vst.msk [vmem:[#allocation2 + $0x4] sm:$0x2] %vm293_vm1, %v3009_v0  ;;  %388 = vmatpush.bf16.msra.mxu0 %v2695_v2  ;;  %v2699_v5 = vld [vmem:[%s3307_s1 + $0x68] sm:$0xff]  ;;  %v2694_v6 = vld [vmem:[%s3307_s1 + $0x40] sm:$0xff]  ;;  %434 = vmatpush.bf16.msra.mxu1 %v2690_v3  ;;  %v2689_v7 = vld [vmem:[%s3307_s1 + $0x18] sm:$0xff]  ;;  %vm381_vm3 = vcmask 654336  }
  0x30   : > { %566 = vmatpush.bf16.msra.mxu3 %v2705_v4  ;;  %v2704_v8 = vld [vmem:[%s3307_s1 + $0x90] sm:$0xff]  ;;  %v2698_v9 = vld [vmem:[%s3307_s1 + $0x60] sm:$0xff]  ;;  %v2693_v10 = vld [vmem:[%s3307_s1 + $0x38] sm:$0xff]  ;;  %vm295_vm4 = vcmask 516096   ;;  %vm296_vm5 = vsmask.f32 256 }
  0x31   : > { %v306_v11 = vld [vmem:[%s237_s27] sm:$0xff]  ;;  %v2703_v13 = vld [vmem:[%s3307_s1 + $0x88] sm:$0xff]  ;;  %v2702_v19 = vld [vmem:[%s3307_s1 + $0x80] sm:$0xff]  ;;  %vm301_vm7 = vsmask.f32 7938  ;;  %vm654_vm10 = vcmask 519168  }
  0x32   : > { %497 = vmatpush.bf16.msra.mxu2 %v2699_v5  ;;  %v2688_v12 = vld [vmem:[%s3307_s1 + $0x10] sm:$0xff]  ;;  %v307_v14 = vpack.c.bf16 %v306_v11, %v306_v11  ;;  %v2697_v16 = vld [vmem:[%s3307_s1 + $0x58] sm:$0xff]  ;;  %v2687_v18 = vld [vmem:[%s3307_s1 + $0x8] sm:$0xff]  ;;  %vm717_vm12 = vcmask 523264   ;;  %s3010_s21 = smov 64   ;;  %p280_p1 = scmp.lt.s32.totalorder %s3065_s25, 1 }
  0x33   : > { %389 = vmatpush.bf16.msra.mxu0 %v2694_v6  ;;  %435 = vmatpush.bf16.msra.mxu1 %v2689_v7  ;;  %v2692_v17 = vld [vmem:[%s3307_s1 + $0x30] sm:$0xff]  ;;  %v2691_v22 = vld [vmem:[%s3307_s1 + $0x28] sm:$0xff]  ;;  %v2686_v23 = vld [vmem:[%s3307_s1] sm:$0xff] }
  0x34   : > { %567 = vmatpush.bf16.msra.mxu3 %v2704_v8  ;;  %v309_v15 = vrot.slane %v307_v14, 7  ;;  %v2696_v21 = vld [vmem:[%s3307_s1 + $0x50] sm:$0xff]  ;;  %v2701_v24 = vld [vmem:[%s3307_s1 + $0x78] sm:$0xff]  ;;  %v2710_v25 = vld [vmem:[%s3307_s1 + $0xc0] sm:$0xff]  ;;  %s3324_s25 = smov (!%p280_p1, %s3065_s25), 1 }
  0x35   : > { %v2709_v32 = vld [vmem:[%s3307_s1 + $0xb8] sm:$0xff]  ;;  %v2708_v38 = vld [vmem:[%s3307_s1 + $0xb0] sm:$0xff]  ;;  %v2707_v47 = vld [vmem:[%s3307_s1 + $0xa8] sm:$0xff]  ;;  %s2684_s10 = sshll.u32 %s3324_s25, 3  ;;  %s2685_s15 = sshll.u32 %s3324_s25, 4 }
  0x36   : > { %498 = vmatpush.bf16.msra.mxu2 %v2698_v9  ;;  %v310_v20 = vrot.slane %v309_v15, 4  ;;  %314 = vst.msk [vmem:[#allocation2] sm:$0xe] %vm313_vm2, %v309_v15  ;;  %v2706_v50 = vld [vmem:[%s3307_s1 + $0xa0] sm:$0xff]  ;;  %v298_v55 = vld [vmem:[#allocation3] sm:$0x1]  ;;  %vm3214_vm6 = vmand %vm295_vm4, %vm296_vm5  ;;  %s284_s14 = scalar_lea.vmem %s3310_s4, %s2684_s10  ;;  %s289_s24 = scalar_lea.vmem %s3311_s5, %s2685_s15 }
  0x37   : > { %390 = vmatpush.bf16.msra.mxu0 %v2693_v10  ;;  %436 = vmatpush.bf16.msra.mxu1 %v2688_v12  ;;  %v303_v57 = vld [vmem:[#allocation3 + $0x4] sm:$0x1]  ;;  %v299_v58 = vsel %vm3214_vm6, 0, %v298_v55  ;;  %vm302_vm8 = vmand %vm295_vm4, %vm301_vm7  ;;  %v2714_v61 = vld [vmem:[#allocation6 + $0x18] sm:$0xff]  ;;  %vm1795_vm4 = vcmask 523268  }
  0x38   : > { %568 = vmatpush.bf16.msra.mxu3 %v2703_v13  ;;  %315 = vst.msk [vmem:[#allocation2 + $0x4] sm:$0x1] %vm291_vm0, %v310_v20  ;;  %v304_v59 = vsel %vm302_vm8, 0, %v303_v57  ;;  %v2713_v62 = vld [vmem:[#allocation6 + $0x10] sm:$0xff]  ;;  %v2722_v63 = vld [vmem:[#allocation6 + $0x58] sm:$0xff]  ;;  %v2712_v1 = vld [vmem:[#allocation6 + $0x8] sm:$0xff] }
  0x39   : > { %300 = vst [vmem:[#allocation3] sm:$0x1] %v299_v58  ;;  %v2718_v3 = vld [vmem:[#allocation6 + $0x38] sm:$0xff]  ;;  %v2721_v4 = vld [vmem:[#allocation6 + $0x50] sm:$0xff]  ;;  %v2711_v5 = vld [vmem:[#allocation6] sm:$0xff] }
  0x3a   : > { %499 = vmatpush.bf16.msra.mxu2 %v2697_v16  ;;  %305 = vst [vmem:[#allocation3 + $0x4] sm:$0x1] %v304_v59  ;;  %v2717_v7 = vld [vmem:[#allocation6 + $0x30] sm:$0xff]  ;;  %v2720_v8 = vld [vmem:[#allocation6 + $0x48] sm:$0xff]  ;;  %v2719_v11 = vld [vmem:[#allocation6 + $0x40] sm:$0xff] }
  0x3b   : > { %391 = vmatpush.bf16.msra.mxu0 %v2692_v17  ;;  %437 = vmatpush.bf16.msra.mxu1 %v2687_v18  ;;  %v2716_v10 = vld [vmem:[#allocation6 + $0x28] sm:$0xff]  ;;  %v2715_v15 = vld [vmem:[#allocation6 + $0x20] sm:$0xff]  ;;  %vm3226_vm11 = vmand %vm654_vm10, %vm301_vm7 }
  0x3c   : > { %569 = vmatpush.bf16.msra.mxu3 %v2702_v19  ;;  %v2729_v55 = vld [vmem:[#allocation6 + $0x30] sm:$0xff]  ;;  %v2732_v57 = vld [vmem:[#allocation6 + $0x48] sm:$0xff]  ;;  %v2731_v59 = vld [vmem:[#allocation6 + $0x40] sm:$0xff] }
  0x3d   : > { %v444_v26 = vld [vmem:[#allocation2] sm:$0xe]  ;;  %v2728_v58 = vld [vmem:[#allocation6 + $0x28] sm:$0xff]  ;;  %v2594_v56 = vld [vmem:[#allocation8 + $0x10] sm:$0xf] }
  0x3e   : > { %500 = vmatpush.bf16.msra.mxu2 %v2696_v21  ;;  %v316_v27 = vld [vmem:[#allocation2] sm:$0xf]  ;;  %v457_v28 = vunpack.c.l.b16 %v444_v26 }
  0x3f   : > { %392 = vmatpush.bf16.msra.mxu0 %v2691_v22  ;;  %438 = vmatpush.bf16.msra.mxu1 %v2686_v23  ;;  %v341_v29 = vunpack.c.l.b16 %v316_v27  ;;  %v327_v30 = vld [vmem:[#allocation2 + $0x4] sm:$0x1]  ;;  %v577_v51 = vld [vmem:[#allocation2] sm:$0xc] }
  0x40   : > { %570 = vmatpush.bf16.msra.mxu3 %v2701_v24  ;;  %v507_v31 = vld [vmem:[#allocation2 + $0x4] sm:$0x3]  ;;  %v342_v33 = vunpack.c.l.b16 %v327_v30  ;;  %v590_v52 = vunpack.c.l.b16 %v577_v51  ;;  %v2724_v51 = vld [vmem:[#allocation6 + $0x8] sm:$0xff] }
  0x41   : > { %v520_v34 = vunpack.c.l.b16 %v507_v31  ;;  %v659_v30 = vld [vmem:[#allocation3 + $0x4] sm:$0x1] }
  0x42   : > { %2184 = vmatmul.msk.bf16.vlgmr.msra.gmra.mxu1 %vm381_vm3, %v316_v27  ;;  %v458_v35 = vpack.c.b16 %v342_v33, %v457_v28  ;;  %v343_v36 = vpack.c.b16 %v342_v33, %v341_v29  ;;  %765 = vmatpush.bf16.msrb.mxu2 %v2714_v61  ;;  %v656_v29 = vld [vmem:[#allocation3] sm:$0xf]  ;;  %v2727_v61 = vld [vmem:[#allocation6 + $0x20] sm:$0xff] }
  0x43   : > { %629 = vmatpush.bf16.msrb.mxu0 %v2710_v25  ;;  %v521_v37 = vpack.c.b16 %v520_v34, %v457_v28  ;;  %v591_v53 = vpack.c.b16 %v520_v34, %v590_v52  ;;  %725 = vmatpush.bf16.msrb.mxu1 %v2718_v3  ;;  %v2730_v52 = vld [vmem:[#allocation6 + $0x38] sm:$0xff]  ;;  %v2604_v28 = vld [vmem:[#allocation8 + $0x28] sm:$0xf0] }
  0x44   : > { %v459_v39 = vrot.slane %v458_v35, 1  ;;  %v345_v40 = vshrl.u32 %v343_v36, 16  ;;  %v347_v41 = vshll.u32 %v343_v36, 16  ;;  %819 = vmatpush.bf16.msrb.mxu3 %v2722_v63 }
  0x45   : > { %v523_v42 = vshrl.u32 %v521_v37, 16  ;;  %v526_v43 = vshll.u32 %v521_v37, 16  ;;  %v592_v54 = vrot.slane %v591_v53, 2  ;;  %v2733_v53 = vld [vmem:[#allocation6 + $0x50] sm:$0xff] }
  0x46   : > { %2215 = vmatmul.msk.bf16.vlgmr.msra.gmra.mxu2 %vm381_vm3, %v459_v39  ;;  %v349_v44 = vrot.slane %v347_v41, 1 }
  0x47   : > { %630 = vmatpush.bf16.msrb.mxu0 %v2709_v32  ;;  %v525_v45 = vrot.slane %v523_v42, 1  ;;  %v528_v46 = vrot.slane %v526_v43, 2  ;;  %766 = vmatpush.bf16.msrb.mxu2 %v2713_v62 }
  0x48   : > { %v350_v48 = vor.u32 %v349_v44, %v345_v40  ;;  %820 = vmatpush.bf16.msrb.mxu3 %v2721_v4  ;;  %726 = vmatpush.bf16.msrb.mxu1 %v2717_v7 }
  0x49   : > { %v529_v49 = vor.u32 %v528_v46, %v525_v45 }
  0x4a   : > { %2163 = vmatmul.msk.bf16.vlgmr.msra.gmra.mxu0 %vm381_vm3, %v350_v48  ;;  %v2726_v48 = vld [vmem:[#allocation6 + $0x18] sm:$0xff] }
  0x4b   : > { %631 = vmatpush.bf16.msrb.mxu0 %v2708_v38  ;;  %2246 = vmatmul.msk.bf16.vlgmr.msra.gmra.mxu3 %vm381_vm3, %v529_v49  ;;  %v2725_v49 = vld [vmem:[#allocation6 + $0x10] sm:$0xff] }
  0x4c   : > { %767 = vmatpush.bf16.msrb.mxu2 %v2712_v1  ;;  %821 = vmatpush.bf16.msrb.mxu3 %v2720_v8 }
  0x4d   : > { %727 = vmatpush.bf16.msrb.mxu1 %v2716_v10 }
  0x4f   : > { %632 = vmatpush.bf16.msrb.mxu0 %v2707_v47 }
  0x50   : > { %768 = vmatpush.bf16.msrb.mxu2 %v2711_v5  ;;  %822 = vmatpush.bf16.msrb.mxu3 %v2719_v11 }
  0x51   : > { %728 = vmatpush.bf16.msrb.mxu1 %v2715_v15 }
  0x53   : > { %633 = vmatpush.bf16.msrb.mxu0 %v2706_v50  ;;  %v2734_v50 = vld [vmem:[#allocation6 + $0x58] sm:$0xff] }
  0x54   : > { %949 = vmatpush.bf16.msra.mxu2 %v2726_v48  ;;  %1002 = vmatpush.bf16.msra.mxu3 %v2734_v50 }
  0x55   : > { %909 = vmatpush.bf16.msra.mxu1 %v2730_v52 }
  0x58   : > { %950 = vmatpush.bf16.msra.mxu2 %v2725_v49  ;;  %1003 = vmatpush.bf16.msra.mxu3 %v2733_v53 }
  0x59   : > { %910 = vmatpush.bf16.msra.mxu1 %v2729_v55 }
  0x5a   : > { %2277 = vmatmul.msk.bf16.vlgmr.msrb.gmra.mxu0 %vm381_vm3, %v592_v54  ;;  %v2723_v54 = vld [vmem:[#allocation6] sm:$0xff]  ;;  %vm1794_vm3 = vcmask 1043456  }
  0x5b   : > { %vm1796_vm5 = vmor %vm1795_vm4, %vm1794_vm3 }
  0x5c   : > { %951 = vmatpush.bf16.msra.mxu2 %v2724_v51  ;;  %1004 = vmatpush.bf16.msra.mxu3 %v2732_v57 }
  0x5d   : > { %911 = vmatpush.bf16.msra.mxu1 %v2728_v58 }
  0x60   : > { %952 = vmatpush.bf16.msra.mxu2 %v2723_v54  ;;  %1005 = vmatpush.bf16.msra.mxu3 %v2731_v59 }
  0x61   : > { %912 = vmatpush.bf16.msra.mxu1 %v2727_v61 }
  0xbf   : > { %v440_v60 = vpop.f32.mrf.mxu1 }
  0xc7   : > { %v442_v0 = vpop.f32.mrf.mxu1  ;;  %v394_v2 = vpop.f32.mrf.mxu0 }
  0xc8   : > { %v441_v13 = vadd.f32 %v440_v60, %v394_v2 }
  0xc9   : > { %v502_v6 = vpop.f32.mrf.mxu2 }
  0xca   : > { %v506_v16 = vadd.f32 %v502_v6, %v441_v13 }
  0xce   : > { %v572_v9 = vpop.f32.mrf.mxu3 }
  0xcf   : > { %v396_v12 = vpop.f32.mrf.mxu0  ;;  %v576_v17 = vadd.f32 %v572_v9, %v506_v16 }
  0xd1   : > { %v504_v14 = vpop.f32.mrf.mxu2 }
  0xd6   : > { %v574_v18 = vpop.f32.mrf.mxu3 }
  0xd7   : > { %v635_v19 = vpop.f32.mrf.mxu0 }
  0xd8   : > { %v639_v20 = vadd.f32 %v635_v19, %v576_v17 }
  0xda   : > { %vm640_vm9 = vcmp.ge.f32.partialorder %v639_v20, 0.0  ;;  %v641_v21 = vmul.f32 0.1, %v639_v20 }
  0xdc   : > { %v3221_v22 = vsel %vm640_vm9, %v639_v20, %v641_v21 }
  0xdd   : > { %v643_v23 = vpack.c.bf16 %v3221_v22, %v3221_v22 }
  0xdf   : > { %v645_v24 = vshrl.u32 %v643_v23, 16  ;;  %v637_v25 = vpop.f32.mrf.mxu0  ;;  %v648_v27 = vshll.u32 %v643_v23, 16 }
  0xe1   : > { %v647_v26 = vrot.slane %v645_v24, 7 }
  0xe3   : > { %v650_v31 = vor.u32 %v648_v27, %v647_v26  ;;  %v651_v32 = vrot.slane %v647_v26, 4 }
  0xe5   : > { %v657_v33 = vsel %vm3226_vm11, %v650_v31, %v656_v29  ;;  %v660_v34 = vsel %vm3214_vm6, %v651_v32, %v659_v30  ;;  %v2738_v31 = vld [vmem:[#allocation6 + $0x18] sm:$0xff]  ;;  %v2737_v32 = vld [vmem:[#allocation6 + $0x10] sm:$0xff] }
  0xe6   : > { %658 = vst [vmem:[#allocation3] sm:$0xf] %v657_v33  ;;  %v2746_v33 = vld [vmem:[#allocation6 + $0x58] sm:$0xff] }
  0xe7   : > { %661 = vst [vmem:[#allocation3 + $0x4] sm:$0x1] %v660_v34  ;;  %v2736_v34 = vld [vmem:[#allocation6 + $0x8] sm:$0xff] }
  0xed   : > { %v662_v35 = vld [vmem:[#allocation3] sm:$0xf] }
  0xee   : > { %v774_v36 = vld [vmem:[#allocation3] sm:$0xe]  ;;  %2311 = vmatmul.msk.bf16.vlgmr.msrb.gmra.mxu2 %vm717_vm12, %v662_v35  ;;  %v671_v37 = vld [vmem:[#allocation3 + $0x4] sm:$0x1]  ;;  %v683_v39 = vunpack.c.l.b16 %v662_v35 }
  0xef   : > { %v785_v38 = vunpack.c.l.b16 %v774_v36  ;;  %v684_v40 = vunpack.c.l.b16 %v671_v37  ;;  %v845_v13 = vld [vmem:[#allocation3 + $0x4] sm:$0x1]  ;;  %1185 = vmatpush.bf16.msrb.mxu2 %v2746_v33  ;;  %v2745_v36 = vld [vmem:[#allocation6 + $0x50] sm:$0xff]  ;;  %v2735_v37 = vld [vmem:[#allocation6] sm:$0xff] }
  0xf1   : > { %v786_v41 = vpack.c.b16 %v684_v40, %v785_v38  ;;  %v685_v42 = vpack.c.b16 %v684_v40, %v683_v39  ;;  %v2741_v38 = vld [vmem:[#allocation6 + $0x30] sm:$0xff]  ;;  %v2744_v39 = vld [vmem:[#allocation6 + $0x48] sm:$0xff] }
  0xf2   : > { %v2740_v40 = vld [vmem:[#allocation6 + $0x28] sm:$0xff] }
  0xf3   : > { %v787_v43 = vrot.slane %v786_v41, 1  ;;  %v689_v44 = vshll.u32 %v685_v42, 16  ;;  %v687_v45 = vshrl.u32 %v685_v42, 16  ;;  %1186 = vmatpush.bf16.msrb.mxu2 %v2745_v36  ;;  %v2743_v41 = vld [vmem:[#allocation6 + $0x40] sm:$0xff] }
  0xf5   : > { %2328 = vmatmul.msk.bf16.vlgmr.msrb.gmra.mxu3 %vm717_vm12, %v787_v43  ;;  %v691_v46 = vrot.slane %v689_v44, 1  ;;  %v2739_v43 = vld [vmem:[#allocation6 + $0x20] sm:$0xff] }
  0xf7   : > { %v692_v47 = vor.u32 %v691_v46, %v687_v45  ;;  %1187 = vmatpush.bf16.msrb.mxu2 %v2744_v39 }
  0xf9   : > { %2294 = vmatmul.msk.bf16.vlgmr.msrb.gmra.mxu1 %vm717_vm12, %v692_v47 }
  0xfa   : > { %1132 = vmatpush.bf16.msrb.mxu1 %v2738_v31 }
  0xfb   : > { %1188 = vmatpush.bf16.msrb.mxu2 %v2743_v41 }
  0xfe   : > { %1133 = vmatpush.bf16.msrb.mxu1 %v2737_v32 }
 0x102   : > { %1134 = vmatpush.bf16.msrb.mxu1 %v2736_v34 }
 0x106   : > { %1135 = vmatpush.bf16.msrb.mxu1 %v2735_v37 }
 0x171   : > { %v770_v60 = vpop.f32.mrf.mxu2 }
 0x176   : > { %v730_v62 = vpop.f32.mrf.mxu1 }
 0x177   : > { %v771_v63 = vadd.f32 %v770_v60, %v730_v62 }
 0x178   : > { %v824_v0 = vpop.f32.mrf.mxu3 }
 0x179   : > { %v828_v1 = vadd.f32 %v824_v0, %v771_v63  ;;  %v772_v2 = vpop.f32.mrf.mxu2 }
 0x17b   : > { %vm829_vm13 = vcmp.ge.f32.partialorder %v828_v1, 0.0  ;;  %v830_v3 = vmul.f32 0.1, %v828_v1 }
 0x17d   : > { %v831_v4 = vsel %vm829_vm13, %v828_v1, %v830_v3 }
 0x17e   : > { %v832_v5 = vpack.c.bf16 %v831_v4, %v831_v4  ;;  %v732_v6 = vpop.f32.mrf.mxu1 }
 0x180   : > { %v834_v7 = vshrl.u32 %v832_v5, 16  ;;  %v826_v8 = vpop.f32.mrf.mxu3  ;;  %v837_v10 = vshll.u32 %v832_v5, 16 }
 0x182   : > { %v836_v9 = vrot.slane %v834_v7, 7 }
 0x184   : > { %v839_v11 = vor.u32 %v837_v10, %v836_v9  ;;  %v840_v12 = vrot.slane %v836_v9, 4 }
 0x186   : > { %v843_v14 = vsel %vm3226_vm11, %v839_v11, %v662_v35  ;;  %v846_v15 = vsel %vm3214_vm6, %v840_v12, %v845_v13  ;;  %v2742_v35 = vld [vmem:[#allocation6 + $0x38] sm:$0xff]  ;;  %v2749_v13 = vld [vmem:[#allocation6 + $0x10] sm:$0xff] }
 0x187   : > { %844 = vst [vmem:[#allocation3] sm:$0xf] %v843_v14  ;;  %1092 = vmatpush.bf16.msra.mxu0 %v2742_v35  ;;  %v2750_v12 = vld [vmem:[#allocation6 + $0x18] sm:$0xff] }
 0x188   : > { %847 = vst [vmem:[#allocation3 + $0x4] sm:$0x1] %v846_v15  ;;  %v2758_v14 = vld [vmem:[#allocation6 + $0x58] sm:$0xff]  ;;  %v2748_v15 = vld [vmem:[#allocation6 + $0x8] sm:$0xff] }
 0x18b   : > { %1093 = vmatpush.bf16.msra.mxu0 %v2741_v38 }
 0x18e   : > { %v848_v16 = vld [vmem:[#allocation3] sm:$0xf] }
 0x18f   : > { %v958_v17 = vld [vmem:[#allocation3] sm:$0xe]  ;;  %2362 = vmatmul.msk.bf16.vlgmr.msra.gmra.mxu2 %vm717_vm12, %v848_v16  ;;  %v857_v18 = vld [vmem:[#allocation3 + $0x4] sm:$0x1]  ;;  %v868_v20 = vunpack.c.l.b16 %v848_v16  ;;  %1094 = vmatpush.bf16.msra.mxu0 %v2740_v40 }
 0x190   : > { %v968_v19 = vunpack.c.l.b16 %v958_v17  ;;  %v869_v21 = vunpack.c.l.b16 %v857_v18  ;;  %v1028_v60 = vld [vmem:[#allocation3 + $0x4] sm:$0x1]  ;;  %v2757_v17 = vld [vmem:[#allocation6 + $0x50] sm:$0xff]  ;;  %v2747_v18 = vld [vmem:[#allocation6] sm:$0xff] }
 0x192   : > { %v969_v23 = vpack.c.b16 %v869_v21, %v968_v19  ;;  %v870_v24 = vpack.c.b16 %v869_v21, %v868_v20  ;;  %v2753_v19 = vld [vmem:[#allocation6 + $0x30] sm:$0xff]  ;;  %v2756_v21 = vld [vmem:[#allocation6 + $0x48] sm:$0xff] }
 0x193   : > { %1095 = vmatpush.bf16.msra.mxu0 %v2739_v43 }
 0x194   : > { %v970_v25 = vrot.slane %v969_v23, 1  ;;  %v874_v26 = vshll.u32 %v870_v24, 16  ;;  %v872_v27 = vshrl.u32 %v870_v24, 16  ;;  %v2752_v23 = vld [vmem:[#allocation6 + $0x28] sm:$0xff]  ;;  %v2755_v24 = vld [vmem:[#allocation6 + $0x40] sm:$0xff] }
 0x196   : > { %2379 = vmatmul.msk.bf16.vlgmr.msra.gmra.mxu3 %vm717_vm12, %v970_v25  ;;  %v876_v29 = vrot.slane %v874_v26, 1  ;;  %v2751_v25 = vld [vmem:[#allocation6 + $0x20] sm:$0xff] }
 0x197   : > { %1315 = vmatpush.bf16.msrb.mxu0 %v2750_v12 }
 0x198   : > { %v877_v30 = vor.u32 %v876_v29, %v872_v27 }
 0x19a   : > { %2345 = vmatmul.msk.bf16.vlgmr.msra.gmra.mxu1 %vm717_vm12, %v877_v30 }
 0x19b   : > { %1316 = vmatpush.bf16.msrb.mxu0 %v2749_v13  ;;  %1368 = vmatpush.bf16.msra.mxu1 %v2758_v14 }
 0x19f   : > { %1317 = vmatpush.bf16.msrb.mxu0 %v2748_v15  ;;  %1369 = vmatpush.bf16.msra.mxu1 %v2757_v17 }
 0x1a3   : > { %1318 = vmatpush.bf16.msrb.mxu0 %v2747_v18  ;;  %1370 = vmatpush.bf16.msra.mxu1 %v2756_v21 }
 0x1a7   : > { %1371 = vmatpush.bf16.msra.mxu1 %v2755_v24 }
 0x212   : > { %v954_v42 = vpop.f32.mrf.mxu2 }
 0x217   : > { %v914_v44 = vpop.f32.mrf.mxu1 }
 0x218   : > { %v955_v45 = vadd.f32 %v954_v42, %v914_v44 }
 0x219   : > { %v1007_v46 = vpop.f32.mrf.mxu3 }
 0x21a   : > { %v1011_v47 = vadd.f32 %v1007_v46, %v955_v45  ;;  %v956_v48 = vpop.f32.mrf.mxu2 }
 0x21c   : > { %vm1012_vm14 = vcmp.ge.f32.partialorder %v1011_v47, 0.0  ;;  %v1013_v49 = vmul.f32 0.1, %v1011_v47 }
 0x21e   : > { %v1014_v50 = vsel %vm1012_vm14, %v1011_v47, %v1013_v49 }
 0x21f   : > { %v1015_v51 = vpack.c.bf16 %v1014_v50, %v1014_v50  ;;  %v916_v52 = vpop.f32.mrf.mxu1 }
 0x221   : > { %v1017_v53 = vshrl.u32 %v1015_v51, 16  ;;  %v1009_v54 = vpop.f32.mrf.mxu3  ;;  %v1020_v57 = vshll.u32 %v1015_v51, 16 }
 0x223   : > { %v1019_v55 = vrot.slane %v1017_v53, 7 }
 0x225   : > { %v1022_v58 = vor.u32 %v1020_v57, %v1019_v55  ;;  %v1023_v59 = vrot.slane %v1019_v55, 4 }
 0x227   : > { %v1026_v61 = vsel %vm3226_vm11, %v1022_v58, %v848_v16  ;;  %v1029_v62 = vsel %vm3214_vm6, %v1023_v59, %v1028_v60  ;;  %v2754_v16 = vld [vmem:[#allocation6 + $0x38] sm:$0xff]  ;;  %v2761_v60 = vld [vmem:[#allocation6 + $0x10] sm:$0xff] }
 0x228   : > { %1027 = vst [vmem:[#allocation3] sm:$0xf] %v1026_v61  ;;  %1275 = vmatpush.bf16.msrb.mxu3 %v2754_v16  ;;  %v2762_v59 = vld [vmem:[#allocation6 + $0x18] sm:$0xff] }
 0x229   : > { %1030 = vst [vmem:[#allocation3 + $0x4] sm:$0x1] %v1029_v62  ;;  %v2770_v61 = vld [vmem:[#allocation6 + $0x58] sm:$0xff] }
 0x22c   : > { %1276 = vmatpush.bf16.msrb.mxu3 %v2753_v19 }
 0x22f   : > { %v1031_v63 = vld [vmem:[#allocation3] sm:$0xf] }
 0x230   : > { %v1141_v0 = vld [vmem:[#allocation3] sm:$0xe]  ;;  %2413 = vmatmul.msk.bf16.vlgmr.msrb.gmra.mxu1 %vm717_vm12, %v1031_v63  ;;  %v1040_v1 = vld [vmem:[#allocation3 + $0x4] sm:$0x1]  ;;  %v1051_v3 = vunpack.c.l.b16 %v1031_v63  ;;  %1277 = vmatpush.bf16.msrb.mxu3 %v2752_v23 }
 0x231   : > { %v1151_v2 = vunpack.c.l.b16 %v1141_v0  ;;  %v1052_v4 = vunpack.c.l.b16 %v1040_v1  ;;  %v1211_v42 = vld [vmem:[#allocation3 + $0x4] sm:$0x1]  ;;  %v2766_v0 = vld [vmem:[#allocation6 + $0x38] sm:$0xff]  ;;  %v2769_v1 = vld [vmem:[#allocation6 + $0x50] sm:$0xff] }
 0x232   : > { %1458 = vmatpush.bf16.msra.mxu2 %v2766_v0 }
 0x233   : > { %v1152_v5 = vpack.c.b16 %v1052_v4, %v1151_v2  ;;  %v1053_v6 = vpack.c.b16 %v1052_v4, %v1051_v3  ;;  %v2759_v2 = vld [vmem:[#allocation6] sm:$0xff]  ;;  %v2765_v3 = vld [vmem:[#allocation6 + $0x30] sm:$0xff]  ;;  %v2768_v4 = vld [vmem:[#allocation6 + $0x48] sm:$0xff] }
 0x234   : > { %1278 = vmatpush.bf16.msrb.mxu3 %v2751_v25 }
 0x235   : > { %v1153_v7 = vrot.slane %v1152_v5, 1  ;;  %v1057_v8 = vshll.u32 %v1053_v6, 16  ;;  %v1055_v9 = vshrl.u32 %v1053_v6, 16 }
 0x236   : > { %1459 = vmatpush.bf16.msra.mxu2 %v2765_v3 }
 0x237   : > { %2430 = vmatmul.msk.bf16.vlgmr.msrb.gmra.mxu2 %vm717_vm12, %v1153_v7  ;;  %v1059_v10 = vrot.slane %v1057_v8, 1  ;;  %v2764_v7 = vld [vmem:[#allocation6 + $0x28] sm:$0xff]  ;;  %v2767_v8 = vld [vmem:[#allocation6 + $0x40] sm:$0xff] }
 0x238   : > { %1498 = vmatpush.bf16.msra.mxu3 %v2762_v59 }
 0x239   : > { %v1060_v11 = vor.u32 %v1059_v10, %v1055_v9  ;;  %v2763_v9 = vld [vmem:[#allocation6 + $0x20] sm:$0xff] }
 0x23a   : > { %1460 = vmatpush.bf16.msra.mxu2 %v2764_v7 }
 0x23b   : > { %2396 = vmatmul.msk.bf16.vlgmr.msra.gmra.mxu0 %vm717_vm12, %v1060_v11 }
 0x23c   : > { %1499 = vmatpush.bf16.msra.mxu3 %v2761_v60  ;;  %1551 = vmatpush.bf16.msra.mxu0 %v2770_v61 }
 0x23e   : > { %1461 = vmatpush.bf16.msra.mxu2 %v2763_v9 }
 0x240   : > { %1552 = vmatpush.bf16.msra.mxu0 %v2769_v1 }
 0x244   : > { %1553 = vmatpush.bf16.msra.mxu0 %v2768_v4 }
 0x248   : > { %1554 = vmatpush.bf16.msra.mxu0 %v2767_v8 }
 0x2ad   : > { %v1137_v20 = vpop.f32.mrf.mxu1 }
 0x2b5   : > { %v1139_v26 = vpop.f32.mrf.mxu1 }
 0x2b8   : > { %v1097_v27 = vpop.f32.mrf.mxu0 }
 0x2b9   : > { %v1138_v29 = vadd.f32 %v1137_v20, %v1097_v27 }
 0x2ba   : > { %v1190_v30 = vpop.f32.mrf.mxu2 }
 0x2bb   : > { %v1194_v31 = vadd.f32 %v1190_v30, %v1138_v29 }
 0x2bd   : > { %vm1195_vm15 = vcmp.ge.f32.partialorder %v1194_v31, 0.0  ;;  %v1196_v32 = vmul.f32 0.1, %v1194_v31 }
 0x2bf   : > { %v1197_v33 = vsel %vm1195_vm15, %v1194_v31, %v1196_v32 }
 0x2c0   : > { %v1198_v34 = vpack.c.bf16 %v1197_v33, %v1197_v33  ;;  %v1099_v35 = vpop.f32.mrf.mxu0 }
 0x2c2   : > { %v1200_v36 = vshrl.u32 %v1198_v34, 16  ;;  %v1192_v37 = vpop.f32.mrf.mxu2  ;;  %v1203_v39 = vshll.u32 %v1198_v34, 16 }
 0x2c4   : > { %v1202_v38 = vrot.slane %v1200_v36, 7 }
 0x2c6   : > { %v1205_v40 = vor.u32 %v1203_v39, %v1202_v38  ;;  %v1206_v41 = vrot.slane %v1202_v38, 4 }
 0x2c8   : > { %v1209_v43 = vsel %vm3226_vm11, %v1205_v40, %v1031_v63  ;;  %v1212_v44 = vsel %vm3214_vm6, %v1206_v41, %v1211_v42  ;;  %v2760_v63 = vld [vmem:[#allocation6 + $0x8] sm:$0xff]  ;;  %v2774_v41 = vld [vmem:[#allocation6 + $0x18] sm:$0xff]  ;;  %v2773_v42 = vld [vmem:[#allocation6 + $0x10] sm:$0xff] }
 0x2c9   : > { %1213 = vst [vmem:[#allocation3 + $0x4] sm:$0x1] %v1212_v44  ;;  %1500 = vmatpush.bf16.msra.mxu3 %v2760_v63  ;;  %1681 = vmatpush.bf16.msrb.mxu2 %v2774_v41  ;;  %v2772_v44 = vld [vmem:[#allocation6 + $0x8] sm:$0xff] }
 0x2ca   : > { %1210 = vst [vmem:[#allocation3] sm:$0xf] %v1209_v43  ;;  %v2782_v43 = vld [vmem:[#allocation6 + $0x58] sm:$0xff] }
 0x2cd   : > { %1501 = vmatpush.bf16.msra.mxu3 %v2759_v2  ;;  %1682 = vmatpush.bf16.msrb.mxu2 %v2773_v42  ;;  %v2650_v42 = vld [vmem:[#allocation8 + $0x80] sm:$0xf] }
 0x2d0   : > { %v1223_v45 = vld [vmem:[#allocation3 + $0x4] sm:$0x1] }
 0x2d1   : > { %v1214_v46 = vld [vmem:[#allocation3] sm:$0xf]  ;;  %v1235_v47 = vunpack.c.l.b16 %v1223_v45  ;;  %v1394_v24 = vld [vmem:[#allocation3 + $0x4] sm:$0x1]  ;;  %v2778_v45 = vld [vmem:[#allocation6 + $0x38] sm:$0xff]  ;;  %1683 = vmatpush.bf16.msrb.mxu2 %v2772_v44 }
 0x2d2   : > { %v1324_v48 = vld [vmem:[#allocation3] sm:$0xe]  ;;  %v1234_v49 = vunpack.c.l.b16 %v1214_v46  ;;  %2464 = vmatmul.msk.bf16.vlgmr.msrb.gmra.mxu0 %vm717_vm12, %v1214_v46  ;;  %1641 = vmatpush.bf16.msrb.mxu1 %v2778_v45  ;;  %v2799_v44 = vld [vmem:[#allocation8 + $0x84] sm:$0xf]  ;;  %v2652_v45 = vld [vmem:[#allocation8 + $0x88] sm:$0xf0] }
 0x2d3   : > { %v1334_v50 = vunpack.c.l.b16 %v1324_v48  ;;  %v2777_v48 = vld [vmem:[#allocation6 + $0x30] sm:$0xff] }
 0x2d4   : > { %v1236_v52 = vpack.c.b16 %v1235_v47, %v1234_v49 }
 0x2d5   : > { %v1335_v51 = vpack.c.b16 %v1235_v47, %v1334_v50  ;;  %v2771_v47 = vld [vmem:[#allocation6] sm:$0xff]  ;;  %v2780_v50 = vld [vmem:[#allocation6 + $0x48] sm:$0xff] }
 0x2d6   : > { %v1240_v54 = vshll.u32 %v1236_v52, 16  ;;  %v1238_v55 = vshrl.u32 %v1236_v52, 16  ;;  %1684 = vmatpush.bf16.msrb.mxu2 %v2771_v47  ;;  %1642 = vmatpush.bf16.msrb.mxu1 %v2777_v48  ;;  %v2776_v52 = vld [vmem:[#allocation6 + $0x28] sm:$0xff]  ;;  %v2655_v48 = vor.u32 %v2799_v44, %v2652_v45 }
 0x2d7   : > { %v1336_v53 = vrot.slane %v1335_v51, 1 }
 0x2d8   : > { %v1242_v57 = vrot.slane %v1240_v54, 1 }
 0x2d9   : > { %2481 = vmatmul.msk.bf16.vlgmr.msra.gmra.mxu1 %vm717_vm12, %v1336_v53  ;;  %v2779_v53 = vld [vmem:[#allocation6 + $0x40] sm:$0xff] }
 0x2da   : > { %v1243_v58 = vor.u32 %v1242_v57, %v1238_v55  ;;  %1643 = vmatpush.bf16.msrb.mxu1 %v2776_v52  ;;  %v2775_v57 = vld [vmem:[#allocation6 + $0x20] sm:$0xff] }
 0x2dc   : > { %2447 = vmatmul.msk.bf16.vlgmr.msrb.gmra.mxu3 %vm717_vm12, %v1243_v58 }
 0x2dd   : > { %1734 = vmatpush.bf16.msrb.mxu3 %v2782_v43  ;;  %v2800_v43 = vld [vmem:[#allocation8 + $0x84] sm:$0xf0] }
 0x2de   : > { %1644 = vmatpush.bf16.msrb.mxu1 %v2775_v57  ;;  %v2651_v47 = vor.u32 %v2800_v43, %v2650_v42  ;;  %v2798_v57 = vld [vmem:[#allocation8 + $0x74] sm:$0xf0] }
 0x2df   : > { %v2786_v43 = vld [vmem:[#allocation8 + $0x14] sm:$0xf0] }
 0x34f   : > { %v1320_v62 = vpop.f32.mrf.mxu0 }
 0x356   : > { %v1373_v5 = vpop.f32.mrf.mxu1 }
 0x357   : > { %v1322_v6 = vpop.f32.mrf.mxu0 }
 0x35e   : > { %v1375_v10 = vpop.f32.mrf.mxu1 }
 0x35f   : > { %v1280_v11 = vpop.f32.mrf.mxu3 }
 0x360   : > { %v1321_v12 = vadd.f32 %v1320_v62, %v1280_v11 }
 0x362   : > { %v1377_v13 = vadd.f32 %v1373_v5, %v1321_v12 }
 0x364   : > { %vm1378_vm0 = vcmp.ge.f32.partialorder %v1377_v13, 0.0  ;;  %v1379_v14 = vmul.f32 0.1, %v1377_v13 }
 0x366   : > { %v1380_v15 = vsel %vm1378_vm0, %v1377_v13, %v1379_v14 }
 0x367   : > { %v1381_v16 = vpack.c.bf16 %v1380_v15, %v1380_v15  ;;  %v1282_v17 = vpop.f32.mrf.mxu3 }
 0x369   : > { %v1383_v18 = vshrl.u32 %v1381_v16, 16  ;;  %v1386_v20 = vshll.u32 %v1381_v16, 16 }
 0x36b   : > { %v1385_v19 = vrot.slane %v1383_v18, 7 }
 0x36d   : > { %v1388_v21 = vor.u32 %v1386_v20, %v1385_v19  ;;  %v1389_v23 = vrot.slane %v1385_v19, 4 }
 0x36f   : > { %v1392_v25 = vsel %vm3226_vm11, %v1388_v21, %v1214_v46  ;;  %v1395_v26 = vsel %vm3214_vm6, %v1389_v23, %v1394_v24  ;;  %v2781_v46 = vld [vmem:[#allocation6 + $0x50] sm:$0xff]  ;;  %v2806_v24 = vld [vmem:[#allocation8 + $0xb4] sm:$0xf0] }
 0x370   : > { %1393 = vst [vmem:[#allocation3] sm:$0xf] %v1392_v25  ;;  %1735 = vmatpush.bf16.msrb.mxu3 %v2781_v46  ;;  %v2674_v23 = vld [vmem:[#allocation8 + $0xb0] sm:$0xf]  ;;  %v2805_v25 = vld [vmem:[#allocation8 + $0xb4] sm:$0xf] }
 0x371   : > { %1396 = vst [vmem:[#allocation3 + $0x4] sm:$0x1] %v1395_v26  ;;  %v2675_v26 = vor.u32 %v2806_v24, %v2674_v23 }
 0x373   : > { %1962 = vmatpush.bf16.msra.mxu1 %v2675_v26 }
 0x374   : > { %1736 = vmatpush.bf16.msrb.mxu3 %v2780_v50 }
 0x377   : > { %v1397_v27 = vld [vmem:[#allocation3] sm:$0xf] }
 0x378   : > { %v1507_v29 = vld [vmem:[#allocation3] sm:$0xe]  ;;  %v1406_v30 = vld [vmem:[#allocation3 + $0x4] sm:$0x1]  ;;  %v1417_v31 = vunpack.c.l.b16 %v1397_v27  ;;  %2515 = vmatmul.msk.bf16.vlgmr.msra.gmra.mxu3 %vm717_vm12, %v1397_v27 }
 0x379   : > { %v1517_v32 = vunpack.c.l.b16 %v1507_v29  ;;  %v1418_v33 = vunpack.c.l.b16 %v1406_v30  ;;  %1737 = vmatpush.bf16.msrb.mxu3 %v2779_v53  ;;  %v1577_v6 = vld [vmem:[#allocation3 + $0x4] sm:$0x1]  ;;  %v2666_v30 = vld [vmem:[#allocation8 + $0xa0] sm:$0xf] }
 0x37b   : > { %v1419_v34 = vpack.c.b16 %v1418_v33, %v1417_v31  ;;  %v1518_v35 = vpack.c.b16 %v1418_v33, %v1517_v32  ;;  %v2804_v31 = vld [vmem:[#allocation8 + $0xa4] sm:$0xf0]  ;;  %v2803_v32 = vld [vmem:[#allocation8 + $0xa4] sm:$0xf] }
 0x37c   : > { %v2667_v33 = vor.u32 %v2804_v31, %v2666_v30  ;;  %v2610_v31 = vld [vmem:[#allocation8 + $0x30] sm:$0xf] }
 0x37d   : > { %v1519_v36 = vrot.slane %v1518_v35, 1  ;;  %v1423_v37 = vshll.u32 %v1419_v34, 16  ;;  %v1421_v38 = vshrl.u32 %v1419_v34, 16  ;;  %v2668_v34 = vld [vmem:[#allocation8 + $0xa8] sm:$0xf0] }
 0x37e   : > { %v2658_v35 = vld [vmem:[#allocation8 + $0x90] sm:$0xf]  ;;  %1963 = vmatpush.bf16.msra.mxu1 %v2667_v33  ;;  %v2789_v33 = vld [vmem:[#allocation8 + $0x34] sm:$0xf] }
 0x37f   : > { %2532 = vmatmul.msk.bf16.vlgmr.msra.gmra.mxu0 %vm717_vm12, %v1519_v36  ;;  %v1425_v39 = vrot.slane %v1423_v37, 1  ;;  %v2802_v36 = vld [vmem:[#allocation8 + $0x94] sm:$0xf0]  ;;  %v2671_v37 = vor.u32 %v2803_v32, %v2668_v34  ;;  %v2612_v34 = vld [vmem:[#allocation8 + $0x38] sm:$0xf0] }
 0x380   : > { %v2790_v32 = vld [vmem:[#allocation8 + $0x34] sm:$0xf0] }
 0x381   : > { %v1426_v40 = vor.u32 %v1425_v39, %v1421_v38  ;;  %v2801_v38 = vld [vmem:[#allocation8 + $0x94] sm:$0xf]  ;;  %v2660_v39 = vld [vmem:[#allocation8 + $0x98] sm:$0xf0] }
 0x382   : > { %v2663_v41 = vor.u32 %v2801_v38, %v2660_v39  ;;  %v2788_v38 = vld [vmem:[#allocation8 + $0x24] sm:$0xf0]  ;;  %v2787_v39 = vld [vmem:[#allocation8 + $0x24] sm:$0xf] }
 0x383   : > { %2498 = vmatmul.msk.bf16.vlgmr.msra.gmra.mxu2 %vm717_vm12, %v1426_v40  ;;  %v2659_v40 = vor.u32 %v2802_v36, %v2658_v35  ;;  %v2611_v35 = vor.u32 %v2790_v32, %v2610_v31  ;;  %v2615_v36 = vor.u32 %v2789_v33, %v2612_v34  ;;  %v2607_v42 = vor.u32 %v2787_v39, %v2604_v28 }
 0x385   : > { %1964 = vmatpush.bf16.msra.mxu1 %v2659_v40 }
 0x389   : > { %1965 = vmatpush.bf16.msra.mxu1 %v2651_v47 }
 0x3fb   : > { %v1503_v49 = vpop.f32.mrf.mxu3 }
 0x3fc   : > { %v1556_v51 = vpop.f32.mrf.mxu0 }
 0x403   : > { %v1505_v54 = vpop.f32.mrf.mxu3 }
 0x404   : > { %v1558_v55 = vpop.f32.mrf.mxu0 }
 0x405   : > { %v2642_v55 = vld [vmem:[#allocation8 + $0x70] sm:$0xf] }
 0x406   : > { %v1463_v58 = vpop.f32.mrf.mxu2 }
 0x407   : > { %v1504_v59 = vadd.f32 %v1503_v49, %v1463_v58  ;;  %v2797_v58 = vld [vmem:[#allocation8 + $0x74] sm:$0xf] }
 0x409   : > { %v1560_v60 = vadd.f32 %v1556_v51, %v1504_v59 }
 0x40b   : > { %vm1561_vm1 = vcmp.ge.f32.partialorder %v1560_v60, 0.0  ;;  %v1562_v61 = vmul.f32 0.1, %v1560_v60 }
 0x40d   : > { %v1563_v62 = vsel %vm1561_vm1, %v1560_v60, %v1562_v61  ;;  %v2643_v60 = vor.u32 %v2798_v57, %v2642_v55  ;;  %v2644_v61 = vld [vmem:[#allocation8 + $0x78] sm:$0xf0] }
 0x40e   : > { %v1564_v63 = vpack.c.bf16 %v1563_v62, %v1563_v62  ;;  %v1465_v0 = vpop.f32.mrf.mxu2  ;;  %v2634_v62 = vld [vmem:[#allocation8 + $0x60] sm:$0xf] }
 0x40f   : > { %1945 = vmatpush.bf16.msrb.mxu0 %v2643_v60  ;;  %v2588_v60 = vld [vmem:[#allocation8 + $0x8] sm:$0xf0] }
 0x410   : > { %v1566_v1 = vshrl.u32 %v1564_v63, 16  ;;  %v1569_v3 = vshll.u32 %v1564_v63, 16  ;;  %v2796_v63 = vld [vmem:[#allocation8 + $0x64] sm:$0xf0] }
 0x412   : > { %v1568_v2 = vrot.slane %v1566_v1, 7 }
 0x414   : > { %v1571_v4 = vor.u32 %v1569_v3, %v1568_v2  ;;  %v1572_v5 = vrot.slane %v1568_v2, 4  ;;  %v2647_v2 = vor.u32 %v2797_v58, %v2644_v61  ;;  %v2795_v3 = vld [vmem:[#allocation8 + $0x64] sm:$0xf] }
 0x416   : > { %v1575_v7 = vsel %vm3226_vm11, %v1571_v4, %v1397_v27  ;;  %v1578_v8 = vsel %vm3214_vm6, %v1572_v5, %v1577_v6  ;;  %v2676_v27 = vld [vmem:[#allocation8 + $0xb8] sm:$0xf0]  ;;  %v2636_v4 = vld [vmem:[#allocation8 + $0x68] sm:$0xf0]  ;;  %v2635_v5 = vor.u32 %v2796_v63, %v2634_v62  ;;  %1971 = vmatpush.bf16.msra.mxu2 %v2647_v2 }
 0x417   : > { %1576 = vst [vmem:[#allocation3] sm:$0xf] %v1575_v7  ;;  %v2679_v29 = vor.u32 %v2805_v25, %v2676_v27 }
 0x418   : > { %1579 = vst [vmem:[#allocation3 + $0x4] sm:$0x1] %v1578_v8  ;;  %v2639_v8 = vor.u32 %v2795_v3, %v2636_v4  ;;  %1946 = vmatpush.bf16.msrb.mxu0 %v2635_v5 }
 0x419   : > { %1988 = vmatpush.bf16.msra.mxu3 %v2679_v29 }
 0x41a   : > { %1972 = vmatpush.bf16.msra.mxu2 %v2639_v8 }
 0x41d   : > { %1989 = vmatpush.bf16.msra.mxu3 %v2671_v37  ;;  %v2602_v37 = vld [vmem:[#allocation8 + $0x20] sm:$0xf] }
 0x41e   : > { %v3269_v9 = vld [vmem:[#allocation3] sm:$0xf] }
 0x41f   : > { %v1690_v10 = vld [vmem:[#allocation3] sm:$0xe]  ;;  %v1589_v11 = vld [vmem:[#allocation3 + $0x4] sm:$0x1]  ;;  %v1600_v12 = vunpack.c.l.b16 %v3269_v9  ;;  %2566 = vmatmul.msk.bf16.vlgmr.msrb.gmra.mxu2 %vm717_vm12, %v3269_v9 }
 0x420   : > { %v1700_v13 = vunpack.c.l.b16 %v1690_v10  ;;  %v1601_v14 = vunpack.c.l.b16 %v1589_v11  ;;  %v2626_v10 = vld [vmem:[#allocation8 + $0x50] sm:$0xf]  ;;  %v2794_v11 = vld [vmem:[#allocation8 + $0x54] sm:$0xf0]  ;;  %v1761_v25 = vld [vmem:[#allocation3 + $0x4] sm:$0x1] }
 0x421   : > { %1990 = vmatpush.bf16.msra.mxu3 %v2663_v41 }
 0x422   : > { %v1602_v15 = vpack.c.b16 %v1601_v14, %v1600_v12  ;;  %v1701_v16 = vpack.c.b16 %v1601_v14, %v1700_v13  ;;  %v2793_v12 = vld [vmem:[#allocation8 + $0x54] sm:$0xf]  ;;  %v2628_v13 = vld [vmem:[#allocation8 + $0x58] sm:$0xf0] }
 0x424   : > { %v1606_v17 = vshll.u32 %v1602_v15, 16  ;;  %v1702_v18 = vrot.slane %v1701_v16, 1  ;;  %v1604_v19 = vshrl.u32 %v1602_v15, 16  ;;  %v2627_v15 = vor.u32 %v2794_v11, %v2626_v10 }
 0x425   : > { %1991 = vmatpush.bf16.msra.mxu3 %v2655_v48  ;;  %v2785_v48 = vld [vmem:[#allocation8 + $0x14] sm:$0xf] }
 0x426   : > { %2583 = vmatmul.msk.bf16.vlgmr.msrb.gmra.mxu3 %vm717_vm12, %v1702_v18  ;;  %v1608_v20 = vrot.slane %v1606_v17, 1  ;;  %v2618_v18 = vld [vmem:[#allocation8 + $0x40] sm:$0xf]  ;;  %1947 = vmatpush.bf16.msrb.mxu0 %v2627_v15 }
 0x428   : > { %v1609_v21 = vor.u32 %v1608_v20, %v1604_v19  ;;  %v2792_v19 = vld [vmem:[#allocation8 + $0x44] sm:$0xf0]  ;;  %v2791_v20 = vld [vmem:[#allocation8 + $0x44] sm:$0xf] }
 0x429   : > { %v2619_v26 = vor.u32 %v2792_v19, %v2618_v18 }
 0x42a   : > { %2549 = vmatmul.msk.bf16.vlgmr.msrb.gmra.mxu1 %vm717_vm12, %v1609_v21  ;;  %v2620_v21 = vld [vmem:[#allocation8 + $0x48] sm:$0xf0] }
 0x42b   : > { %v2623_v30 = vor.u32 %v2791_v20, %v2620_v21  ;;  %1948 = vmatpush.bf16.msrb.mxu0 %v2619_v26 }
 0x42f   : > { %1949 = vmatpush.bf16.msrb.mxu0 %v2611_v35 }
 0x4a2   : > { %v1686_v46 = vpop.f32.mrf.mxu2 }
 0x4a7   : > { %v1646_v49 = vpop.f32.mrf.mxu1 }
 0x4a8   : > { %v1687_v50 = vadd.f32 %v1686_v46, %v1646_v49  ;;  %v2596_v49 = vld [vmem:[#allocation8 + $0x18] sm:$0xf0] }
 0x4a9   : > { %v1739_v51 = vpop.f32.mrf.mxu3  ;;  %v2599_v55 = vor.u32 %v2785_v48, %v2596_v49 }
 0x4aa   : > { %v1743_v52 = vadd.f32 %v1739_v51, %v1687_v50  ;;  %v1688_v53 = vpop.f32.mrf.mxu2  ;;  %v2595_v50 = vor.u32 %v2786_v43, %v2594_v56 }
 0x4ab   : > { %v2586_v53 = vld [vmem:[#allocation8] sm:$0xf] }
 0x4ac   : > { %vm1744_vm2 = vcmp.ge.f32.partialorder %v1743_v52, 0.0  ;;  %v1745_v54 = vmul.f32 0.1, %v1743_v52 }
 0x4ae   : > { %v1746_v59 = vsel %vm1744_vm2, %v1743_v52, %v1745_v54  ;;  %v2784_v54 = vld [vmem:[#allocation8 + $0x4] sm:$0xf0] }
 0x4af   : > { %v1747_v0 = vadd.f32 %v1746_v59, %v3221_v22  ;;  %v1648_v1 = vpop.f32.mrf.mxu1  ;;  %v2631_v22 = vor.u32 %v2793_v12, %v2628_v13  ;;  %v2783_v59 = vld [vmem:[#allocation8 + $0x4] sm:$0xf]  ;;  %v2587_v61 = vor.u32 %v2784_v54, %v2586_v53 }
 0x4b1   : > { %v1748_v6 = vpack.c.bf16 %v1747_v0, %v1747_v0  ;;  %v1741_v7 = vpop.f32.mrf.mxu3  ;;  %1973 = vmatpush.bf16.msra.mxu2 %v2631_v22  ;;  %v2591_v0 = vor.u32 %v2783_v59, %v2588_v60 }
 0x4b3   : > { %v1750_v14 = vshrl.u32 %v1748_v6, 16  ;;  %v1753_v17 = vshll.u32 %v1748_v6, 16 }
 0x4b5   : > { %v1752_v16 = vrot.slane %v1750_v14, 7  ;;  %1974 = vmatpush.bf16.msra.mxu2 %v2623_v30 }
 0x4b7   : > { %v1755_v23 = vor.u32 %v1753_v17, %v1752_v16  ;;  %v1756_v24 = vrot.slane %v1752_v16, 4 }
 0x4b9   : > { %v1759_v27 = vsel %vm3226_vm11, %v1755_v23, %v3269_v9  ;;  %v1762_v29 = vsel %vm3214_vm6, %v1756_v24, %v1761_v25  ;;  %v2603_v9 = vor.u32 %v2788_v38, %v2602_v37  ;;  %1975 = vmatpush.bf16.msra.mxu2 %v2615_v36 }
 0x4ba   : > { %1760 = vst [vmem:[#allocation3] sm:$0xf] %v1759_v27 }
 0x4bb   : > { %1763 = vst [vmem:[#allocation3 + $0x4] sm:$0x1] %v1762_v29  ;;  %1950 = vmatpush.bf16.msrb.mxu0 %v2603_v9 }
 0x4bd   : > { %1976 = vmatpush.bf16.msra.mxu2 %v2607_v42 }
 0x4bf   : > { %1951 = vmatpush.bf16.msrb.mxu0 %v2595_v50 }
 0x4c1   : > { %v1766_v40 = vld [vmem:[#allocation3] sm:$0xe]  ;;  %1977 = vmatpush.bf16.msra.mxu2 %v2599_v55 }
 0x4c2   : > { %v1764_v41 = vld [vmem:[#allocation3] sm:$0xf]  ;;  %v1765_v44 = vld [vmem:[#allocation3 + $0x4] sm:$0x1]  ;;  %v1782_v45 = vunpack.c.l.b16 %v1766_v40 }
 0x4c3   : > { %v1769_v46 = vunpack.c.l.b16 %v1764_v41  ;;  %v1770_v47 = vunpack.c.l.b16 %v1765_v44  ;;  %1952 = vmatpush.bf16.msrb.mxu0 %v2587_v61 }
 0x4c5   : > { %v1783_v51 = vpack.c.b16 %v1770_v47, %v1782_v45  ;;  %v1771_v52 = vpack.c.b16 %v1770_v47, %v1769_v46  ;;  %1978 = vmatpush.bf16.msra.mxu2 %v2591_v0 }
 0x4c7   : > { %v1784_v57 = vrot.slane %v1783_v51, 1  ;;  %v1775_v58 = vshll.u32 %v1771_v52, 16  ;;  %v1773_v62 = vshrl.u32 %v1771_v52, 16 }
 0x4c9   : > { %2680 = vmatmul.msk.bf16.vlgmr.msra.gmra.mxu1 %vm717_vm12, %v1784_v57  ;;  %2681 = vmatmul.msk.bf16.vlgmr.msra.gmra.mxu3 %vm717_vm12, %v1784_v57  ;;  %v1777_v63 = vrot.slane %v1775_v58, 1  ;;  %v1791_v5 = vunpack.c.l.b16 %v1784_v57 }
 0x4cb   : > { %v1778_v1 = vor.u32 %v1777_v63, %v1773_v62 }
 0x4cd   : > { %1779 = vrot.lane.b32.xlu0 %v1778_v1, %s3010_s21 }
 0x53f   : > { %v1780_v2 = vpop.permute.xlu0 %1779 }
 0x540   : > { %v1787_v3 = vsel %vm717_vm12, %v1764_v41, %v1780_v2 }
 0x541   : > { %v1790_v4 = vunpack.c.l.b16 %v1787_v3  ;;  %1953 = vmatmul.bf16.vlgmr.msrb.gmra.mxu0 %v1787_v3  ;;  %1979 = vmatmul.bf16.vlgmr.msra.gmra.mxu2 %v1787_v3 }
 0x543   : > { %v1792_v6 = vpack.c.b16 %v1791_v5, %v1790_v4 }
 0x545   : > { %1797 = vst.msk [vmem:[%s284_s14] sm:$0xff] %vm1796_vm5, %v1792_v6 }
 0x546   : > { %v1967_v7 = vpop.f32.mrf.mxu1 }
 0x54c   : > { %v1993_v8 = vpop.f32.mrf.mxu3 }
 0x54e   : > { %v1969_v10 = vpop.f32.mrf.mxu1 }
 0x554   : > { %v1995_v11 = vpop.f32.mrf.mxu3 }
 0x5be   : > { %v1954_v12 = vpop.f32.mrf.mxu0 }
 0x5bf   : > { %v1968_v13 = vadd.f32 %v1967_v7, %v1954_v12 }
 0x5c1   : > { %1997 = vst [vmem:[%s289_s24] sm:$0xff] %v1968_v13 }
 0x5c4   : > { %v1980_v14 = vpop.f32.mrf.mxu2 }
 0x5c5   : > { %v1994_v15 = vadd.f32 %v1993_v8, %v1980_v14 }
 0x5c6   : > { %v1956_v16 = vpop.f32.mrf.mxu0 }
 0x5c7   : > { %1998 = vst [vmem:[%s289_s24 + $0x8] sm:$0xff] %v1994_v15 }
 0x5cc   : > { %v1982_v17 = vpop.f32.mrf.mxu2 }
 0x5cd PF: > { %p17_p3 = scmp.ge.s32.totalorder %s3082_s13, 4   ;;  %s3319_s18 = smov %s2993_s19 }
 0x5ce   : > { %s3320_s19 = smov %s2997_s20  ;;  %s3321_s20 = smov %s3093_s16 }
 0x5cf   : > { %s3322_s21 = smov %s3082_s13  ;;  %19 = sbr.rel (!%p17_p3) target bundleno = 4 (0x4), region = 102 }
 0x5d4   :  { %2036 = vsyncpa [#allocation5], 1 }
 0x5d5   :  { %2038 = vsyncpa [#allocation5 + $0x1], 1 }
 0x5d6   :  { %2039 = vsyncpa [#allocation7], 1 }

// kernel: kernel_predictor_forward.3
= control target key start
LH: loop header
LB: loop body
LE: loop exit
PB: predicated region body
PF: predicated region fallthrough
CT: control target
= control target key end

     0   :  { %s5220_s9 = smov 0   ;;  %s5222_s10 = smov 0   ;;  %s6442_s0 = inlined_call_operand.vmem [shape: bf16[2,8,192], index: 0, kind: input, shape index: {}]   ;;  %s6443_s1 = inlined_call_operand.vmem [shape: bf16[24576,192], index: 1, kind: input, shape index: {}]   ;;  %s6444_s2 = inlined_call_operand.vmem [shape: f32[2,24576,8], index: 2, kind: output, shape index: {}]  }
   0x1   :  { %s5224_s11 = smov 0   ;;  %s5226_s12 = smov 0  }
   0x2   :  { %s5228_s13 = smov 0  }
   0x3 LB: > { %s27_s14 = sadd.s32 1, %s5195_s11  ;;  %s31_s15 = sadd.s32 1, %s5199_s12  ;;  %s5203_s13 = sphi %s5228_s13, %s12_s13   ;;  %s5199_s12 = sphi %s5226_s12, %s6448_s12   ;;  %s5195_s11 = sphi %s5224_s11, %s6447_s11   ;;  %s5191_s10 = sphi %s5222_s10, %s6446_s10   ;;  %s5187_s9 = sphi %s5220_s9, %s6445_s9  }
   0x4   : > { %p29_p0 = scmp.ge.s32.totalorder %s27_s14, 2  ;;  %p3702_p1 = scmp.ge.s32.totalorder %s5203_s13, 1 }
   0x5   : > { %p153_p2 = scmp.lt.s32.totalorder %s5203_s13, 25 }
   0x6   : > { %s6450_s14 = smov (%p29_p0, %s27_s14), 0  ;;  %s6452_s15 = smov (!%p29_p0, %s31_s15), %s5199_s12 }
   0x7   : > { %p154_p3 = pnand %p3702_p1, %p153_p2  ;;  %p33_p4 = scmp.ge.s32.totalorder %s6452_s15, 12 }
   0x8   : > { %p192_p5 = scmp.lt.s32.totalorder (!%p154_p3), %s5187_s9, 1  ;;  %s3705_s16 = sshll.u32 (!%p154_p3), %s5191_s10, 8 }
   0x9   : > { %s6454_s15 = smov (%p33_p4, %s6452_s15), 0  ;;  %157 = sbr.rel (%p154_p3) target bundleno = 1181 (0x49d), region = 28 }
   0xa   : > { %p202_p6 = scmp.lt.s32.totalorder (!%p154_p3), %s3705_s16, 3071 }
   0xe   : > { %s6456_s9 = smov (!%p192_p5, %s5187_s9), 1  ;;  %s6458_s16 = smov (!%p202_p6, %s3705_s16), 3071  ;;  %vm1637_vm0 = vcmask 523264   ;;  %vm3323_vm1 = vcmask 64512  }
   0xf   : > { %s4864_s17 = sshll.u32 %s6456_s9, 3  ;;  %s4865_s21 = sshll.u32 %s6458_s16, 3 }
  0x10   : > { %s200_s20 = scalar_lea.vmem %s6442_s0, %s4864_s17  ;;  %s5262_s24 = scalar_lea.vmem %s6443_s1, %s4865_s21 }
  0x11   : > { %v478_v0 = vld [vmem:[%s200_s20] sm:$0xff]  ;;  %v4867_v6 = vld [vmem:[%s5262_s24 + $0x4] sm:$0xf0]  ;;  %v3714_v11 = vld [vmem:[%s5262_s24 + $0x8] sm:$0xf0]  ;;  %s5124_s25 = smul.u32 3072, %s6456_s9 }
  0x12   : > { %v1632_v1 = vunpack.c.l.b16 %v478_v0  ;;  %v1633_v2 = vunpack.c.h.b16 %v478_v0  ;;  %v3712_v5 = vld [vmem:[%s5262_s24] sm:$0xf]  ;;  %v4995_v9 = vld [vmem:[%s5262_s24 + $0x404] sm:$0xf0]  ;;  %v4866_v10 = vld [vmem:[%s5262_s24 + $0x4] sm:$0xf] }
  0x13   : > { %v4224_v7 = vld [vmem:[%s5262_s24 + $0x400] sm:$0xf]  ;;  %v4994_v12 = vld [vmem:[%s5262_s24 + $0x404] sm:$0xf]  ;;  %v4226_v13 = vld [vmem:[%s5262_s24 + $0x408] sm:$0xf0]  ;;  %v3713_v14 = vor.u32 %v4867_v6, %v3712_v5  ;;  %v3717_v16 = vor.u32 %v4866_v10, %v3714_v11  ;;  %s5275_s26 = sadd.s32 %s5124_s25, %s6458_s16 }
  0x14   : > { %v1634_v3 = vpack.c.b16 %v1632_v1, %v1632_v1  ;;  %v1635_v4 = vpack.c.b16 %v1633_v2, %v1633_v2  ;;  %v4225_v15 = vor.u32 %v4995_v9, %v4224_v7  ;;  %v4229_v17 = vor.u32 %v4994_v12, %v4226_v13  ;;  %v3720_v18 = vld [vmem:[%s5262_s24 + $0x10] sm:$0xf]  ;;  %v4869_v19 = vld [vmem:[%s5262_s24 + $0x14] sm:$0xf0]  ;;  %v4868_v22 = vld [vmem:[%s5262_s24 + $0x14] sm:$0xf] }
  0x15   : > { %v4232_v20 = vld [vmem:[%s5262_s24 + $0x410] sm:$0xf]  ;;  %v4997_v21 = vld [vmem:[%s5262_s24 + $0x414] sm:$0xf0]  ;;  %v3722_v23 = vld [vmem:[%s5262_s24 + $0x18] sm:$0xf0]  ;;  %v3721_v26 = vor.u32 %v4869_v19, %v3720_v18 }
  0x16   : > { %2032 = vmatpush.bf16.xpose.msra.mxu0 %v1634_v3  ;;  %5122 = vmatpush.bf16.xpose.msra.mxu2 %v1634_v3  ;;  %v2023_v8 = vsel %vm1637_vm0, %v1635_v4, 0  ;;  %v4996_v24 = vld [vmem:[%s5262_s24 + $0x414] sm:$0xf]  ;;  %v4234_v25 = vld [vmem:[%s5262_s24 + $0x418] sm:$0xf0]  ;;  %v4233_v27 = vor.u32 %v4997_v21, %v4232_v20  ;;  %v3725_v28 = vor.u32 %v4868_v22, %v3722_v23  ;;  %s3709_s27 = sshll.u32 %s5275_s26, 3 }
  0x17   : > { %2681 = vmatpush.bf16.xpose.msra.mxu1 %v2023_v8  ;;  %5123 = vmatpush.bf16.xpose.msra.mxu3 %v2023_v8  ;;  %v4237_v29 = vor.u32 %v4996_v24, %v4234_v25  ;;  %v3728_v30 = vld [vmem:[%s5262_s24 + $0x20] sm:$0xf]  ;;  %v4871_v31 = vld [vmem:[%s5262_s24 + $0x24] sm:$0xf0]  ;;  %v4870_v34 = vld [vmem:[%s5262_s24 + $0x24] sm:$0xf]  ;;  %s5361_s30 = scalar_lea.vmem %s6444_s2, %s3709_s27 }
  0x18   : > { %v4240_v32 = vld [vmem:[%s5262_s24 + $0x420] sm:$0xf]  ;;  %v4999_v33 = vld [vmem:[%s5262_s24 + $0x424] sm:$0xf0]  ;;  %v3730_v35 = vld [vmem:[%s5262_s24 + $0x28] sm:$0xf0]  ;;  %v3729_v38 = vor.u32 %v4871_v31, %v3728_v30 }
  0x19   : > { %v4998_v36 = vld [vmem:[%s5262_s24 + $0x424] sm:$0xf]  ;;  %v4242_v37 = vld [vmem:[%s5262_s24 + $0x428] sm:$0xf0]  ;;  %v4241_v39 = vor.u32 %v4999_v33, %v4240_v32  ;;  %v3733_v40 = vor.u32 %v4870_v34, %v3730_v35  ;;  %v3736_v42 = vld [vmem:[%s5262_s24 + $0x30] sm:$0xf] }
  0x1a   : > { %v4245_v41 = vor.u32 %v4998_v36, %v4242_v37  ;;  %v4873_v43 = vld [vmem:[%s5262_s24 + $0x34] sm:$0xf0]  ;;  %v4248_v44 = vld [vmem:[%s5262_s24 + $0x430] sm:$0xf]  ;;  %v4872_v46 = vld [vmem:[%s5262_s24 + $0x34] sm:$0xf] }
  0x1b   : > { %v5001_v45 = vld [vmem:[%s5262_s24 + $0x434] sm:$0xf0]  ;;  %v3738_v47 = vld [vmem:[%s5262_s24 + $0x38] sm:$0xf0]  ;;  %v5000_v48 = vld [vmem:[%s5262_s24 + $0x434] sm:$0xf]  ;;  %v3737_v50 = vor.u32 %v4873_v43, %v3736_v42 }
  0x1c   : > { %v4250_v49 = vld [vmem:[%s5262_s24 + $0x438] sm:$0xf0]  ;;  %v4249_v51 = vor.u32 %v5001_v45, %v4248_v44  ;;  %v3741_v52 = vor.u32 %v4872_v46, %v3738_v47  ;;  %v3744_v54 = vld [vmem:[%s5262_s24 + $0x40] sm:$0xf]  ;;  %v4875_v55 = vld [vmem:[%s5262_s24 + $0x44] sm:$0xf0] }
  0x1d   : > { %2033 = vmatmul.bf16.vlgmr.msra.gmra.mxu0 %v3713_v14  ;;  %2353 = vmatmul.bf16.vlgmr.msra.gmra.mxu2 %v4225_v15  ;;  %v4253_v53 = vor.u32 %v5000_v48, %v4250_v49  ;;  %v4256_v56 = vld [vmem:[%s5262_s24 + $0x440] sm:$0xf]  ;;  %v5003_v57 = vld [vmem:[%s5262_s24 + $0x444] sm:$0xf0]  ;;  %v4874_v58 = vld [vmem:[%s5262_s24 + $0x44] sm:$0xf]  ;;  %v3745_v62 = vor.u32 %v4875_v55, %v3744_v54 }
  0x1e   : > { %4734 = vmatmul.msk.bf16.vlgmr.msra.gmra.mxu1 %vm1637_vm0, %v3717_v16  ;;  %4798 = vmatmul.msk.bf16.vlgmr.msra.gmra.mxu3 %vm1637_vm0, %v4229_v17  ;;  %v3746_v59 = vld [vmem:[%s5262_s24 + $0x48] sm:$0xf0]  ;;  %v5002_v60 = vld [vmem:[%s5262_s24 + $0x444] sm:$0xf]  ;;  %v4257_v63 = vor.u32 %v5003_v57, %v4256_v56  ;;  %v3752_v2 = vld [vmem:[%s5262_s24 + $0x50] sm:$0xf] }
  0x1f   : > { %v4258_v61 = vld [vmem:[%s5262_s24 + $0x448] sm:$0xf0]  ;;  %v3749_v0 = vor.u32 %v4874_v58, %v3746_v59  ;;  %v4877_v3 = vld [vmem:[%s5262_s24 + $0x54] sm:$0xf0]  ;;  %v4264_v4 = vld [vmem:[%s5262_s24 + $0x450] sm:$0xf] }
  0x20   : > { %v4261_v1 = vor.u32 %v5002_v60, %v4258_v61  ;;  %v5005_v5 = vld [vmem:[%s5262_s24 + $0x454] sm:$0xf0]  ;;  %v4876_v6 = vld [vmem:[%s5262_s24 + $0x54] sm:$0xf]  ;;  %v3754_v7 = vld [vmem:[%s5262_s24 + $0x58] sm:$0xf0]  ;;  %v3753_v10 = vor.u32 %v4877_v3, %v3752_v2 }
  0x21   : > { %v5004_v8 = vld [vmem:[%s5262_s24 + $0x454] sm:$0xf]  ;;  %v4266_v9 = vld [vmem:[%s5262_s24 + $0x458] sm:$0xf0]  ;;  %v4265_v11 = vor.u32 %v5005_v5, %v4264_v4  ;;  %v3757_v12 = vor.u32 %v4876_v6, %v3754_v7  ;;  %v3760_v14 = vld [vmem:[%s5262_s24 + $0x60] sm:$0xf] }
  0x22   : > { %v4269_v13 = vor.u32 %v5004_v8, %v4266_v9  ;;  %v4879_v15 = vld [vmem:[%s5262_s24 + $0x64] sm:$0xf0]  ;;  %v4272_v16 = vld [vmem:[%s5262_s24 + $0x460] sm:$0xf]  ;;  %v4878_v18 = vld [vmem:[%s5262_s24 + $0x64] sm:$0xf] }
  0x23   : > { %v5007_v17 = vld [vmem:[%s5262_s24 + $0x464] sm:$0xf0]  ;;  %v3762_v19 = vld [vmem:[%s5262_s24 + $0x68] sm:$0xf0]  ;;  %v5006_v20 = vld [vmem:[%s5262_s24 + $0x464] sm:$0xf]  ;;  %v3761_v22 = vor.u32 %v4879_v15, %v3760_v14 }
  0x24   : > { %v4274_v21 = vld [vmem:[%s5262_s24 + $0x468] sm:$0xf0]  ;;  %v4273_v23 = vor.u32 %v5007_v17, %v4272_v16  ;;  %v3765_v24 = vor.u32 %v4878_v18, %v3762_v19  ;;  %v4880_v30 = vld [vmem:[%s5262_s24 + $0x74] sm:$0xf]  ;;  %v3770_v31 = vld [vmem:[%s5262_s24 + $0x78] sm:$0xf0] }
  0x25   : > { %v4277_v25 = vor.u32 %v5006_v20, %v4274_v21  ;;  %v5008_v32 = vld [vmem:[%s5262_s24 + $0x474] sm:$0xf]  ;;  %v4282_v33 = vld [vmem:[%s5262_s24 + $0x478] sm:$0xf0]  ;;  %v3773_v36 = vor.u32 %v4880_v30, %v3770_v31  ;;  %v4882_v42 = vld [vmem:[%s5262_s24 + $0x84] sm:$0xf] }
  0x26   : > { %v4285_v37 = vor.u32 %v5008_v32, %v4282_v33  ;;  %v3778_v43 = vld [vmem:[%s5262_s24 + $0x88] sm:$0xf0]  ;;  %v5010_v44 = vld [vmem:[%s5262_s24 + $0x484] sm:$0xf]  ;;  %v3784_v59 = vld [vmem:[%s5262_s24 + $0x90] sm:$0xf] }
  0x27   : > { %v4290_v45 = vld [vmem:[%s5262_s24 + $0x488] sm:$0xf0]  ;;  %v3781_v49 = vor.u32 %v4882_v42, %v3778_v43  ;;  %v4885_v60 = vld [vmem:[%s5262_s24 + $0x94] sm:$0xf0]  ;;  %v4296_v61 = vld [vmem:[%s5262_s24 + $0x490] sm:$0xf] }
  0x28   : > { %v4298_v2 = vld [vmem:[%s5262_s24 + $0x498] sm:$0xf0]  ;;  %v3785_v5 = vor.u32 %v4885_v60, %v3784_v59  ;;  %v3792_v19 = vld [vmem:[%s5262_s24 + $0xa0] sm:$0xf]  ;;  %v4887_v20 = vld [vmem:[%s5262_s24 + $0xa4] sm:$0xf0] }
  0x29   : > { %v4304_v21 = vld [vmem:[%s5262_s24 + $0x4a0] sm:$0xf]  ;;  %v3800_v43 = vld [vmem:[%s5262_s24 + $0xb0] sm:$0xf] }
  0x2d   : > { %2038 = vmatmul.bf16.gmra.mxu0 %v3721_v26  ;;  %2358 = vmatmul.bf16.gmra.mxu2 %v4233_v27  ;;  %v3768_v26 = vld [vmem:[%s5262_s24 + $0x70] sm:$0xf]  ;;  %v4881_v27 = vld [vmem:[%s5262_s24 + $0x74] sm:$0xf0] }
  0x2e   : > { %4735 = vmatmul.msk.bf16.gmra.mxu1 %vm1637_vm0, %v3725_v28  ;;  %4799 = vmatmul.msk.bf16.gmra.mxu3 %vm1637_vm0, %v4237_v29  ;;  %v4280_v28 = vld [vmem:[%s5262_s24 + $0x470] sm:$0xf]  ;;  %v5009_v29 = vld [vmem:[%s5262_s24 + $0x474] sm:$0xf0]  ;;  %v3769_v34 = vor.u32 %v4881_v27, %v3768_v26  ;;  %v4306_v26 = vld [vmem:[%s5262_s24 + $0x4a8] sm:$0xf0] }
  0x2f   : > { %v4281_v35 = vor.u32 %v5009_v29, %v4280_v28  ;;  %v3793_v29 = vor.u32 %v4887_v20, %v3792_v19 }
  0x3d   : > { %2043 = vmatmul.bf16.gmra.mxu0 %v3729_v38  ;;  %2363 = vmatmul.bf16.gmra.mxu2 %v4241_v39  ;;  %v3776_v38 = vld [vmem:[%s5262_s24 + $0x80] sm:$0xf]  ;;  %v4883_v39 = vld [vmem:[%s5262_s24 + $0x84] sm:$0xf0] }
  0x3e   : > { %4736 = vmatmul.msk.bf16.gmra.mxu1 %vm1637_vm0, %v3733_v40  ;;  %4800 = vmatmul.msk.bf16.gmra.mxu3 %vm1637_vm0, %v4245_v41  ;;  %v4288_v40 = vld [vmem:[%s5262_s24 + $0x480] sm:$0xf]  ;;  %v5011_v41 = vld [vmem:[%s5262_s24 + $0x484] sm:$0xf0]  ;;  %v3777_v46 = vor.u32 %v4883_v39, %v3776_v38 }
  0x3f   : > { %v4289_v47 = vor.u32 %v5011_v41, %v4288_v40 }
  0x4d   : > { %2048 = vmatmul.bf16.gmra.mxu0 %v3737_v50  ;;  %2368 = vmatmul.bf16.gmra.mxu2 %v4249_v51  ;;  %v4293_v50 = vor.u32 %v5010_v44, %v4290_v45  ;;  %v4889_v44 = vld [vmem:[%s5262_s24 + $0xb4] sm:$0xf0]  ;;  %v4312_v45 = vld [vmem:[%s5262_s24 + $0x4b0] sm:$0xf] }
  0x4e   : > { %4737 = vmatmul.msk.bf16.gmra.mxu1 %vm1637_vm0, %v3741_v52  ;;  %4801 = vmatmul.msk.bf16.gmra.mxu3 %vm1637_vm0, %v4253_v53 }
  0x5d   : > { %2053 = vmatmul.bf16.gmra.mxu0 %v3745_v62  ;;  %2373 = vmatmul.bf16.gmra.mxu2 %v4257_v63  ;;  %v5013_v62 = vld [vmem:[%s5262_s24 + $0x494] sm:$0xf0]  ;;  %v4884_v63 = vld [vmem:[%s5262_s24 + $0x94] sm:$0xf] }
  0x5e   : > { %4738 = vmatmul.msk.bf16.gmra.mxu1 %vm1637_vm0, %v3749_v0  ;;  %4802 = vmatmul.msk.bf16.gmra.mxu3 %vm1637_vm0, %v4261_v1  ;;  %v3786_v0 = vld [vmem:[%s5262_s24 + $0x98] sm:$0xf0]  ;;  %v5012_v1 = vld [vmem:[%s5262_s24 + $0x494] sm:$0xf]  ;;  %v4297_v6 = vor.u32 %v5013_v62, %v4296_v61 }
  0x5f   : > { %v3789_v9 = vor.u32 %v4884_v63, %v3786_v0 }
  0x6d   : > { %2058 = vmatmul.bf16.gmra.mxu0 %v3753_v10  ;;  %2378 = vmatmul.bf16.gmra.mxu2 %v4265_v11  ;;  %v4301_v10 = vor.u32 %v5012_v1, %v4298_v2 }
  0x6e   : > { %4739 = vmatmul.msk.bf16.gmra.mxu1 %vm1637_vm0, %v3757_v12  ;;  %4803 = vmatmul.msk.bf16.gmra.mxu3 %vm1637_vm0, %v4269_v13 }
  0x7d   : > { %2063 = vmatmul.bf16.gmra.mxu0 %v3761_v22  ;;  %2383 = vmatmul.bf16.gmra.mxu2 %v4273_v23  ;;  %v5015_v22 = vld [vmem:[%s5262_s24 + $0x4a4] sm:$0xf0]  ;;  %v4886_v23 = vld [vmem:[%s5262_s24 + $0xa4] sm:$0xf] }
  0x7e   : > { %4740 = vmatmul.msk.bf16.gmra.mxu1 %vm1637_vm0, %v3765_v24  ;;  %4804 = vmatmul.msk.bf16.gmra.mxu3 %vm1637_vm0, %v4277_v25  ;;  %v3794_v24 = vld [vmem:[%s5262_s24 + $0xa8] sm:$0xf0]  ;;  %v5014_v25 = vld [vmem:[%s5262_s24 + $0x4a4] sm:$0xf]  ;;  %v4305_v30 = vor.u32 %v5015_v22, %v4304_v21 }
  0x7f   : > { %v3797_v33 = vor.u32 %v4886_v23, %v3794_v24 }
  0x8d   : > { %2068 = vmatmul.bf16.gmra.mxu0 %v3769_v34  ;;  %2388 = vmatmul.bf16.gmra.mxu2 %v4281_v35  ;;  %v4309_v34 = vor.u32 %v5014_v25, %v4306_v26 }
  0x8e   : > { %4741 = vmatmul.msk.bf16.gmra.mxu1 %vm1637_vm0, %v3773_v36  ;;  %4805 = vmatmul.msk.bf16.gmra.mxu3 %vm1637_vm0, %v4285_v37 }
  0x9a   : > { %v2034_v48 = vpop.f32.mrf.mxu0 }
  0x9b   : > { %v2683_v51 = vpop.f32.mrf.mxu1 }
  0x9c   : > { %v2684_v52 = vadd.f32 %v2683_v51, %v2034_v48  ;;  %v3802_v48 = vld [vmem:[%s5262_s24 + $0xb8] sm:$0xf0] }
  0x9d   : > { %2073 = vmatmul.bf16.gmra.mxu0 %v3777_v46  ;;  %2393 = vmatmul.bf16.gmra.mxu2 %v4289_v47  ;;  %v5017_v46 = vld [vmem:[%s5262_s24 + $0x4b4] sm:$0xf0]  ;;  %v4888_v47 = vld [vmem:[%s5262_s24 + $0xb4] sm:$0xf] }
  0x9e   : > { %3324 = vst.msk [vmem:[%s5361_s30] sm:$0xff] %vm3323_vm1, %v2684_v52  ;;  %4742 = vmatmul.msk.bf16.gmra.mxu1 %vm1637_vm0, %v3781_v49  ;;  %4806 = vmatmul.msk.bf16.gmra.mxu3 %vm1637_vm0, %v4293_v50  ;;  %v5016_v49 = vld [vmem:[%s5262_s24 + $0x4b4] sm:$0xf]  ;;  %v4314_v50 = vld [vmem:[%s5262_s24 + $0x4b8] sm:$0xf0] }
  0xa0   : > { %v2354_v53 = vpop.f32.mrf.mxu2 }
  0xa1   : > { %v3003_v54 = vpop.f32.mrf.mxu3 }
  0xa2   : > { %v3004_v55 = vadd.f32 %v3003_v54, %v2354_v53  ;;  %v2036_v56 = vpop.f32.mrf.mxu0  ;;  %v3801_v53 = vor.u32 %v4889_v44, %v3800_v43  ;;  %v4313_v54 = vor.u32 %v5017_v46, %v4312_v45 }
  0xa3   : > { %v2685_v57 = vpop.f32.mrf.mxu1 }
  0xa4   : > { %3452 = vst.msk [vmem:[%s5361_s30 + $0x400] sm:$0xff] %vm3323_vm1, %v3004_v55  ;;  %v2686_v58 = vadd.f32 %v2685_v57, %v2036_v56  ;;  %v3805_v57 = vor.u32 %v4888_v47, %v3802_v48 }
  0xa6   : > { %3325 = vst.msk [vmem:[%s5361_s30 + $0x8] sm:$0xff] %vm3323_vm1, %v2686_v58  ;;  %v4317_v58 = vor.u32 %v5016_v49, %v4314_v50 }
  0xa8   : > { %v2356_v3 = vpop.f32.mrf.mxu2 }
  0xa9   : > { %v3005_v4 = vpop.f32.mrf.mxu3 }
  0xaa   : > { %v3006_v7 = vadd.f32 %v3005_v4, %v2356_v3  ;;  %v2039_v8 = vpop.f32.mrf.mxu0  ;;  %v3808_v3 = vld [vmem:[%s5262_s24 + $0xc0] sm:$0xf]  ;;  %v4891_v4 = vld [vmem:[%s5262_s24 + $0xc4] sm:$0xf0] }
  0xab   : > { %v2688_v11 = vpop.f32.mrf.mxu1 }
  0xac   : > { %3453 = vst.msk [vmem:[%s5361_s30 + $0x408] sm:$0xff] %vm3323_vm1, %v3006_v7  ;;  %v2689_v12 = vadd.f32 %v2688_v11, %v2039_v8  ;;  %v4890_v7 = vld [vmem:[%s5262_s24 + $0xc4] sm:$0xf]  ;;  %v3810_v8 = vld [vmem:[%s5262_s24 + $0xc8] sm:$0xf0] }
  0xad   : > { %2078 = vmatmul.bf16.gmra.mxu0 %v3785_v5  ;;  %2398 = vmatmul.bf16.gmra.mxu2 %v4297_v6  ;;  %v4320_v5 = vld [vmem:[%s5262_s24 + $0x4c0] sm:$0xf]  ;;  %v5019_v6 = vld [vmem:[%s5262_s24 + $0x4c4] sm:$0xf0] }
  0xae   : > { %3326 = vst.msk [vmem:[%s5361_s30 + $0x10] sm:$0xff] %vm3323_vm1, %v2689_v12  ;;  %4743 = vmatmul.msk.bf16.gmra.mxu1 %vm1637_vm0, %v3789_v9  ;;  %4807 = vmatmul.msk.bf16.gmra.mxu3 %vm1637_vm0, %v4301_v10  ;;  %v5018_v9 = vld [vmem:[%s5262_s24 + $0x4c4] sm:$0xf]  ;;  %v4322_v10 = vld [vmem:[%s5262_s24 + $0x4c8] sm:$0xf0] }
  0xb0   : > { %v2359_v13 = vpop.f32.mrf.mxu2 }
  0xb1   : > { %v3008_v14 = vpop.f32.mrf.mxu3 }
  0xb2   : > { %v3009_v15 = vadd.f32 %v3008_v14, %v2359_v13  ;;  %v2041_v16 = vpop.f32.mrf.mxu0  ;;  %v3809_v13 = vor.u32 %v4891_v4, %v3808_v3  ;;  %v4321_v14 = vor.u32 %v5019_v6, %v4320_v5 }
  0xb3   : > { %v2690_v17 = vpop.f32.mrf.mxu1 }
  0xb4   : > { %3454 = vst.msk [vmem:[%s5361_s30 + $0x410] sm:$0xff] %vm3323_vm1, %v3009_v15  ;;  %v2691_v18 = vadd.f32 %v2690_v17, %v2041_v16  ;;  %v3813_v17 = vor.u32 %v4890_v7, %v3810_v8 }
  0xb6   : > { %3327 = vst.msk [vmem:[%s5361_s30 + $0x18] sm:$0xff] %vm3323_vm1, %v2691_v18  ;;  %v4325_v18 = vor.u32 %v5018_v9, %v4322_v10 }
  0xb8   : > { %v2361_v27 = vpop.f32.mrf.mxu2 }
  0xb9   : > { %v3010_v28 = vpop.f32.mrf.mxu3 }
  0xba   : > { %v3011_v31 = vadd.f32 %v3010_v28, %v2361_v27  ;;  %v2044_v32 = vpop.f32.mrf.mxu0  ;;  %v3816_v27 = vld [vmem:[%s5262_s24 + $0xd0] sm:$0xf]  ;;  %v4893_v28 = vld [vmem:[%s5262_s24 + $0xd4] sm:$0xf0] }
  0xbb   : > { %v2693_v35 = vpop.f32.mrf.mxu1 }
  0xbc   : > { %3455 = vst.msk [vmem:[%s5361_s30 + $0x418] sm:$0xff] %vm3323_vm1, %v3011_v31  ;;  %v2694_v36 = vadd.f32 %v2693_v35, %v2044_v32  ;;  %v4892_v31 = vld [vmem:[%s5262_s24 + $0xd4] sm:$0xf]  ;;  %v3818_v32 = vld [vmem:[%s5262_s24 + $0xd8] sm:$0xf0] }
  0xbd   : > { %2083 = vmatmul.bf16.gmra.mxu0 %v3793_v29  ;;  %2403 = vmatmul.bf16.gmra.mxu2 %v4305_v30  ;;  %v4328_v29 = vld [vmem:[%s5262_s24 + $0x4d0] sm:$0xf]  ;;  %v5021_v30 = vld [vmem:[%s5262_s24 + $0x4d4] sm:$0xf0] }
  0xbe   : > { %3328 = vst.msk [vmem:[%s5361_s30 + $0x20] sm:$0xff] %vm3323_vm1, %v2694_v36  ;;  %4744 = vmatmul.msk.bf16.gmra.mxu1 %vm1637_vm0, %v3797_v33  ;;  %4808 = vmatmul.msk.bf16.gmra.mxu3 %vm1637_vm0, %v4309_v34  ;;  %v5020_v33 = vld [vmem:[%s5262_s24 + $0x4d4] sm:$0xf]  ;;  %v4330_v34 = vld [vmem:[%s5262_s24 + $0x4d8] sm:$0xf0] }
  0xc0   : > { %v2364_v37 = vpop.f32.mrf.mxu2 }
  0xc1   : > { %v3013_v38 = vpop.f32.mrf.mxu3 }
  0xc2   : > { %v3014_v39 = vadd.f32 %v3013_v38, %v2364_v37  ;;  %v2046_v40 = vpop.f32.mrf.mxu0  ;;  %v3817_v37 = vor.u32 %v4893_v28, %v3816_v27  ;;  %v4329_v38 = vor.u32 %v5021_v30, %v4328_v29 }
  0xc3   : > { %v2695_v41 = vpop.f32.mrf.mxu1 }
  0xc4   : > { %3456 = vst.msk [vmem:[%s5361_s30 + $0x420] sm:$0xff] %vm3323_vm1, %v3014_v39  ;;  %v2696_v42 = vadd.f32 %v2695_v41, %v2046_v40  ;;  %v3821_v41 = vor.u32 %v4892_v31, %v3818_v32 }
  0xc6   : > { %3329 = vst.msk [vmem:[%s5361_s30 + $0x28] sm:$0xff] %vm3323_vm1, %v2696_v42  ;;  %v4333_v42 = vor.u32 %v5020_v33, %v4330_v34 }
  0xc8   : > { %v2366_v51 = vpop.f32.mrf.mxu2 }
  0xc9   : > { %v3015_v52 = vpop.f32.mrf.mxu3 }
  0xca   : > { %v3016_v55 = vadd.f32 %v3015_v52, %v2366_v51  ;;  %v2049_v56 = vpop.f32.mrf.mxu0  ;;  %v3824_v51 = vld [vmem:[%s5262_s24 + $0xe0] sm:$0xf]  ;;  %v4895_v52 = vld [vmem:[%s5262_s24 + $0xe4] sm:$0xf0] }
  0xcb   : > { %v2698_v59 = vpop.f32.mrf.mxu1 }
  0xcc   : > { %3457 = vst.msk [vmem:[%s5361_s30 + $0x428] sm:$0xff] %vm3323_vm1, %v3016_v55  ;;  %v2699_v60 = vadd.f32 %v2698_v59, %v2049_v56  ;;  %v4894_v55 = vld [vmem:[%s5262_s24 + $0xe4] sm:$0xf]  ;;  %v3826_v56 = vld [vmem:[%s5262_s24 + $0xe8] sm:$0xf0] }
  0xcd   : > { %2088 = vmatmul.bf16.gmra.mxu0 %v3801_v53  ;;  %2408 = vmatmul.bf16.gmra.mxu2 %v4313_v54  ;;  %v4336_v53 = vld [vmem:[%s5262_s24 + $0x4e0] sm:$0xf]  ;;  %v5023_v54 = vld [vmem:[%s5262_s24 + $0x4e4] sm:$0xf0] }
  0xce   : > { %3330 = vst.msk [vmem:[%s5361_s30 + $0x30] sm:$0xff] %vm3323_vm1, %v2699_v60  ;;  %4745 = vmatmul.msk.bf16.gmra.mxu1 %vm1637_vm0, %v3805_v57  ;;  %4809 = vmatmul.msk.bf16.gmra.mxu3 %vm1637_vm0, %v4317_v58  ;;  %v5022_v57 = vld [vmem:[%s5262_s24 + $0x4e4] sm:$0xf]  ;;  %v4338_v58 = vld [vmem:[%s5262_s24 + $0x4e8] sm:$0xf0] }
  0xd0   : > { %v2369_v61 = vpop.f32.mrf.mxu2 }
  0xd1   : > { %v3018_v62 = vpop.f32.mrf.mxu3 }
  0xd2   : > { %v3019_v63 = vadd.f32 %v3018_v62, %v2369_v61  ;;  %v2051_v0 = vpop.f32.mrf.mxu0  ;;  %v3825_v61 = vor.u32 %v4895_v52, %v3824_v51  ;;  %v4337_v62 = vor.u32 %v5023_v54, %v4336_v53 }
  0xd3   : > { %v2700_v1 = vpop.f32.mrf.mxu1 }
  0xd4   : > { %3458 = vst.msk [vmem:[%s5361_s30 + $0x430] sm:$0xff] %vm3323_vm1, %v3019_v63  ;;  %v2701_v2 = vadd.f32 %v2700_v1, %v2051_v0  ;;  %v3829_v1 = vor.u32 %v4894_v55, %v3826_v56 }
  0xd6   : > { %3331 = vst.msk [vmem:[%s5361_s30 + $0x38] sm:$0xff] %vm3323_vm1, %v2701_v2  ;;  %v4341_v2 = vor.u32 %v5022_v57, %v4338_v58 }
  0xd8   : > { %v2371_v11 = vpop.f32.mrf.mxu2 }
  0xd9   : > { %v3020_v12 = vpop.f32.mrf.mxu3 }
  0xda   : > { %v3021_v15 = vadd.f32 %v3020_v12, %v2371_v11  ;;  %v2054_v16 = vpop.f32.mrf.mxu0  ;;  %v3832_v11 = vld [vmem:[%s5262_s24 + $0xf0] sm:$0xf]  ;;  %v4897_v12 = vld [vmem:[%s5262_s24 + $0xf4] sm:$0xf0] }
  0xdb   : > { %v2703_v19 = vpop.f32.mrf.mxu1 }
  0xdc   : > { %3459 = vst.msk [vmem:[%s5361_s30 + $0x438] sm:$0xff] %vm3323_vm1, %v3021_v15  ;;  %v2704_v20 = vadd.f32 %v2703_v19, %v2054_v16  ;;  %v4896_v15 = vld [vmem:[%s5262_s24 + $0xf4] sm:$0xf]  ;;  %v3834_v16 = vld [vmem:[%s5262_s24 + $0xf8] sm:$0xf0] }
  0xdd   : > { %2093 = vmatmul.bf16.gmra.mxu0 %v3809_v13  ;;  %2413 = vmatmul.bf16.gmra.mxu2 %v4321_v14  ;;  %v4344_v13 = vld [vmem:[%s5262_s24 + $0x4f0] sm:$0xf]  ;;  %v5025_v14 = vld [vmem:[%s5262_s24 + $0x4f4] sm:$0xf0] }
  0xde   : > { %3332 = vst.msk [vmem:[%s5361_s30 + $0x40] sm:$0xff] %vm3323_vm1, %v2704_v20  ;;  %4746 = vmatmul.msk.bf16.gmra.mxu1 %vm1637_vm0, %v3813_v17  ;;  %4810 = vmatmul.msk.bf16.gmra.mxu3 %vm1637_vm0, %v4325_v18  ;;  %v5024_v17 = vld [vmem:[%s5262_s24 + $0x4f4] sm:$0xf]  ;;  %v4346_v18 = vld [vmem:[%s5262_s24 + $0x4f8] sm:$0xf0] }
  0xe0   : > { %v2374_v21 = vpop.f32.mrf.mxu2 }
  0xe1   : > { %v3023_v22 = vpop.f32.mrf.mxu3 }
  0xe2   : > { %v3024_v23 = vadd.f32 %v3023_v22, %v2374_v21  ;;  %v2056_v24 = vpop.f32.mrf.mxu0  ;;  %v3833_v21 = vor.u32 %v4897_v12, %v3832_v11  ;;  %v4345_v22 = vor.u32 %v5025_v14, %v4344_v13 }
  0xe3   : > { %v2705_v25 = vpop.f32.mrf.mxu1 }
  0xe4   : > { %3460 = vst.msk [vmem:[%s5361_s30 + $0x440] sm:$0xff] %vm3323_vm1, %v3024_v23  ;;  %v2706_v26 = vadd.f32 %v2705_v25, %v2056_v24  ;;  %v3837_v25 = vor.u32 %v4896_v15, %v3834_v16 }
  0xe6   : > { %3333 = vst.msk [vmem:[%s5361_s30 + $0x48] sm:$0xff] %vm3323_vm1, %v2706_v26  ;;  %v4349_v26 = vor.u32 %v5024_v17, %v4346_v18 }
  0xe8   : > { %v2376_v35 = vpop.f32.mrf.mxu2 }
  0xe9   : > { %v3025_v36 = vpop.f32.mrf.mxu3 }
  0xea   : > { %v3026_v39 = vadd.f32 %v3025_v36, %v2376_v35  ;;  %v2059_v40 = vpop.f32.mrf.mxu0  ;;  %v3840_v35 = vld [vmem:[%s5262_s24 + $0x100] sm:$0xf]  ;;  %v4899_v36 = vld [vmem:[%s5262_s24 + $0x104] sm:$0xf0] }
  0xeb   : > { %v2708_v43 = vpop.f32.mrf.mxu1 }
  0xec   : > { %3461 = vst.msk [vmem:[%s5361_s30 + $0x448] sm:$0xff] %vm3323_vm1, %v3026_v39  ;;  %v2709_v44 = vadd.f32 %v2708_v43, %v2059_v40  ;;  %v4898_v39 = vld [vmem:[%s5262_s24 + $0x104] sm:$0xf]  ;;  %v3842_v40 = vld [vmem:[%s5262_s24 + $0x108] sm:$0xf0] }
  0xed   : > { %2098 = vmatmul.bf16.gmra.mxu0 %v3817_v37  ;;  %2418 = vmatmul.bf16.gmra.mxu2 %v4329_v38  ;;  %v4352_v37 = vld [vmem:[%s5262_s24 + $0x500] sm:$0xf]  ;;  %v5027_v38 = vld [vmem:[%s5262_s24 + $0x504] sm:$0xf0] }
  0xee   : > { %3334 = vst.msk [vmem:[%s5361_s30 + $0x50] sm:$0xff] %vm3323_vm1, %v2709_v44  ;;  %4747 = vmatmul.msk.bf16.gmra.mxu1 %vm1637_vm0, %v3821_v41  ;;  %4811 = vmatmul.msk.bf16.gmra.mxu3 %vm1637_vm0, %v4333_v42  ;;  %v5026_v41 = vld [vmem:[%s5262_s24 + $0x504] sm:$0xf]  ;;  %v4354_v42 = vld [vmem:[%s5262_s24 + $0x508] sm:$0xf0] }
  0xf0   : > { %v2379_v45 = vpop.f32.mrf.mxu2 }
  0xf1   : > { %v3028_v46 = vpop.f32.mrf.mxu3 }
  0xf2   : > { %v3029_v47 = vadd.f32 %v3028_v46, %v2379_v45  ;;  %v2061_v48 = vpop.f32.mrf.mxu0  ;;  %v3841_v45 = vor.u32 %v4899_v36, %v3840_v35  ;;  %v4353_v46 = vor.u32 %v5027_v38, %v4352_v37 }
  0xf3   : > { %v2710_v49 = vpop.f32.mrf.mxu1 }
  0xf4   : > { %3462 = vst.msk [vmem:[%s5361_s30 + $0x450] sm:$0xff] %vm3323_vm1, %v3029_v47  ;;  %v2711_v50 = vadd.f32 %v2710_v49, %v2061_v48  ;;  %v3845_v49 = vor.u32 %v4898_v39, %v3842_v40 }
  0xf6   : > { %3335 = vst.msk [vmem:[%s5361_s30 + $0x58] sm:$0xff] %vm3323_vm1, %v2711_v50  ;;  %v4357_v50 = vor.u32 %v5026_v41, %v4354_v42 }
  0xf8   : > { %v2381_v59 = vpop.f32.mrf.mxu2 }
  0xf9   : > { %v3030_v60 = vpop.f32.mrf.mxu3 }
  0xfa   : > { %v3031_v63 = vadd.f32 %v3030_v60, %v2381_v59  ;;  %v2064_v0 = vpop.f32.mrf.mxu0  ;;  %v3848_v59 = vld [vmem:[%s5262_s24 + $0x110] sm:$0xf]  ;;  %v4901_v60 = vld [vmem:[%s5262_s24 + $0x114] sm:$0xf0] }
  0xfb   : > { %v2713_v3 = vpop.f32.mrf.mxu1 }
  0xfc   : > { %3463 = vst.msk [vmem:[%s5361_s30 + $0x458] sm:$0xff] %vm3323_vm1, %v3031_v63  ;;  %v2714_v4 = vadd.f32 %v2713_v3, %v2064_v0  ;;  %v4900_v63 = vld [vmem:[%s5262_s24 + $0x114] sm:$0xf]  ;;  %v3850_v0 = vld [vmem:[%s5262_s24 + $0x118] sm:$0xf0] }
  0xfd   : > { %2103 = vmatmul.bf16.gmra.mxu0 %v3825_v61  ;;  %2423 = vmatmul.bf16.gmra.mxu2 %v4337_v62  ;;  %v4360_v61 = vld [vmem:[%s5262_s24 + $0x510] sm:$0xf]  ;;  %v5029_v62 = vld [vmem:[%s5262_s24 + $0x514] sm:$0xf0] }
  0xfe   : > { %3336 = vst.msk [vmem:[%s5361_s30 + $0x60] sm:$0xff] %vm3323_vm1, %v2714_v4  ;;  %4748 = vmatmul.msk.bf16.gmra.mxu1 %vm1637_vm0, %v3829_v1  ;;  %4812 = vmatmul.msk.bf16.gmra.mxu3 %vm1637_vm0, %v4341_v2  ;;  %v5028_v1 = vld [vmem:[%s5262_s24 + $0x514] sm:$0xf]  ;;  %v4362_v2 = vld [vmem:[%s5262_s24 + $0x518] sm:$0xf0] }
 0x100   : > { %v2384_v5 = vpop.f32.mrf.mxu2 }
 0x101   : > { %v3033_v6 = vpop.f32.mrf.mxu3 }
 0x102   : > { %v3034_v7 = vadd.f32 %v3033_v6, %v2384_v5  ;;  %v2066_v8 = vpop.f32.mrf.mxu0  ;;  %v3849_v5 = vor.u32 %v4901_v60, %v3848_v59  ;;  %v4361_v6 = vor.u32 %v5029_v62, %v4360_v61 }
 0x103   : > { %v2715_v9 = vpop.f32.mrf.mxu1 }
 0x104   : > { %3464 = vst.msk [vmem:[%s5361_s30 + $0x460] sm:$0xff] %vm3323_vm1, %v3034_v7  ;;  %v2716_v10 = vadd.f32 %v2715_v9, %v2066_v8  ;;  %v3853_v9 = vor.u32 %v4900_v63, %v3850_v0 }
 0x106   : > { %3337 = vst.msk [vmem:[%s5361_s30 + $0x68] sm:$0xff] %vm3323_vm1, %v2716_v10  ;;  %v4365_v10 = vor.u32 %v5028_v1, %v4362_v2 }
 0x108   : > { %v2386_v19 = vpop.f32.mrf.mxu2 }
 0x109   : > { %v3035_v20 = vpop.f32.mrf.mxu3 }
 0x10a   : > { %v3036_v23 = vadd.f32 %v3035_v20, %v2386_v19  ;;  %v2069_v24 = vpop.f32.mrf.mxu0  ;;  %v3856_v19 = vld [vmem:[%s5262_s24 + $0x120] sm:$0xf]  ;;  %v4903_v20 = vld [vmem:[%s5262_s24 + $0x124] sm:$0xf0] }
 0x10b   : > { %v2718_v27 = vpop.f32.mrf.mxu1 }
 0x10c   : > { %3465 = vst.msk [vmem:[%s5361_s30 + $0x468] sm:$0xff] %vm3323_vm1, %v3036_v23  ;;  %v2719_v28 = vadd.f32 %v2718_v27, %v2069_v24  ;;  %v4902_v23 = vld [vmem:[%s5262_s24 + $0x124] sm:$0xf]  ;;  %v3858_v24 = vld [vmem:[%s5262_s24 + $0x128] sm:$0xf0] }
 0x10d   : > { %2108 = vmatmul.bf16.gmra.mxu0 %v3833_v21  ;;  %2428 = vmatmul.bf16.gmra.mxu2 %v4345_v22  ;;  %v4368_v21 = vld [vmem:[%s5262_s24 + $0x520] sm:$0xf]  ;;  %v5031_v22 = vld [vmem:[%s5262_s24 + $0x524] sm:$0xf0] }
 0x10e   : > { %3338 = vst.msk [vmem:[%s5361_s30 + $0x70] sm:$0xff] %vm3323_vm1, %v2719_v28  ;;  %4749 = vmatmul.msk.bf16.gmra.mxu1 %vm1637_vm0, %v3837_v25  ;;  %4813 = vmatmul.msk.bf16.gmra.mxu3 %vm1637_vm0, %v4349_v26  ;;  %v5030_v25 = vld [vmem:[%s5262_s24 + $0x524] sm:$0xf]  ;;  %v4370_v26 = vld [vmem:[%s5262_s24 + $0x528] sm:$0xf0] }
 0x110   : > { %v2389_v29 = vpop.f32.mrf.mxu2 }
 0x111   : > { %v3038_v30 = vpop.f32.mrf.mxu3 }
 0x112   : > { %v3039_v31 = vadd.f32 %v3038_v30, %v2389_v29  ;;  %v2071_v32 = vpop.f32.mrf.mxu0  ;;  %v3857_v29 = vor.u32 %v4903_v20, %v3856_v19  ;;  %v4369_v30 = vor.u32 %v5031_v22, %v4368_v21 }
 0x113   : > { %v2720_v33 = vpop.f32.mrf.mxu1 }
 0x114   : > { %3466 = vst.msk [vmem:[%s5361_s30 + $0x470] sm:$0xff] %vm3323_vm1, %v3039_v31  ;;  %v2721_v34 = vadd.f32 %v2720_v33, %v2071_v32  ;;  %v3861_v33 = vor.u32 %v4902_v23, %v3858_v24 }
 0x116   : > { %3339 = vst.msk [vmem:[%s5361_s30 + $0x78] sm:$0xff] %vm3323_vm1, %v2721_v34  ;;  %v4373_v34 = vor.u32 %v5030_v25, %v4370_v26 }
 0x118   : > { %v2391_v43 = vpop.f32.mrf.mxu2 }
 0x119   : > { %v3040_v44 = vpop.f32.mrf.mxu3 }
 0x11a   : > { %v3041_v47 = vadd.f32 %v3040_v44, %v2391_v43  ;;  %v2074_v48 = vpop.f32.mrf.mxu0  ;;  %v3864_v43 = vld [vmem:[%s5262_s24 + $0x130] sm:$0xf]  ;;  %v4905_v44 = vld [vmem:[%s5262_s24 + $0x134] sm:$0xf0] }
 0x11b   : > { %v2723_v51 = vpop.f32.mrf.mxu1 }
 0x11c   : > { %3467 = vst.msk [vmem:[%s5361_s30 + $0x478] sm:$0xff] %vm3323_vm1, %v3041_v47  ;;  %v2724_v52 = vadd.f32 %v2723_v51, %v2074_v48  ;;  %v4904_v47 = vld [vmem:[%s5262_s24 + $0x134] sm:$0xf]  ;;  %v3866_v48 = vld [vmem:[%s5262_s24 + $0x138] sm:$0xf0] }
 0x11d   : > { %2113 = vmatmul.bf16.gmra.mxu0 %v3841_v45  ;;  %2433 = vmatmul.bf16.gmra.mxu2 %v4353_v46  ;;  %v4376_v45 = vld [vmem:[%s5262_s24 + $0x530] sm:$0xf]  ;;  %v5033_v46 = vld [vmem:[%s5262_s24 + $0x534] sm:$0xf0] }
 0x11e   : > { %3340 = vst.msk [vmem:[%s5361_s30 + $0x80] sm:$0xff] %vm3323_vm1, %v2724_v52  ;;  %4750 = vmatmul.msk.bf16.gmra.mxu1 %vm1637_vm0, %v3845_v49  ;;  %4814 = vmatmul.msk.bf16.gmra.mxu3 %vm1637_vm0, %v4357_v50  ;;  %v5032_v49 = vld [vmem:[%s5262_s24 + $0x534] sm:$0xf]  ;;  %v4378_v50 = vld [vmem:[%s5262_s24 + $0x538] sm:$0xf0] }
 0x120   : > { %v2394_v53 = vpop.f32.mrf.mxu2 }
 0x121   : > { %v3043_v54 = vpop.f32.mrf.mxu3 }
 0x122   : > { %v3044_v55 = vadd.f32 %v3043_v54, %v2394_v53  ;;  %v2076_v56 = vpop.f32.mrf.mxu0  ;;  %v3865_v53 = vor.u32 %v4905_v44, %v3864_v43  ;;  %v4377_v54 = vor.u32 %v5033_v46, %v4376_v45 }
 0x123   : > { %v2725_v57 = vpop.f32.mrf.mxu1 }
 0x124   : > { %3468 = vst.msk [vmem:[%s5361_s30 + $0x480] sm:$0xff] %vm3323_vm1, %v3044_v55  ;;  %v2726_v58 = vadd.f32 %v2725_v57, %v2076_v56  ;;  %v3869_v57 = vor.u32 %v4904_v47, %v3866_v48 }
 0x126   : > { %3341 = vst.msk [vmem:[%s5361_s30 + $0x88] sm:$0xff] %vm3323_vm1, %v2726_v58  ;;  %v4381_v58 = vor.u32 %v5032_v49, %v4378_v50 }
 0x128   : > { %v2396_v3 = vpop.f32.mrf.mxu2 }
 0x129   : > { %v3045_v4 = vpop.f32.mrf.mxu3 }
 0x12a   : > { %v3046_v7 = vadd.f32 %v3045_v4, %v2396_v3  ;;  %v2079_v8 = vpop.f32.mrf.mxu0  ;;  %v3872_v3 = vld [vmem:[%s5262_s24 + $0x140] sm:$0xf]  ;;  %v4907_v4 = vld [vmem:[%s5262_s24 + $0x144] sm:$0xf0] }
 0x12b   : > { %v2728_v11 = vpop.f32.mrf.mxu1 }
 0x12c   : > { %3469 = vst.msk [vmem:[%s5361_s30 + $0x488] sm:$0xff] %vm3323_vm1, %v3046_v7  ;;  %v2729_v12 = vadd.f32 %v2728_v11, %v2079_v8  ;;  %v4906_v7 = vld [vmem:[%s5262_s24 + $0x144] sm:$0xf]  ;;  %v3874_v8 = vld [vmem:[%s5262_s24 + $0x148] sm:$0xf0] }
 0x12d   : > { %2118 = vmatmul.bf16.gmra.mxu0 %v3849_v5  ;;  %2438 = vmatmul.bf16.gmra.mxu2 %v4361_v6  ;;  %v4384_v5 = vld [vmem:[%s5262_s24 + $0x540] sm:$0xf]  ;;  %v5035_v6 = vld [vmem:[%s5262_s24 + $0x544] sm:$0xf0] }
 0x12e   : > { %3342 = vst.msk [vmem:[%s5361_s30 + $0x90] sm:$0xff] %vm3323_vm1, %v2729_v12  ;;  %4751 = vmatmul.msk.bf16.gmra.mxu1 %vm1637_vm0, %v3853_v9  ;;  %4815 = vmatmul.msk.bf16.gmra.mxu3 %vm1637_vm0, %v4365_v10  ;;  %v5034_v9 = vld [vmem:[%s5262_s24 + $0x544] sm:$0xf]  ;;  %v4386_v10 = vld [vmem:[%s5262_s24 + $0x548] sm:$0xf0] }
 0x130   : > { %v2399_v13 = vpop.f32.mrf.mxu2 }
 0x131   : > { %v3048_v14 = vpop.f32.mrf.mxu3 }
 0x132   : > { %v3049_v15 = vadd.f32 %v3048_v14, %v2399_v13  ;;  %v2081_v16 = vpop.f32.mrf.mxu0  ;;  %v3873_v13 = vor.u32 %v4907_v4, %v3872_v3  ;;  %v4385_v14 = vor.u32 %v5035_v6, %v4384_v5 }
 0x133   : > { %v2730_v17 = vpop.f32.mrf.mxu1 }
 0x134   : > { %3470 = vst.msk [vmem:[%s5361_s30 + $0x490] sm:$0xff] %vm3323_vm1, %v3049_v15  ;;  %v2731_v18 = vadd.f32 %v2730_v17, %v2081_v16  ;;  %v3877_v17 = vor.u32 %v4906_v7, %v3874_v8 }
 0x136   : > { %3343 = vst.msk [vmem:[%s5361_s30 + $0x98] sm:$0xff] %vm3323_vm1, %v2731_v18  ;;  %v4389_v18 = vor.u32 %v5034_v9, %v4386_v10 }
 0x138   : > { %v2401_v27 = vpop.f32.mrf.mxu2 }
 0x139   : > { %v3050_v28 = vpop.f32.mrf.mxu3 }
 0x13a   : > { %v3051_v31 = vadd.f32 %v3050_v28, %v2401_v27  ;;  %v2084_v32 = vpop.f32.mrf.mxu0  ;;  %v3880_v27 = vld [vmem:[%s5262_s24 + $0x150] sm:$0xf]  ;;  %v4909_v28 = vld [vmem:[%s5262_s24 + $0x154] sm:$0xf0] }
 0x13b   : > { %v2733_v35 = vpop.f32.mrf.mxu1 }
 0x13c   : > { %3471 = vst.msk [vmem:[%s5361_s30 + $0x498] sm:$0xff] %vm3323_vm1, %v3051_v31  ;;  %v2734_v36 = vadd.f32 %v2733_v35, %v2084_v32  ;;  %v4908_v31 = vld [vmem:[%s5262_s24 + $0x154] sm:$0xf]  ;;  %v3882_v32 = vld [vmem:[%s5262_s24 + $0x158] sm:$0xf0] }
 0x13d   : > { %2123 = vmatmul.bf16.gmra.mxu0 %v3857_v29  ;;  %2443 = vmatmul.bf16.gmra.mxu2 %v4369_v30  ;;  %v4392_v29 = vld [vmem:[%s5262_s24 + $0x550] sm:$0xf]  ;;  %v5037_v30 = vld [vmem:[%s5262_s24 + $0x554] sm:$0xf0] }
 0x13e   : > { %3344 = vst.msk [vmem:[%s5361_s30 + $0xa0] sm:$0xff] %vm3323_vm1, %v2734_v36  ;;  %4752 = vmatmul.msk.bf16.gmra.mxu1 %vm1637_vm0, %v3861_v33  ;;  %4816 = vmatmul.msk.bf16.gmra.mxu3 %vm1637_vm0, %v4373_v34  ;;  %v5036_v33 = vld [vmem:[%s5262_s24 + $0x554] sm:$0xf]  ;;  %v4394_v34 = vld [vmem:[%s5262_s24 + $0x558] sm:$0xf0] }
 0x140   : > { %v2404_v37 = vpop.f32.mrf.mxu2 }
 0x141   : > { %v3053_v38 = vpop.f32.mrf.mxu3 }
 0x142   : > { %v3054_v39 = vadd.f32 %v3053_v38, %v2404_v37  ;;  %v2086_v40 = vpop.f32.mrf.mxu0  ;;  %v3881_v37 = vor.u32 %v4909_v28, %v3880_v27  ;;  %v4393_v38 = vor.u32 %v5037_v30, %v4392_v29 }
 0x143   : > { %v2735_v41 = vpop.f32.mrf.mxu1 }
 0x144   : > { %3472 = vst.msk [vmem:[%s5361_s30 + $0x4a0] sm:$0xff] %vm3323_vm1, %v3054_v39  ;;  %v2736_v42 = vadd.f32 %v2735_v41, %v2086_v40  ;;  %v3885_v41 = vor.u32 %v4908_v31, %v3882_v32 }
 0x146   : > { %3345 = vst.msk [vmem:[%s5361_s30 + $0xa8] sm:$0xff] %vm3323_vm1, %v2736_v42  ;;  %v4397_v42 = vor.u32 %v5036_v33, %v4394_v34 }
 0x148   : > { %v2406_v51 = vpop.f32.mrf.mxu2 }
 0x149   : > { %v3055_v52 = vpop.f32.mrf.mxu3 }
 0x14a   : > { %v3056_v55 = vadd.f32 %v3055_v52, %v2406_v51  ;;  %v2089_v56 = vpop.f32.mrf.mxu0  ;;  %v3888_v51 = vld [vmem:[%s5262_s24 + $0x160] sm:$0xf]  ;;  %v4911_v52 = vld [vmem:[%s5262_s24 + $0x164] sm:$0xf0] }
 0x14b   : > { %v2738_v59 = vpop.f32.mrf.mxu1 }
 0x14c   : > { %3473 = vst.msk [vmem:[%s5361_s30 + $0x4a8] sm:$0xff] %vm3323_vm1, %v3056_v55  ;;  %v2739_v60 = vadd.f32 %v2738_v59, %v2089_v56  ;;  %v4910_v55 = vld [vmem:[%s5262_s24 + $0x164] sm:$0xf]  ;;  %v3890_v56 = vld [vmem:[%s5262_s24 + $0x168] sm:$0xf0] }
 0x14d   : > { %2128 = vmatmul.bf16.gmra.mxu0 %v3865_v53  ;;  %2448 = vmatmul.bf16.gmra.mxu2 %v4377_v54  ;;  %v4400_v53 = vld [vmem:[%s5262_s24 + $0x560] sm:$0xf]  ;;  %v5039_v54 = vld [vmem:[%s5262_s24 + $0x564] sm:$0xf0] }
 0x14e   : > { %3346 = vst.msk [vmem:[%s5361_s30 + $0xb0] sm:$0xff] %vm3323_vm1, %v2739_v60  ;;  %4753 = vmatmul.msk.bf16.gmra.mxu1 %vm1637_vm0, %v3869_v57  ;;  %4817 = vmatmul.msk.bf16.gmra.mxu3 %vm1637_vm0, %v4381_v58  ;;  %v5038_v57 = vld [vmem:[%s5262_s24 + $0x564] sm:$0xf]  ;;  %v4402_v58 = vld [vmem:[%s5262_s24 + $0x568] sm:$0xf0] }
 0x150   : > { %v2409_v61 = vpop.f32.mrf.mxu2 }
 0x151   : > { %v3058_v62 = vpop.f32.mrf.mxu3 }
 0x152   : > { %v3059_v63 = vadd.f32 %v3058_v62, %v2409_v61  ;;  %v2091_v0 = vpop.f32.mrf.mxu0  ;;  %v3889_v61 = vor.u32 %v4911_v52, %v3888_v51  ;;  %v4401_v62 = vor.u32 %v5039_v54, %v4400_v53 }
 0x153   : > { %v2740_v1 = vpop.f32.mrf.mxu1 }
 0x154   : > { %3474 = vst.msk [vmem:[%s5361_s30 + $0x4b0] sm:$0xff] %vm3323_vm1, %v3059_v63  ;;  %v2741_v2 = vadd.f32 %v2740_v1, %v2091_v0  ;;  %v3893_v1 = vor.u32 %v4910_v55, %v3890_v56 }
 0x156   : > { %3347 = vst.msk [vmem:[%s5361_s30 + $0xb8] sm:$0xff] %vm3323_vm1, %v2741_v2  ;;  %v4405_v2 = vor.u32 %v5038_v57, %v4402_v58 }
 0x158   : > { %v2411_v11 = vpop.f32.mrf.mxu2 }
 0x159   : > { %v3060_v12 = vpop.f32.mrf.mxu3 }
 0x15a   : > { %v3061_v15 = vadd.f32 %v3060_v12, %v2411_v11  ;;  %v2094_v16 = vpop.f32.mrf.mxu0  ;;  %v3896_v11 = vld [vmem:[%s5262_s24 + $0x170] sm:$0xf]  ;;  %v4913_v12 = vld [vmem:[%s5262_s24 + $0x174] sm:$0xf0] }
 0x15b   : > { %v2743_v19 = vpop.f32.mrf.mxu1 }
 0x15c   : > { %3475 = vst.msk [vmem:[%s5361_s30 + $0x4b8] sm:$0xff] %vm3323_vm1, %v3061_v15  ;;  %v2744_v20 = vadd.f32 %v2743_v19, %v2094_v16  ;;  %v4912_v15 = vld [vmem:[%s5262_s24 + $0x174] sm:$0xf]  ;;  %v3898_v16 = vld [vmem:[%s5262_s24 + $0x178] sm:$0xf0] }
 0x15d   : > { %2133 = vmatmul.bf16.gmra.mxu0 %v3873_v13  ;;  %2453 = vmatmul.bf16.gmra.mxu2 %v4385_v14  ;;  %v4408_v13 = vld [vmem:[%s5262_s24 + $0x570] sm:$0xf]  ;;  %v5041_v14 = vld [vmem:[%s5262_s24 + $0x574] sm:$0xf0] }
 0x15e   : > { %3348 = vst.msk [vmem:[%s5361_s30 + $0xc0] sm:$0xff] %vm3323_vm1, %v2744_v20  ;;  %4754 = vmatmul.msk.bf16.gmra.mxu1 %vm1637_vm0, %v3877_v17  ;;  %4818 = vmatmul.msk.bf16.gmra.mxu3 %vm1637_vm0, %v4389_v18  ;;  %v5040_v17 = vld [vmem:[%s5262_s24 + $0x574] sm:$0xf]  ;;  %v4410_v18 = vld [vmem:[%s5262_s24 + $0x578] sm:$0xf0] }
 0x160   : > { %v2414_v21 = vpop.f32.mrf.mxu2 }
 0x161   : > { %v3063_v22 = vpop.f32.mrf.mxu3 }
 0x162   : > { %v3064_v23 = vadd.f32 %v3063_v22, %v2414_v21  ;;  %v2096_v24 = vpop.f32.mrf.mxu0  ;;  %v3897_v21 = vor.u32 %v4913_v12, %v3896_v11  ;;  %v4409_v22 = vor.u32 %v5041_v14, %v4408_v13 }
 0x163   : > { %v2745_v25 = vpop.f32.mrf.mxu1 }
 0x164   : > { %3476 = vst.msk [vmem:[%s5361_s30 + $0x4c0] sm:$0xff] %vm3323_vm1, %v3064_v23  ;;  %v2746_v26 = vadd.f32 %v2745_v25, %v2096_v24  ;;  %v3901_v25 = vor.u32 %v4912_v15, %v3898_v16 }
 0x166   : > { %3349 = vst.msk [vmem:[%s5361_s30 + $0xc8] sm:$0xff] %vm3323_vm1, %v2746_v26  ;;  %v4413_v26 = vor.u32 %v5040_v17, %v4410_v18 }
 0x168   : > { %v2416_v35 = vpop.f32.mrf.mxu2 }
 0x169   : > { %v3065_v36 = vpop.f32.mrf.mxu3 }
 0x16a   : > { %v3066_v39 = vadd.f32 %v3065_v36, %v2416_v35  ;;  %v2099_v40 = vpop.f32.mrf.mxu0  ;;  %v3904_v35 = vld [vmem:[%s5262_s24 + $0x180] sm:$0xf]  ;;  %v4915_v36 = vld [vmem:[%s5262_s24 + $0x184] sm:$0xf0] }
 0x16b   : > { %v2748_v43 = vpop.f32.mrf.mxu1 }
 0x16c   : > { %3477 = vst.msk [vmem:[%s5361_s30 + $0x4c8] sm:$0xff] %vm3323_vm1, %v3066_v39  ;;  %v2749_v44 = vadd.f32 %v2748_v43, %v2099_v40  ;;  %v4914_v39 = vld [vmem:[%s5262_s24 + $0x184] sm:$0xf]  ;;  %v3906_v40 = vld [vmem:[%s5262_s24 + $0x188] sm:$0xf0] }
 0x16d   : > { %2138 = vmatmul.bf16.gmra.mxu0 %v3881_v37  ;;  %2458 = vmatmul.bf16.gmra.mxu2 %v4393_v38  ;;  %v4416_v37 = vld [vmem:[%s5262_s24 + $0x580] sm:$0xf]  ;;  %v5043_v38 = vld [vmem:[%s5262_s24 + $0x584] sm:$0xf0] }
 0x16e   : > { %3350 = vst.msk [vmem:[%s5361_s30 + $0xd0] sm:$0xff] %vm3323_vm1, %v2749_v44  ;;  %4755 = vmatmul.msk.bf16.gmra.mxu1 %vm1637_vm0, %v3885_v41  ;;  %4819 = vmatmul.msk.bf16.gmra.mxu3 %vm1637_vm0, %v4397_v42  ;;  %v5042_v41 = vld [vmem:[%s5262_s24 + $0x584] sm:$0xf]  ;;  %v4418_v42 = vld [vmem:[%s5262_s24 + $0x588] sm:$0xf0] }
 0x170   : > { %v2419_v45 = vpop.f32.mrf.mxu2 }
 0x171   : > { %v3068_v46 = vpop.f32.mrf.mxu3 }
 0x172   : > { %v3069_v47 = vadd.f32 %v3068_v46, %v2419_v45  ;;  %v2101_v48 = vpop.f32.mrf.mxu0  ;;  %v3905_v45 = vor.u32 %v4915_v36, %v3904_v35  ;;  %v4417_v46 = vor.u32 %v5043_v38, %v4416_v37 }
 0x173   : > { %v2750_v49 = vpop.f32.mrf.mxu1 }
 0x174   : > { %3478 = vst.msk [vmem:[%s5361_s30 + $0x4d0] sm:$0xff] %vm3323_vm1, %v3069_v47  ;;  %v2751_v50 = vadd.f32 %v2750_v49, %v2101_v48  ;;  %v3909_v49 = vor.u32 %v4914_v39, %v3906_v40 }
 0x176   : > { %3351 = vst.msk [vmem:[%s5361_s30 + $0xd8] sm:$0xff] %vm3323_vm1, %v2751_v50  ;;  %v4421_v50 = vor.u32 %v5042_v41, %v4418_v42 }
 0x178   : > { %v2421_v59 = vpop.f32.mrf.mxu2 }
 0x179   : > { %v3070_v60 = vpop.f32.mrf.mxu3 }
 0x17a   : > { %v3071_v63 = vadd.f32 %v3070_v60, %v2421_v59  ;;  %v2104_v0 = vpop.f32.mrf.mxu0  ;;  %v3912_v59 = vld [vmem:[%s5262_s24 + $0x190] sm:$0xf]  ;;  %v4917_v60 = vld [vmem:[%s5262_s24 + $0x194] sm:$0xf0] }
 0x17b   : > { %v2753_v3 = vpop.f32.mrf.mxu1 }
 0x17c   : > { %3479 = vst.msk [vmem:[%s5361_s30 + $0x4d8] sm:$0xff] %vm3323_vm1, %v3071_v63  ;;  %v2754_v4 = vadd.f32 %v2753_v3, %v2104_v0  ;;  %v4916_v63 = vld [vmem:[%s5262_s24 + $0x194] sm:$0xf]  ;;  %v3914_v0 = vld [vmem:[%s5262_s24 + $0x198] sm:$0xf0] }
 0x17d   : > { %2143 = vmatmul.bf16.gmra.mxu0 %v3889_v61  ;;  %2463 = vmatmul.bf16.gmra.mxu2 %v4401_v62  ;;  %v4424_v61 = vld [vmem:[%s5262_s24 + $0x590] sm:$0xf]  ;;  %v5045_v62 = vld [vmem:[%s5262_s24 + $0x594] sm:$0xf0] }
 0x17e   : > { %3352 = vst.msk [vmem:[%s5361_s30 + $0xe0] sm:$0xff] %vm3323_vm1, %v2754_v4  ;;  %4756 = vmatmul.msk.bf16.gmra.mxu1 %vm1637_vm0, %v3893_v1  ;;  %4820 = vmatmul.msk.bf16.gmra.mxu3 %vm1637_vm0, %v4405_v2  ;;  %v5044_v1 = vld [vmem:[%s5262_s24 + $0x594] sm:$0xf]  ;;  %v4426_v2 = vld [vmem:[%s5262_s24 + $0x598] sm:$0xf0] }
 0x180   : > { %v2424_v5 = vpop.f32.mrf.mxu2 }
 0x181   : > { %v3073_v6 = vpop.f32.mrf.mxu3 }
 0x182   : > { %v3074_v7 = vadd.f32 %v3073_v6, %v2424_v5  ;;  %v2106_v8 = vpop.f32.mrf.mxu0  ;;  %v3913_v5 = vor.u32 %v4917_v60, %v3912_v59  ;;  %v4425_v6 = vor.u32 %v5045_v62, %v4424_v61 }
 0x183   : > { %v2755_v9 = vpop.f32.mrf.mxu1 }
 0x184   : > { %3480 = vst.msk [vmem:[%s5361_s30 + $0x4e0] sm:$0xff] %vm3323_vm1, %v3074_v7  ;;  %v2756_v10 = vadd.f32 %v2755_v9, %v2106_v8  ;;  %v3917_v9 = vor.u32 %v4916_v63, %v3914_v0 }
 0x186   : > { %3353 = vst.msk [vmem:[%s5361_s30 + $0xe8] sm:$0xff] %vm3323_vm1, %v2756_v10  ;;  %v4429_v10 = vor.u32 %v5044_v1, %v4426_v2 }
 0x188   : > { %v2426_v19 = vpop.f32.mrf.mxu2 }
 0x189   : > { %v3075_v20 = vpop.f32.mrf.mxu3 }
 0x18a   : > { %v3076_v23 = vadd.f32 %v3075_v20, %v2426_v19  ;;  %v2109_v24 = vpop.f32.mrf.mxu0  ;;  %v3920_v19 = vld [vmem:[%s5262_s24 + $0x1a0] sm:$0xf]  ;;  %v4919_v20 = vld [vmem:[%s5262_s24 + $0x1a4] sm:$0xf0] }
 0x18b   : > { %v2758_v27 = vpop.f32.mrf.mxu1 }
 0x18c   : > { %3481 = vst.msk [vmem:[%s5361_s30 + $0x4e8] sm:$0xff] %vm3323_vm1, %v3076_v23  ;;  %v2759_v28 = vadd.f32 %v2758_v27, %v2109_v24  ;;  %v4918_v23 = vld [vmem:[%s5262_s24 + $0x1a4] sm:$0xf]  ;;  %v3922_v24 = vld [vmem:[%s5262_s24 + $0x1a8] sm:$0xf0] }
 0x18d   : > { %2148 = vmatmul.bf16.gmra.mxu0 %v3897_v21  ;;  %2468 = vmatmul.bf16.gmra.mxu2 %v4409_v22  ;;  %v4432_v21 = vld [vmem:[%s5262_s24 + $0x5a0] sm:$0xf]  ;;  %v5047_v22 = vld [vmem:[%s5262_s24 + $0x5a4] sm:$0xf0] }
 0x18e   : > { %3354 = vst.msk [vmem:[%s5361_s30 + $0xf0] sm:$0xff] %vm3323_vm1, %v2759_v28  ;;  %4757 = vmatmul.msk.bf16.gmra.mxu1 %vm1637_vm0, %v3901_v25  ;;  %4821 = vmatmul.msk.bf16.gmra.mxu3 %vm1637_vm0, %v4413_v26  ;;  %v5046_v25 = vld [vmem:[%s5262_s24 + $0x5a4] sm:$0xf]  ;;  %v4434_v26 = vld [vmem:[%s5262_s24 + $0x5a8] sm:$0xf0] }
 0x190   : > { %v2429_v29 = vpop.f32.mrf.mxu2 }
 0x191   : > { %v3078_v30 = vpop.f32.mrf.mxu3 }
 0x192   : > { %v3079_v31 = vadd.f32 %v3078_v30, %v2429_v29  ;;  %v2111_v32 = vpop.f32.mrf.mxu0  ;;  %v3921_v29 = vor.u32 %v4919_v20, %v3920_v19  ;;  %v4433_v30 = vor.u32 %v5047_v22, %v4432_v21 }
 0x193   : > { %v2760_v33 = vpop.f32.mrf.mxu1 }
 0x194   : > { %3482 = vst.msk [vmem:[%s5361_s30 + $0x4f0] sm:$0xff] %vm3323_vm1, %v3079_v31  ;;  %v2761_v34 = vadd.f32 %v2760_v33, %v2111_v32  ;;  %v3925_v33 = vor.u32 %v4918_v23, %v3922_v24 }
 0x196   : > { %3355 = vst.msk [vmem:[%s5361_s30 + $0xf8] sm:$0xff] %vm3323_vm1, %v2761_v34  ;;  %v4437_v34 = vor.u32 %v5046_v25, %v4434_v26 }
 0x198   : > { %v2431_v43 = vpop.f32.mrf.mxu2 }
 0x199   : > { %v3080_v44 = vpop.f32.mrf.mxu3 }
 0x19a   : > { %v3081_v47 = vadd.f32 %v3080_v44, %v2431_v43  ;;  %v2114_v48 = vpop.f32.mrf.mxu0  ;;  %v3928_v43 = vld [vmem:[%s5262_s24 + $0x1b0] sm:$0xf]  ;;  %v4921_v44 = vld [vmem:[%s5262_s24 + $0x1b4] sm:$0xf0] }
 0x19b   : > { %v2763_v51 = vpop.f32.mrf.mxu1 }
 0x19c   : > { %3483 = vst.msk [vmem:[%s5361_s30 + $0x4f8] sm:$0xff] %vm3323_vm1, %v3081_v47  ;;  %v2764_v52 = vadd.f32 %v2763_v51, %v2114_v48  ;;  %v4920_v47 = vld [vmem:[%s5262_s24 + $0x1b4] sm:$0xf]  ;;  %v3930_v48 = vld [vmem:[%s5262_s24 + $0x1b8] sm:$0xf0] }
 0x19d   : > { %2153 = vmatmul.bf16.gmra.mxu0 %v3905_v45  ;;  %2473 = vmatmul.bf16.gmra.mxu2 %v4417_v46  ;;  %v4440_v45 = vld [vmem:[%s5262_s24 + $0x5b0] sm:$0xf]  ;;  %v5049_v46 = vld [vmem:[%s5262_s24 + $0x5b4] sm:$0xf0] }
 0x19e   : > { %3356 = vst.msk [vmem:[%s5361_s30 + $0x100] sm:$0xff] %vm3323_vm1, %v2764_v52  ;;  %4758 = vmatmul.msk.bf16.gmra.mxu1 %vm1637_vm0, %v3909_v49  ;;  %4822 = vmatmul.msk.bf16.gmra.mxu3 %vm1637_vm0, %v4421_v50  ;;  %v5048_v49 = vld [vmem:[%s5262_s24 + $0x5b4] sm:$0xf]  ;;  %v4442_v50 = vld [vmem:[%s5262_s24 + $0x5b8] sm:$0xf0] }
 0x1a0   : > { %v2434_v53 = vpop.f32.mrf.mxu2 }
 0x1a1   : > { %v3083_v54 = vpop.f32.mrf.mxu3 }
 0x1a2   : > { %v3084_v55 = vadd.f32 %v3083_v54, %v2434_v53  ;;  %v2116_v56 = vpop.f32.mrf.mxu0  ;;  %v3929_v53 = vor.u32 %v4921_v44, %v3928_v43  ;;  %v4441_v54 = vor.u32 %v5049_v46, %v4440_v45 }
 0x1a3   : > { %v2765_v57 = vpop.f32.mrf.mxu1 }
 0x1a4   : > { %3484 = vst.msk [vmem:[%s5361_s30 + $0x500] sm:$0xff] %vm3323_vm1, %v3084_v55  ;;  %v2766_v58 = vadd.f32 %v2765_v57, %v2116_v56  ;;  %v3933_v57 = vor.u32 %v4920_v47, %v3930_v48 }
 0x1a6   : > { %3357 = vst.msk [vmem:[%s5361_s30 + $0x108] sm:$0xff] %vm3323_vm1, %v2766_v58  ;;  %v4445_v58 = vor.u32 %v5048_v49, %v4442_v50 }
 0x1a8   : > { %v2436_v3 = vpop.f32.mrf.mxu2 }
 0x1a9   : > { %v3085_v4 = vpop.f32.mrf.mxu3 }
 0x1aa   : > { %v3086_v7 = vadd.f32 %v3085_v4, %v2436_v3  ;;  %v2119_v8 = vpop.f32.mrf.mxu0  ;;  %v3936_v3 = vld [vmem:[%s5262_s24 + $0x1c0] sm:$0xf]  ;;  %v4923_v4 = vld [vmem:[%s5262_s24 + $0x1c4] sm:$0xf0] }
 0x1ab   : > { %v2768_v11 = vpop.f32.mrf.mxu1 }
 0x1ac   : > { %3485 = vst.msk [vmem:[%s5361_s30 + $0x508] sm:$0xff] %vm3323_vm1, %v3086_v7  ;;  %v2769_v12 = vadd.f32 %v2768_v11, %v2119_v8  ;;  %v4922_v7 = vld [vmem:[%s5262_s24 + $0x1c4] sm:$0xf]  ;;  %v3938_v8 = vld [vmem:[%s5262_s24 + $0x1c8] sm:$0xf0] }
 0x1ad   : > { %2158 = vmatmul.bf16.gmra.mxu0 %v3913_v5  ;;  %2478 = vmatmul.bf16.gmra.mxu2 %v4425_v6  ;;  %v4448_v5 = vld [vmem:[%s5262_s24 + $0x5c0] sm:$0xf]  ;;  %v5051_v6 = vld [vmem:[%s5262_s24 + $0x5c4] sm:$0xf0] }
 0x1ae   : > { %3358 = vst.msk [vmem:[%s5361_s30 + $0x110] sm:$0xff] %vm3323_vm1, %v2769_v12  ;;  %4759 = vmatmul.msk.bf16.gmra.mxu1 %vm1637_vm0, %v3917_v9  ;;  %4823 = vmatmul.msk.bf16.gmra.mxu3 %vm1637_vm0, %v4429_v10  ;;  %v5050_v9 = vld [vmem:[%s5262_s24 + $0x5c4] sm:$0xf]  ;;  %v4450_v10 = vld [vmem:[%s5262_s24 + $0x5c8] sm:$0xf0] }
 0x1b0   : > { %v2439_v13 = vpop.f32.mrf.mxu2 }
 0x1b1   : > { %v3088_v14 = vpop.f32.mrf.mxu3 }
 0x1b2   : > { %v3089_v15 = vadd.f32 %v3088_v14, %v2439_v13  ;;  %v2121_v16 = vpop.f32.mrf.mxu0  ;;  %v3937_v13 = vor.u32 %v4923_v4, %v3936_v3  ;;  %v4449_v14 = vor.u32 %v5051_v6, %v4448_v5 }
 0x1b3   : > { %v2770_v17 = vpop.f32.mrf.mxu1 }
 0x1b4   : > { %3486 = vst.msk [vmem:[%s5361_s30 + $0x510] sm:$0xff] %vm3323_vm1, %v3089_v15  ;;  %v2771_v18 = vadd.f32 %v2770_v17, %v2121_v16  ;;  %v3941_v17 = vor.u32 %v4922_v7, %v3938_v8 }
 0x1b6   : > { %3359 = vst.msk [vmem:[%s5361_s30 + $0x118] sm:$0xff] %vm3323_vm1, %v2771_v18  ;;  %v4453_v18 = vor.u32 %v5050_v9, %v4450_v10 }
 0x1b8   : > { %v2441_v27 = vpop.f32.mrf.mxu2 }
 0x1b9   : > { %v3090_v28 = vpop.f32.mrf.mxu3 }
 0x1ba   : > { %v3091_v31 = vadd.f32 %v3090_v28, %v2441_v27  ;;  %v2124_v32 = vpop.f32.mrf.mxu0  ;;  %v3944_v27 = vld [vmem:[%s5262_s24 + $0x1d0] sm:$0xf]  ;;  %v4925_v28 = vld [vmem:[%s5262_s24 + $0x1d4] sm:$0xf0] }
 0x1bb   : > { %v2773_v35 = vpop.f32.mrf.mxu1 }
 0x1bc   : > { %3487 = vst.msk [vmem:[%s5361_s30 + $0x518] sm:$0xff] %vm3323_vm1, %v3091_v31  ;;  %v2774_v36 = vadd.f32 %v2773_v35, %v2124_v32  ;;  %v4924_v31 = vld [vmem:[%s5262_s24 + $0x1d4] sm:$0xf]  ;;  %v3946_v32 = vld [vmem:[%s5262_s24 + $0x1d8] sm:$0xf0] }
 0x1bd   : > { %2163 = vmatmul.bf16.gmra.mxu0 %v3921_v29  ;;  %2483 = vmatmul.bf16.gmra.mxu2 %v4433_v30  ;;  %v4456_v29 = vld [vmem:[%s5262_s24 + $0x5d0] sm:$0xf]  ;;  %v5053_v30 = vld [vmem:[%s5262_s24 + $0x5d4] sm:$0xf0] }
 0x1be   : > { %3360 = vst.msk [vmem:[%s5361_s30 + $0x120] sm:$0xff] %vm3323_vm1, %v2774_v36  ;;  %4760 = vmatmul.msk.bf16.gmra.mxu1 %vm1637_vm0, %v3925_v33  ;;  %4824 = vmatmul.msk.bf16.gmra.mxu3 %vm1637_vm0, %v4437_v34  ;;  %v5052_v33 = vld [vmem:[%s5262_s24 + $0x5d4] sm:$0xf]  ;;  %v4458_v34 = vld [vmem:[%s5262_s24 + $0x5d8] sm:$0xf0] }
 0x1c0   : > { %v2444_v37 = vpop.f32.mrf.mxu2 }
 0x1c1   : > { %v3093_v38 = vpop.f32.mrf.mxu3 }
 0x1c2   : > { %v3094_v39 = vadd.f32 %v3093_v38, %v2444_v37  ;;  %v2126_v40 = vpop.f32.mrf.mxu0  ;;  %v3945_v37 = vor.u32 %v4925_v28, %v3944_v27  ;;  %v4457_v38 = vor.u32 %v5053_v30, %v4456_v29 }
 0x1c3   : > { %v2775_v41 = vpop.f32.mrf.mxu1 }
 0x1c4   : > { %3488 = vst.msk [vmem:[%s5361_s30 + $0x520] sm:$0xff] %vm3323_vm1, %v3094_v39  ;;  %v2776_v42 = vadd.f32 %v2775_v41, %v2126_v40  ;;  %v3949_v41 = vor.u32 %v4924_v31, %v3946_v32 }
 0x1c6   : > { %3361 = vst.msk [vmem:[%s5361_s30 + $0x128] sm:$0xff] %vm3323_vm1, %v2776_v42  ;;  %v4461_v42 = vor.u32 %v5052_v33, %v4458_v34 }
 0x1c8   : > { %v2446_v51 = vpop.f32.mrf.mxu2 }
 0x1c9   : > { %v3095_v52 = vpop.f32.mrf.mxu3 }
 0x1ca   : > { %v3096_v55 = vadd.f32 %v3095_v52, %v2446_v51  ;;  %v2129_v56 = vpop.f32.mrf.mxu0  ;;  %v3952_v51 = vld [vmem:[%s5262_s24 + $0x1e0] sm:$0xf]  ;;  %v4927_v52 = vld [vmem:[%s5262_s24 + $0x1e4] sm:$0xf0] }
 0x1cb   : > { %v2778_v59 = vpop.f32.mrf.mxu1 }
 0x1cc   : > { %3489 = vst.msk [vmem:[%s5361_s30 + $0x528] sm:$0xff] %vm3323_vm1, %v3096_v55  ;;  %v2779_v60 = vadd.f32 %v2778_v59, %v2129_v56  ;;  %v4926_v55 = vld [vmem:[%s5262_s24 + $0x1e4] sm:$0xf]  ;;  %v3954_v56 = vld [vmem:[%s5262_s24 + $0x1e8] sm:$0xf0] }
 0x1cd   : > { %2168 = vmatmul.bf16.gmra.mxu0 %v3929_v53  ;;  %2488 = vmatmul.bf16.gmra.mxu2 %v4441_v54  ;;  %v4464_v53 = vld [vmem:[%s5262_s24 + $0x5e0] sm:$0xf]  ;;  %v5055_v54 = vld [vmem:[%s5262_s24 + $0x5e4] sm:$0xf0] }
 0x1ce   : > { %3362 = vst.msk [vmem:[%s5361_s30 + $0x130] sm:$0xff] %vm3323_vm1, %v2779_v60  ;;  %4761 = vmatmul.msk.bf16.gmra.mxu1 %vm1637_vm0, %v3933_v57  ;;  %4825 = vmatmul.msk.bf16.gmra.mxu3 %vm1637_vm0, %v4445_v58  ;;  %v5054_v57 = vld [vmem:[%s5262_s24 + $0x5e4] sm:$0xf]  ;;  %v4466_v58 = vld [vmem:[%s5262_s24 + $0x5e8] sm:$0xf0] }
 0x1d0   : > { %v2449_v61 = vpop.f32.mrf.mxu2 }
 0x1d1   : > { %v3098_v62 = vpop.f32.mrf.mxu3 }
 0x1d2   : > { %v3099_v63 = vadd.f32 %v3098_v62, %v2449_v61  ;;  %v2131_v0 = vpop.f32.mrf.mxu0  ;;  %v3953_v61 = vor.u32 %v4927_v52, %v3952_v51  ;;  %v4465_v62 = vor.u32 %v5055_v54, %v4464_v53 }
 0x1d3   : > { %v2780_v1 = vpop.f32.mrf.mxu1 }
 0x1d4   : > { %3490 = vst.msk [vmem:[%s5361_s30 + $0x530] sm:$0xff] %vm3323_vm1, %v3099_v63  ;;  %v2781_v2 = vadd.f32 %v2780_v1, %v2131_v0  ;;  %v3957_v1 = vor.u32 %v4926_v55, %v3954_v56 }
 0x1d6   : > { %3363 = vst.msk [vmem:[%s5361_s30 + $0x138] sm:$0xff] %vm3323_vm1, %v2781_v2  ;;  %v4469_v2 = vor.u32 %v5054_v57, %v4466_v58 }
 0x1d8   : > { %v2451_v11 = vpop.f32.mrf.mxu2 }
 0x1d9   : > { %v3100_v12 = vpop.f32.mrf.mxu3 }
 0x1da   : > { %v3101_v15 = vadd.f32 %v3100_v12, %v2451_v11  ;;  %v2134_v16 = vpop.f32.mrf.mxu0  ;;  %v3960_v11 = vld [vmem:[%s5262_s24 + $0x1f0] sm:$0xf]  ;;  %v4929_v12 = vld [vmem:[%s5262_s24 + $0x1f4] sm:$0xf0] }
 0x1db   : > { %v2783_v19 = vpop.f32.mrf.mxu1 }
 0x1dc   : > { %3491 = vst.msk [vmem:[%s5361_s30 + $0x538] sm:$0xff] %vm3323_vm1, %v3101_v15  ;;  %v2784_v20 = vadd.f32 %v2783_v19, %v2134_v16  ;;  %v4928_v15 = vld [vmem:[%s5262_s24 + $0x1f4] sm:$0xf]  ;;  %v3962_v16 = vld [vmem:[%s5262_s24 + $0x1f8] sm:$0xf0] }
 0x1dd   : > { %2173 = vmatmul.bf16.gmra.mxu0 %v3937_v13  ;;  %2493 = vmatmul.bf16.gmra.mxu2 %v4449_v14  ;;  %v4472_v13 = vld [vmem:[%s5262_s24 + $0x5f0] sm:$0xf]  ;;  %v5057_v14 = vld [vmem:[%s5262_s24 + $0x5f4] sm:$0xf0] }
 0x1de   : > { %3364 = vst.msk [vmem:[%s5361_s30 + $0x140] sm:$0xff] %vm3323_vm1, %v2784_v20  ;;  %4762 = vmatmul.msk.bf16.gmra.mxu1 %vm1637_vm0, %v3941_v17  ;;  %4826 = vmatmul.msk.bf16.gmra.mxu3 %vm1637_vm0, %v4453_v18  ;;  %v5056_v17 = vld [vmem:[%s5262_s24 + $0x5f4] sm:$0xf]  ;;  %v4474_v18 = vld [vmem:[%s5262_s24 + $0x5f8] sm:$0xf0] }
 0x1e0   : > { %v2454_v21 = vpop.f32.mrf.mxu2 }
 0x1e1   : > { %v3103_v22 = vpop.f32.mrf.mxu3 }
 0x1e2   : > { %v3104_v23 = vadd.f32 %v3103_v22, %v2454_v21  ;;  %v2136_v24 = vpop.f32.mrf.mxu0  ;;  %v3961_v21 = vor.u32 %v4929_v12, %v3960_v11  ;;  %v4473_v22 = vor.u32 %v5057_v14, %v4472_v13 }
 0x1e3   : > { %v2785_v25 = vpop.f32.mrf.mxu1 }
 0x1e4   : > { %3492 = vst.msk [vmem:[%s5361_s30 + $0x540] sm:$0xff] %vm3323_vm1, %v3104_v23  ;;  %v2786_v26 = vadd.f32 %v2785_v25, %v2136_v24  ;;  %v3965_v25 = vor.u32 %v4928_v15, %v3962_v16 }
 0x1e6   : > { %3365 = vst.msk [vmem:[%s5361_s30 + $0x148] sm:$0xff] %vm3323_vm1, %v2786_v26  ;;  %v4477_v26 = vor.u32 %v5056_v17, %v4474_v18 }
 0x1e8   : > { %v2456_v35 = vpop.f32.mrf.mxu2 }
 0x1e9   : > { %v3105_v36 = vpop.f32.mrf.mxu3 }
 0x1ea   : > { %v3106_v39 = vadd.f32 %v3105_v36, %v2456_v35  ;;  %v2139_v40 = vpop.f32.mrf.mxu0  ;;  %v3968_v35 = vld [vmem:[%s5262_s24 + $0x200] sm:$0xf]  ;;  %v4931_v36 = vld [vmem:[%s5262_s24 + $0x204] sm:$0xf0] }
 0x1eb   : > { %v2788_v43 = vpop.f32.mrf.mxu1 }
 0x1ec   : > { %3493 = vst.msk [vmem:[%s5361_s30 + $0x548] sm:$0xff] %vm3323_vm1, %v3106_v39  ;;  %v2789_v44 = vadd.f32 %v2788_v43, %v2139_v40  ;;  %v4930_v39 = vld [vmem:[%s5262_s24 + $0x204] sm:$0xf]  ;;  %v3970_v40 = vld [vmem:[%s5262_s24 + $0x208] sm:$0xf0] }
 0x1ed   : > { %2178 = vmatmul.bf16.gmra.mxu0 %v3945_v37  ;;  %2498 = vmatmul.bf16.gmra.mxu2 %v4457_v38  ;;  %v4480_v37 = vld [vmem:[%s5262_s24 + $0x600] sm:$0xf]  ;;  %v5059_v38 = vld [vmem:[%s5262_s24 + $0x604] sm:$0xf0] }
 0x1ee   : > { %3366 = vst.msk [vmem:[%s5361_s30 + $0x150] sm:$0xff] %vm3323_vm1, %v2789_v44  ;;  %4763 = vmatmul.msk.bf16.gmra.mxu1 %vm1637_vm0, %v3949_v41  ;;  %4827 = vmatmul.msk.bf16.gmra.mxu3 %vm1637_vm0, %v4461_v42  ;;  %v5058_v41 = vld [vmem:[%s5262_s24 + $0x604] sm:$0xf]  ;;  %v4482_v42 = vld [vmem:[%s5262_s24 + $0x608] sm:$0xf0] }
 0x1f0   : > { %v2459_v45 = vpop.f32.mrf.mxu2 }
 0x1f1   : > { %v3108_v46 = vpop.f32.mrf.mxu3 }
 0x1f2   : > { %v3109_v47 = vadd.f32 %v3108_v46, %v2459_v45  ;;  %v2141_v48 = vpop.f32.mrf.mxu0  ;;  %v3969_v45 = vor.u32 %v4931_v36, %v3968_v35  ;;  %v4481_v46 = vor.u32 %v5059_v38, %v4480_v37 }
 0x1f3   : > { %v2790_v49 = vpop.f32.mrf.mxu1 }
 0x1f4   : > { %3494 = vst.msk [vmem:[%s5361_s30 + $0x550] sm:$0xff] %vm3323_vm1, %v3109_v47  ;;  %v2791_v50 = vadd.f32 %v2790_v49, %v2141_v48  ;;  %v3973_v49 = vor.u32 %v4930_v39, %v3970_v40 }
 0x1f6   : > { %3367 = vst.msk [vmem:[%s5361_s30 + $0x158] sm:$0xff] %vm3323_vm1, %v2791_v50  ;;  %v4485_v50 = vor.u32 %v5058_v41, %v4482_v42 }
 0x1f8   : > { %v2461_v59 = vpop.f32.mrf.mxu2 }
 0x1f9   : > { %v3110_v60 = vpop.f32.mrf.mxu3 }
 0x1fa   : > { %v3111_v63 = vadd.f32 %v3110_v60, %v2461_v59  ;;  %v2144_v0 = vpop.f32.mrf.mxu0  ;;  %v3976_v59 = vld [vmem:[%s5262_s24 + $0x210] sm:$0xf]  ;;  %v4933_v60 = vld [vmem:[%s5262_s24 + $0x214] sm:$0xf0] }
 0x1fb   : > { %v2793_v3 = vpop.f32.mrf.mxu1 }
 0x1fc   : > { %3495 = vst.msk [vmem:[%s5361_s30 + $0x558] sm:$0xff] %vm3323_vm1, %v3111_v63  ;;  %v2794_v4 = vadd.f32 %v2793_v3, %v2144_v0  ;;  %v4932_v63 = vld [vmem:[%s5262_s24 + $0x214] sm:$0xf]  ;;  %v3978_v0 = vld [vmem:[%s5262_s24 + $0x218] sm:$0xf0] }
 0x1fd   : > { %2183 = vmatmul.bf16.gmra.mxu0 %v3953_v61  ;;  %2503 = vmatmul.bf16.gmra.mxu2 %v4465_v62  ;;  %v4488_v61 = vld [vmem:[%s5262_s24 + $0x610] sm:$0xf]  ;;  %v5061_v62 = vld [vmem:[%s5262_s24 + $0x614] sm:$0xf0] }
 0x1fe   : > { %3368 = vst.msk [vmem:[%s5361_s30 + $0x160] sm:$0xff] %vm3323_vm1, %v2794_v4  ;;  %4764 = vmatmul.msk.bf16.gmra.mxu1 %vm1637_vm0, %v3957_v1  ;;  %4828 = vmatmul.msk.bf16.gmra.mxu3 %vm1637_vm0, %v4469_v2  ;;  %v5060_v1 = vld [vmem:[%s5262_s24 + $0x614] sm:$0xf]  ;;  %v4490_v2 = vld [vmem:[%s5262_s24 + $0x618] sm:$0xf0] }
 0x200   : > { %v2464_v5 = vpop.f32.mrf.mxu2 }
 0x201   : > { %v3113_v6 = vpop.f32.mrf.mxu3 }
 0x202   : > { %v3114_v7 = vadd.f32 %v3113_v6, %v2464_v5  ;;  %v2146_v8 = vpop.f32.mrf.mxu0  ;;  %v3977_v5 = vor.u32 %v4933_v60, %v3976_v59  ;;  %v4489_v6 = vor.u32 %v5061_v62, %v4488_v61 }
 0x203   : > { %v2795_v9 = vpop.f32.mrf.mxu1 }
 0x204   : > { %3496 = vst.msk [vmem:[%s5361_s30 + $0x560] sm:$0xff] %vm3323_vm1, %v3114_v7  ;;  %v2796_v10 = vadd.f32 %v2795_v9, %v2146_v8  ;;  %v3981_v9 = vor.u32 %v4932_v63, %v3978_v0 }
 0x206   : > { %3369 = vst.msk [vmem:[%s5361_s30 + $0x168] sm:$0xff] %vm3323_vm1, %v2796_v10  ;;  %v4493_v10 = vor.u32 %v5060_v1, %v4490_v2 }
 0x208   : > { %v2466_v19 = vpop.f32.mrf.mxu2 }
 0x209   : > { %v3115_v20 = vpop.f32.mrf.mxu3 }
 0x20a   : > { %v3116_v23 = vadd.f32 %v3115_v20, %v2466_v19  ;;  %v2149_v24 = vpop.f32.mrf.mxu0  ;;  %v3984_v19 = vld [vmem:[%s5262_s24 + $0x220] sm:$0xf]  ;;  %v4935_v20 = vld [vmem:[%s5262_s24 + $0x224] sm:$0xf0] }
 0x20b   : > { %v2798_v27 = vpop.f32.mrf.mxu1 }
 0x20c   : > { %3497 = vst.msk [vmem:[%s5361_s30 + $0x568] sm:$0xff] %vm3323_vm1, %v3116_v23  ;;  %v2799_v28 = vadd.f32 %v2798_v27, %v2149_v24  ;;  %v4934_v23 = vld [vmem:[%s5262_s24 + $0x224] sm:$0xf]  ;;  %v3986_v24 = vld [vmem:[%s5262_s24 + $0x228] sm:$0xf0] }
 0x20d   : > { %2188 = vmatmul.bf16.gmra.mxu0 %v3961_v21  ;;  %2508 = vmatmul.bf16.gmra.mxu2 %v4473_v22  ;;  %v4496_v21 = vld [vmem:[%s5262_s24 + $0x620] sm:$0xf]  ;;  %v5063_v22 = vld [vmem:[%s5262_s24 + $0x624] sm:$0xf0] }
 0x20e   : > { %3370 = vst.msk [vmem:[%s5361_s30 + $0x170] sm:$0xff] %vm3323_vm1, %v2799_v28  ;;  %4765 = vmatmul.msk.bf16.gmra.mxu1 %vm1637_vm0, %v3965_v25  ;;  %4829 = vmatmul.msk.bf16.gmra.mxu3 %vm1637_vm0, %v4477_v26  ;;  %v5062_v25 = vld [vmem:[%s5262_s24 + $0x624] sm:$0xf]  ;;  %v4498_v26 = vld [vmem:[%s5262_s24 + $0x628] sm:$0xf0] }
 0x210   : > { %v2469_v29 = vpop.f32.mrf.mxu2 }
 0x211   : > { %v3118_v30 = vpop.f32.mrf.mxu3 }
 0x212   : > { %v3119_v31 = vadd.f32 %v3118_v30, %v2469_v29  ;;  %v2151_v32 = vpop.f32.mrf.mxu0  ;;  %v3985_v29 = vor.u32 %v4935_v20, %v3984_v19  ;;  %v4497_v30 = vor.u32 %v5063_v22, %v4496_v21 }
 0x213   : > { %v2800_v33 = vpop.f32.mrf.mxu1 }
 0x214   : > { %3498 = vst.msk [vmem:[%s5361_s30 + $0x570] sm:$0xff] %vm3323_vm1, %v3119_v31  ;;  %v2801_v34 = vadd.f32 %v2800_v33, %v2151_v32  ;;  %v3989_v33 = vor.u32 %v4934_v23, %v3986_v24 }
 0x216   : > { %3371 = vst.msk [vmem:[%s5361_s30 + $0x178] sm:$0xff] %vm3323_vm1, %v2801_v34  ;;  %v4501_v34 = vor.u32 %v5062_v25, %v4498_v26 }
 0x218   : > { %v2471_v43 = vpop.f32.mrf.mxu2 }
 0x219   : > { %v3120_v44 = vpop.f32.mrf.mxu3 }
 0x21a   : > { %v3121_v47 = vadd.f32 %v3120_v44, %v2471_v43  ;;  %v2154_v48 = vpop.f32.mrf.mxu0  ;;  %v3992_v43 = vld [vmem:[%s5262_s24 + $0x230] sm:$0xf]  ;;  %v4937_v44 = vld [vmem:[%s5262_s24 + $0x234] sm:$0xf0] }
 0x21b   : > { %v2803_v51 = vpop.f32.mrf.mxu1 }
 0x21c   : > { %3499 = vst.msk [vmem:[%s5361_s30 + $0x578] sm:$0xff] %vm3323_vm1, %v3121_v47  ;;  %v2804_v52 = vadd.f32 %v2803_v51, %v2154_v48  ;;  %v4936_v47 = vld [vmem:[%s5262_s24 + $0x234] sm:$0xf]  ;;  %v3994_v48 = vld [vmem:[%s5262_s24 + $0x238] sm:$0xf0] }
 0x21d   : > { %2193 = vmatmul.bf16.gmra.mxu0 %v3969_v45  ;;  %2513 = vmatmul.bf16.gmra.mxu2 %v4481_v46  ;;  %v4504_v45 = vld [vmem:[%s5262_s24 + $0x630] sm:$0xf]  ;;  %v5065_v46 = vld [vmem:[%s5262_s24 + $0x634] sm:$0xf0] }
 0x21e   : > { %3372 = vst.msk [vmem:[%s5361_s30 + $0x180] sm:$0xff] %vm3323_vm1, %v2804_v52  ;;  %4766 = vmatmul.msk.bf16.gmra.mxu1 %vm1637_vm0, %v3973_v49  ;;  %4830 = vmatmul.msk.bf16.gmra.mxu3 %vm1637_vm0, %v4485_v50  ;;  %v5064_v49 = vld [vmem:[%s5262_s24 + $0x634] sm:$0xf]  ;;  %v4506_v50 = vld [vmem:[%s5262_s24 + $0x638] sm:$0xf0] }
 0x220   : > { %v2474_v53 = vpop.f32.mrf.mxu2 }
 0x221   : > { %v3123_v54 = vpop.f32.mrf.mxu3 }
 0x222   : > { %v3124_v55 = vadd.f32 %v3123_v54, %v2474_v53  ;;  %v2156_v56 = vpop.f32.mrf.mxu0  ;;  %v3993_v53 = vor.u32 %v4937_v44, %v3992_v43  ;;  %v4505_v54 = vor.u32 %v5065_v46, %v4504_v45 }
 0x223   : > { %v2805_v57 = vpop.f32.mrf.mxu1 }
 0x224   : > { %3500 = vst.msk [vmem:[%s5361_s30 + $0x580] sm:$0xff] %vm3323_vm1, %v3124_v55  ;;  %v2806_v58 = vadd.f32 %v2805_v57, %v2156_v56  ;;  %v3997_v57 = vor.u32 %v4936_v47, %v3994_v48 }
 0x226   : > { %3373 = vst.msk [vmem:[%s5361_s30 + $0x188] sm:$0xff] %vm3323_vm1, %v2806_v58  ;;  %v4509_v58 = vor.u32 %v5064_v49, %v4506_v50 }
 0x228   : > { %v2476_v3 = vpop.f32.mrf.mxu2 }
 0x229   : > { %v3125_v4 = vpop.f32.mrf.mxu3 }
 0x22a   : > { %v3126_v7 = vadd.f32 %v3125_v4, %v2476_v3  ;;  %v2159_v8 = vpop.f32.mrf.mxu0  ;;  %v4000_v3 = vld [vmem:[%s5262_s24 + $0x240] sm:$0xf]  ;;  %v4939_v4 = vld [vmem:[%s5262_s24 + $0x244] sm:$0xf0] }
 0x22b   : > { %v2808_v11 = vpop.f32.mrf.mxu1 }
 0x22c   : > { %3501 = vst.msk [vmem:[%s5361_s30 + $0x588] sm:$0xff] %vm3323_vm1, %v3126_v7  ;;  %v2809_v12 = vadd.f32 %v2808_v11, %v2159_v8  ;;  %v4938_v7 = vld [vmem:[%s5262_s24 + $0x244] sm:$0xf]  ;;  %v4002_v8 = vld [vmem:[%s5262_s24 + $0x248] sm:$0xf0] }
 0x22d   : > { %2198 = vmatmul.bf16.gmra.mxu0 %v3977_v5  ;;  %2518 = vmatmul.bf16.gmra.mxu2 %v4489_v6  ;;  %v4512_v5 = vld [vmem:[%s5262_s24 + $0x640] sm:$0xf]  ;;  %v5067_v6 = vld [vmem:[%s5262_s24 + $0x644] sm:$0xf0] }
 0x22e   : > { %3374 = vst.msk [vmem:[%s5361_s30 + $0x190] sm:$0xff] %vm3323_vm1, %v2809_v12  ;;  %4767 = vmatmul.msk.bf16.gmra.mxu1 %vm1637_vm0, %v3981_v9  ;;  %4831 = vmatmul.msk.bf16.gmra.mxu3 %vm1637_vm0, %v4493_v10  ;;  %v5066_v9 = vld [vmem:[%s5262_s24 + $0x644] sm:$0xf]  ;;  %v4514_v10 = vld [vmem:[%s5262_s24 + $0x648] sm:$0xf0] }
 0x230   : > { %v2479_v13 = vpop.f32.mrf.mxu2 }
 0x231   : > { %v3128_v14 = vpop.f32.mrf.mxu3 }
 0x232   : > { %v3129_v15 = vadd.f32 %v3128_v14, %v2479_v13  ;;  %v2161_v16 = vpop.f32.mrf.mxu0  ;;  %v4001_v13 = vor.u32 %v4939_v4, %v4000_v3  ;;  %v4513_v14 = vor.u32 %v5067_v6, %v4512_v5 }
 0x233   : > { %v2810_v17 = vpop.f32.mrf.mxu1 }
 0x234   : > { %3502 = vst.msk [vmem:[%s5361_s30 + $0x590] sm:$0xff] %vm3323_vm1, %v3129_v15  ;;  %v2811_v18 = vadd.f32 %v2810_v17, %v2161_v16  ;;  %v4005_v17 = vor.u32 %v4938_v7, %v4002_v8 }
 0x236   : > { %3375 = vst.msk [vmem:[%s5361_s30 + $0x198] sm:$0xff] %vm3323_vm1, %v2811_v18  ;;  %v4517_v18 = vor.u32 %v5066_v9, %v4514_v10 }
 0x238   : > { %v2481_v27 = vpop.f32.mrf.mxu2 }
 0x239   : > { %v3130_v28 = vpop.f32.mrf.mxu3 }
 0x23a   : > { %v3131_v31 = vadd.f32 %v3130_v28, %v2481_v27  ;;  %v2164_v32 = vpop.f32.mrf.mxu0  ;;  %v4008_v27 = vld [vmem:[%s5262_s24 + $0x250] sm:$0xf]  ;;  %v4941_v28 = vld [vmem:[%s5262_s24 + $0x254] sm:$0xf0] }
 0x23b   : > { %v2813_v35 = vpop.f32.mrf.mxu1 }
 0x23c   : > { %3503 = vst.msk [vmem:[%s5361_s30 + $0x598] sm:$0xff] %vm3323_vm1, %v3131_v31  ;;  %v2814_v36 = vadd.f32 %v2813_v35, %v2164_v32  ;;  %v4940_v31 = vld [vmem:[%s5262_s24 + $0x254] sm:$0xf]  ;;  %v4010_v32 = vld [vmem:[%s5262_s24 + $0x258] sm:$0xf0] }
 0x23d   : > { %2203 = vmatmul.bf16.gmra.mxu0 %v3985_v29  ;;  %2523 = vmatmul.bf16.gmra.mxu2 %v4497_v30  ;;  %v4520_v29 = vld [vmem:[%s5262_s24 + $0x650] sm:$0xf]  ;;  %v5069_v30 = vld [vmem:[%s5262_s24 + $0x654] sm:$0xf0] }
 0x23e   : > { %3376 = vst.msk [vmem:[%s5361_s30 + $0x1a0] sm:$0xff] %vm3323_vm1, %v2814_v36  ;;  %4768 = vmatmul.msk.bf16.gmra.mxu1 %vm1637_vm0, %v3989_v33  ;;  %4832 = vmatmul.msk.bf16.gmra.mxu3 %vm1637_vm0, %v4501_v34  ;;  %v5068_v33 = vld [vmem:[%s5262_s24 + $0x654] sm:$0xf]  ;;  %v4522_v34 = vld [vmem:[%s5262_s24 + $0x658] sm:$0xf0] }
 0x240   : > { %v2484_v37 = vpop.f32.mrf.mxu2 }
 0x241   : > { %v3133_v38 = vpop.f32.mrf.mxu3 }
 0x242   : > { %v3134_v39 = vadd.f32 %v3133_v38, %v2484_v37  ;;  %v2166_v40 = vpop.f32.mrf.mxu0  ;;  %v4009_v37 = vor.u32 %v4941_v28, %v4008_v27  ;;  %v4521_v38 = vor.u32 %v5069_v30, %v4520_v29 }
 0x243   : > { %v2815_v41 = vpop.f32.mrf.mxu1 }
 0x244   : > { %3504 = vst.msk [vmem:[%s5361_s30 + $0x5a0] sm:$0xff] %vm3323_vm1, %v3134_v39  ;;  %v2816_v42 = vadd.f32 %v2815_v41, %v2166_v40  ;;  %v4013_v41 = vor.u32 %v4940_v31, %v4010_v32 }
 0x246   : > { %3377 = vst.msk [vmem:[%s5361_s30 + $0x1a8] sm:$0xff] %vm3323_vm1, %v2816_v42  ;;  %v4525_v42 = vor.u32 %v5068_v33, %v4522_v34 }
 0x248   : > { %v2486_v51 = vpop.f32.mrf.mxu2 }
 0x249   : > { %v3135_v52 = vpop.f32.mrf.mxu3 }
 0x24a   : > { %v3136_v55 = vadd.f32 %v3135_v52, %v2486_v51  ;;  %v2169_v56 = vpop.f32.mrf.mxu0  ;;  %v4016_v51 = vld [vmem:[%s5262_s24 + $0x260] sm:$0xf]  ;;  %v4943_v52 = vld [vmem:[%s5262_s24 + $0x264] sm:$0xf0] }
 0x24b   : > { %v2818_v59 = vpop.f32.mrf.mxu1 }
 0x24c   : > { %3505 = vst.msk [vmem:[%s5361_s30 + $0x5a8] sm:$0xff] %vm3323_vm1, %v3136_v55  ;;  %v2819_v60 = vadd.f32 %v2818_v59, %v2169_v56  ;;  %v4942_v55 = vld [vmem:[%s5262_s24 + $0x264] sm:$0xf]  ;;  %v4018_v56 = vld [vmem:[%s5262_s24 + $0x268] sm:$0xf0] }
 0x24d   : > { %2208 = vmatmul.bf16.gmra.mxu0 %v3993_v53  ;;  %2528 = vmatmul.bf16.gmra.mxu2 %v4505_v54  ;;  %v4528_v53 = vld [vmem:[%s5262_s24 + $0x660] sm:$0xf]  ;;  %v5071_v54 = vld [vmem:[%s5262_s24 + $0x664] sm:$0xf0] }
 0x24e   : > { %3378 = vst.msk [vmem:[%s5361_s30 + $0x1b0] sm:$0xff] %vm3323_vm1, %v2819_v60  ;;  %4769 = vmatmul.msk.bf16.gmra.mxu1 %vm1637_vm0, %v3997_v57  ;;  %4833 = vmatmul.msk.bf16.gmra.mxu3 %vm1637_vm0, %v4509_v58  ;;  %v5070_v57 = vld [vmem:[%s5262_s24 + $0x664] sm:$0xf]  ;;  %v4530_v58 = vld [vmem:[%s5262_s24 + $0x668] sm:$0xf0] }
 0x250   : > { %v2489_v61 = vpop.f32.mrf.mxu2 }
 0x251   : > { %v3138_v62 = vpop.f32.mrf.mxu3 }
 0x252   : > { %v3139_v63 = vadd.f32 %v3138_v62, %v2489_v61  ;;  %v2171_v0 = vpop.f32.mrf.mxu0  ;;  %v4017_v61 = vor.u32 %v4943_v52, %v4016_v51  ;;  %v4529_v62 = vor.u32 %v5071_v54, %v4528_v53 }
 0x253   : > { %v2820_v1 = vpop.f32.mrf.mxu1 }
 0x254   : > { %3506 = vst.msk [vmem:[%s5361_s30 + $0x5b0] sm:$0xff] %vm3323_vm1, %v3139_v63  ;;  %v2821_v2 = vadd.f32 %v2820_v1, %v2171_v0  ;;  %v4021_v1 = vor.u32 %v4942_v55, %v4018_v56 }
 0x256   : > { %3379 = vst.msk [vmem:[%s5361_s30 + $0x1b8] sm:$0xff] %vm3323_vm1, %v2821_v2  ;;  %v4533_v2 = vor.u32 %v5070_v57, %v4530_v58 }
 0x258   : > { %v2491_v11 = vpop.f32.mrf.mxu2 }
 0x259   : > { %v3140_v12 = vpop.f32.mrf.mxu3 }
 0x25a   : > { %v3141_v15 = vadd.f32 %v3140_v12, %v2491_v11  ;;  %v2174_v16 = vpop.f32.mrf.mxu0  ;;  %v4024_v11 = vld [vmem:[%s5262_s24 + $0x270] sm:$0xf]  ;;  %v4945_v12 = vld [vmem:[%s5262_s24 + $0x274] sm:$0xf0] }
 0x25b   : > { %v2823_v19 = vpop.f32.mrf.mxu1 }
 0x25c   : > { %3507 = vst.msk [vmem:[%s5361_s30 + $0x5b8] sm:$0xff] %vm3323_vm1, %v3141_v15  ;;  %v2824_v20 = vadd.f32 %v2823_v19, %v2174_v16  ;;  %v4944_v15 = vld [vmem:[%s5262_s24 + $0x274] sm:$0xf]  ;;  %v4026_v16 = vld [vmem:[%s5262_s24 + $0x278] sm:$0xf0] }
 0x25d   : > { %2213 = vmatmul.bf16.gmra.mxu0 %v4001_v13  ;;  %2533 = vmatmul.bf16.gmra.mxu2 %v4513_v14  ;;  %v4536_v13 = vld [vmem:[%s5262_s24 + $0x670] sm:$0xf]  ;;  %v5073_v14 = vld [vmem:[%s5262_s24 + $0x674] sm:$0xf0] }
 0x25e   : > { %3380 = vst.msk [vmem:[%s5361_s30 + $0x1c0] sm:$0xff] %vm3323_vm1, %v2824_v20  ;;  %4770 = vmatmul.msk.bf16.gmra.mxu1 %vm1637_vm0, %v4005_v17  ;;  %4834 = vmatmul.msk.bf16.gmra.mxu3 %vm1637_vm0, %v4517_v18  ;;  %v5072_v17 = vld [vmem:[%s5262_s24 + $0x674] sm:$0xf]  ;;  %v4538_v18 = vld [vmem:[%s5262_s24 + $0x678] sm:$0xf0] }
 0x260   : > { %v2494_v21 = vpop.f32.mrf.mxu2 }
 0x261   : > { %v3143_v22 = vpop.f32.mrf.mxu3 }
 0x262   : > { %v3144_v23 = vadd.f32 %v3143_v22, %v2494_v21  ;;  %v2176_v24 = vpop.f32.mrf.mxu0  ;;  %v4025_v21 = vor.u32 %v4945_v12, %v4024_v11  ;;  %v4537_v22 = vor.u32 %v5073_v14, %v4536_v13 }
 0x263   : > { %v2825_v25 = vpop.f32.mrf.mxu1 }
 0x264   : > { %3508 = vst.msk [vmem:[%s5361_s30 + $0x5c0] sm:$0xff] %vm3323_vm1, %v3144_v23  ;;  %v2826_v26 = vadd.f32 %v2825_v25, %v2176_v24  ;;  %v4029_v25 = vor.u32 %v4944_v15, %v4026_v16 }
 0x266   : > { %3381 = vst.msk [vmem:[%s5361_s30 + $0x1c8] sm:$0xff] %vm3323_vm1, %v2826_v26  ;;  %v4541_v26 = vor.u32 %v5072_v17, %v4538_v18 }
 0x268   : > { %v2496_v35 = vpop.f32.mrf.mxu2 }
 0x269   : > { %v3145_v36 = vpop.f32.mrf.mxu3 }
 0x26a   : > { %v3146_v39 = vadd.f32 %v3145_v36, %v2496_v35  ;;  %v2179_v40 = vpop.f32.mrf.mxu0  ;;  %v4032_v35 = vld [vmem:[%s5262_s24 + $0x280] sm:$0xf]  ;;  %v4947_v36 = vld [vmem:[%s5262_s24 + $0x284] sm:$0xf0] }
 0x26b   : > { %v2828_v43 = vpop.f32.mrf.mxu1 }
 0x26c   : > { %3509 = vst.msk [vmem:[%s5361_s30 + $0x5c8] sm:$0xff] %vm3323_vm1, %v3146_v39  ;;  %v2829_v44 = vadd.f32 %v2828_v43, %v2179_v40  ;;  %v4946_v39 = vld [vmem:[%s5262_s24 + $0x284] sm:$0xf]  ;;  %v4034_v40 = vld [vmem:[%s5262_s24 + $0x288] sm:$0xf0] }
 0x26d   : > { %2218 = vmatmul.bf16.gmra.mxu0 %v4009_v37  ;;  %2538 = vmatmul.bf16.gmra.mxu2 %v4521_v38  ;;  %v4544_v37 = vld [vmem:[%s5262_s24 + $0x680] sm:$0xf]  ;;  %v5075_v38 = vld [vmem:[%s5262_s24 + $0x684] sm:$0xf0] }
 0x26e   : > { %3382 = vst.msk [vmem:[%s5361_s30 + $0x1d0] sm:$0xff] %vm3323_vm1, %v2829_v44  ;;  %4771 = vmatmul.msk.bf16.gmra.mxu1 %vm1637_vm0, %v4013_v41  ;;  %4835 = vmatmul.msk.bf16.gmra.mxu3 %vm1637_vm0, %v4525_v42  ;;  %v5074_v41 = vld [vmem:[%s5262_s24 + $0x684] sm:$0xf]  ;;  %v4546_v42 = vld [vmem:[%s5262_s24 + $0x688] sm:$0xf0] }
 0x270   : > { %v2499_v45 = vpop.f32.mrf.mxu2 }
 0x271   : > { %v3148_v46 = vpop.f32.mrf.mxu3 }
 0x272   : > { %v3149_v47 = vadd.f32 %v3148_v46, %v2499_v45  ;;  %v2181_v48 = vpop.f32.mrf.mxu0  ;;  %v4033_v45 = vor.u32 %v4947_v36, %v4032_v35  ;;  %v4545_v46 = vor.u32 %v5075_v38, %v4544_v37 }
 0x273   : > { %v2830_v49 = vpop.f32.mrf.mxu1 }
 0x274   : > { %3510 = vst.msk [vmem:[%s5361_s30 + $0x5d0] sm:$0xff] %vm3323_vm1, %v3149_v47  ;;  %v2831_v50 = vadd.f32 %v2830_v49, %v2181_v48  ;;  %v4037_v49 = vor.u32 %v4946_v39, %v4034_v40 }
 0x276   : > { %3383 = vst.msk [vmem:[%s5361_s30 + $0x1d8] sm:$0xff] %vm3323_vm1, %v2831_v50  ;;  %v4549_v50 = vor.u32 %v5074_v41, %v4546_v42 }
 0x278   : > { %v2501_v59 = vpop.f32.mrf.mxu2 }
 0x279   : > { %v3150_v60 = vpop.f32.mrf.mxu3 }
 0x27a   : > { %v3151_v63 = vadd.f32 %v3150_v60, %v2501_v59  ;;  %v2184_v0 = vpop.f32.mrf.mxu0  ;;  %v4040_v59 = vld [vmem:[%s5262_s24 + $0x290] sm:$0xf]  ;;  %v4949_v60 = vld [vmem:[%s5262_s24 + $0x294] sm:$0xf0] }
 0x27b   : > { %v2833_v3 = vpop.f32.mrf.mxu1 }
 0x27c   : > { %3511 = vst.msk [vmem:[%s5361_s30 + $0x5d8] sm:$0xff] %vm3323_vm1, %v3151_v63  ;;  %v2834_v4 = vadd.f32 %v2833_v3, %v2184_v0  ;;  %v4948_v63 = vld [vmem:[%s5262_s24 + $0x294] sm:$0xf]  ;;  %v4042_v0 = vld [vmem:[%s5262_s24 + $0x298] sm:$0xf0] }
 0x27d   : > { %2223 = vmatmul.bf16.gmra.mxu0 %v4017_v61  ;;  %2543 = vmatmul.bf16.gmra.mxu2 %v4529_v62  ;;  %v4552_v61 = vld [vmem:[%s5262_s24 + $0x690] sm:$0xf]  ;;  %v5077_v62 = vld [vmem:[%s5262_s24 + $0x694] sm:$0xf0] }
 0x27e   : > { %3384 = vst.msk [vmem:[%s5361_s30 + $0x1e0] sm:$0xff] %vm3323_vm1, %v2834_v4  ;;  %4772 = vmatmul.msk.bf16.gmra.mxu1 %vm1637_vm0, %v4021_v1  ;;  %4836 = vmatmul.msk.bf16.gmra.mxu3 %vm1637_vm0, %v4533_v2  ;;  %v5076_v1 = vld [vmem:[%s5262_s24 + $0x694] sm:$0xf]  ;;  %v4554_v2 = vld [vmem:[%s5262_s24 + $0x698] sm:$0xf0] }
 0x280   : > { %v2504_v5 = vpop.f32.mrf.mxu2 }
 0x281   : > { %v3153_v6 = vpop.f32.mrf.mxu3 }
 0x282   : > { %v3154_v7 = vadd.f32 %v3153_v6, %v2504_v5  ;;  %v2186_v8 = vpop.f32.mrf.mxu0  ;;  %v4041_v5 = vor.u32 %v4949_v60, %v4040_v59  ;;  %v4553_v6 = vor.u32 %v5077_v62, %v4552_v61 }
 0x283   : > { %v2835_v9 = vpop.f32.mrf.mxu1 }
 0x284   : > { %3512 = vst.msk [vmem:[%s5361_s30 + $0x5e0] sm:$0xff] %vm3323_vm1, %v3154_v7  ;;  %v2836_v10 = vadd.f32 %v2835_v9, %v2186_v8  ;;  %v4045_v9 = vor.u32 %v4948_v63, %v4042_v0 }
 0x286   : > { %3385 = vst.msk [vmem:[%s5361_s30 + $0x1e8] sm:$0xff] %vm3323_vm1, %v2836_v10  ;;  %v4557_v10 = vor.u32 %v5076_v1, %v4554_v2 }
 0x288   : > { %v2506_v19 = vpop.f32.mrf.mxu2 }
 0x289   : > { %v3155_v20 = vpop.f32.mrf.mxu3 }
 0x28a   : > { %v3156_v23 = vadd.f32 %v3155_v20, %v2506_v19  ;;  %v2189_v24 = vpop.f32.mrf.mxu0  ;;  %v4048_v19 = vld [vmem:[%s5262_s24 + $0x2a0] sm:$0xf]  ;;  %v4951_v20 = vld [vmem:[%s5262_s24 + $0x2a4] sm:$0xf0] }
 0x28b   : > { %v2838_v27 = vpop.f32.mrf.mxu1 }
 0x28c   : > { %3513 = vst.msk [vmem:[%s5361_s30 + $0x5e8] sm:$0xff] %vm3323_vm1, %v3156_v23  ;;  %v2839_v28 = vadd.f32 %v2838_v27, %v2189_v24  ;;  %v4950_v23 = vld [vmem:[%s5262_s24 + $0x2a4] sm:$0xf]  ;;  %v4050_v24 = vld [vmem:[%s5262_s24 + $0x2a8] sm:$0xf0] }
 0x28d   : > { %2228 = vmatmul.bf16.gmra.mxu0 %v4025_v21  ;;  %2548 = vmatmul.bf16.gmra.mxu2 %v4537_v22  ;;  %v4560_v21 = vld [vmem:[%s5262_s24 + $0x6a0] sm:$0xf]  ;;  %v5079_v22 = vld [vmem:[%s5262_s24 + $0x6a4] sm:$0xf0] }
 0x28e   : > { %3386 = vst.msk [vmem:[%s5361_s30 + $0x1f0] sm:$0xff] %vm3323_vm1, %v2839_v28  ;;  %4773 = vmatmul.msk.bf16.gmra.mxu1 %vm1637_vm0, %v4029_v25  ;;  %4837 = vmatmul.msk.bf16.gmra.mxu3 %vm1637_vm0, %v4541_v26  ;;  %v5078_v25 = vld [vmem:[%s5262_s24 + $0x6a4] sm:$0xf]  ;;  %v4562_v26 = vld [vmem:[%s5262_s24 + $0x6a8] sm:$0xf0] }
 0x290   : > { %v2509_v29 = vpop.f32.mrf.mxu2 }
 0x291   : > { %v3158_v30 = vpop.f32.mrf.mxu3 }
 0x292   : > { %v3159_v31 = vadd.f32 %v3158_v30, %v2509_v29  ;;  %v2191_v32 = vpop.f32.mrf.mxu0  ;;  %v4049_v29 = vor.u32 %v4951_v20, %v4048_v19  ;;  %v4561_v30 = vor.u32 %v5079_v22, %v4560_v21 }
 0x293   : > { %v2840_v33 = vpop.f32.mrf.mxu1 }
 0x294   : > { %3514 = vst.msk [vmem:[%s5361_s30 + $0x5f0] sm:$0xff] %vm3323_vm1, %v3159_v31  ;;  %v2841_v34 = vadd.f32 %v2840_v33, %v2191_v32  ;;  %v4053_v33 = vor.u32 %v4950_v23, %v4050_v24 }
 0x296   : > { %3387 = vst.msk [vmem:[%s5361_s30 + $0x1f8] sm:$0xff] %vm3323_vm1, %v2841_v34  ;;  %v4565_v34 = vor.u32 %v5078_v25, %v4562_v26 }
 0x298   : > { %v2511_v43 = vpop.f32.mrf.mxu2 }
 0x299   : > { %v3160_v44 = vpop.f32.mrf.mxu3 }
 0x29a   : > { %v3161_v47 = vadd.f32 %v3160_v44, %v2511_v43  ;;  %v2194_v48 = vpop.f32.mrf.mxu0  ;;  %v4056_v43 = vld [vmem:[%s5262_s24 + $0x2b0] sm:$0xf]  ;;  %v4953_v44 = vld [vmem:[%s5262_s24 + $0x2b4] sm:$0xf0] }
 0x29b   : > { %v2843_v51 = vpop.f32.mrf.mxu1 }
 0x29c   : > { %3515 = vst.msk [vmem:[%s5361_s30 + $0x5f8] sm:$0xff] %vm3323_vm1, %v3161_v47  ;;  %v2844_v52 = vadd.f32 %v2843_v51, %v2194_v48  ;;  %v4952_v47 = vld [vmem:[%s5262_s24 + $0x2b4] sm:$0xf]  ;;  %v4058_v48 = vld [vmem:[%s5262_s24 + $0x2b8] sm:$0xf0] }
 0x29d   : > { %2233 = vmatmul.bf16.gmra.mxu0 %v4033_v45  ;;  %2553 = vmatmul.bf16.gmra.mxu2 %v4545_v46  ;;  %v4568_v45 = vld [vmem:[%s5262_s24 + $0x6b0] sm:$0xf]  ;;  %v5081_v46 = vld [vmem:[%s5262_s24 + $0x6b4] sm:$0xf0] }
 0x29e   : > { %3388 = vst.msk [vmem:[%s5361_s30 + $0x200] sm:$0xff] %vm3323_vm1, %v2844_v52  ;;  %4774 = vmatmul.msk.bf16.gmra.mxu1 %vm1637_vm0, %v4037_v49  ;;  %4838 = vmatmul.msk.bf16.gmra.mxu3 %vm1637_vm0, %v4549_v50  ;;  %v5080_v49 = vld [vmem:[%s5262_s24 + $0x6b4] sm:$0xf]  ;;  %v4570_v50 = vld [vmem:[%s5262_s24 + $0x6b8] sm:$0xf0] }
 0x2a0   : > { %v2514_v53 = vpop.f32.mrf.mxu2 }
 0x2a1   : > { %v3163_v54 = vpop.f32.mrf.mxu3 }
 0x2a2   : > { %v3164_v55 = vadd.f32 %v3163_v54, %v2514_v53  ;;  %v2196_v56 = vpop.f32.mrf.mxu0  ;;  %v4057_v53 = vor.u32 %v4953_v44, %v4056_v43  ;;  %v4569_v54 = vor.u32 %v5081_v46, %v4568_v45 }
 0x2a3   : > { %v2845_v57 = vpop.f32.mrf.mxu1 }
 0x2a4   : > { %3516 = vst.msk [vmem:[%s5361_s30 + $0x600] sm:$0xff] %vm3323_vm1, %v3164_v55  ;;  %v2846_v58 = vadd.f32 %v2845_v57, %v2196_v56  ;;  %v4061_v57 = vor.u32 %v4952_v47, %v4058_v48 }
 0x2a6   : > { %3389 = vst.msk [vmem:[%s5361_s30 + $0x208] sm:$0xff] %vm3323_vm1, %v2846_v58  ;;  %v4573_v58 = vor.u32 %v5080_v49, %v4570_v50 }
 0x2a8   : > { %v2516_v3 = vpop.f32.mrf.mxu2 }
 0x2a9   : > { %v3165_v4 = vpop.f32.mrf.mxu3 }
 0x2aa   : > { %v3166_v7 = vadd.f32 %v3165_v4, %v2516_v3  ;;  %v2199_v8 = vpop.f32.mrf.mxu0  ;;  %v4064_v3 = vld [vmem:[%s5262_s24 + $0x2c0] sm:$0xf]  ;;  %v4955_v4 = vld [vmem:[%s5262_s24 + $0x2c4] sm:$0xf0] }
 0x2ab   : > { %v2848_v11 = vpop.f32.mrf.mxu1 }
 0x2ac   : > { %3517 = vst.msk [vmem:[%s5361_s30 + $0x608] sm:$0xff] %vm3323_vm1, %v3166_v7  ;;  %v2849_v12 = vadd.f32 %v2848_v11, %v2199_v8  ;;  %v4954_v7 = vld [vmem:[%s5262_s24 + $0x2c4] sm:$0xf]  ;;  %v4066_v8 = vld [vmem:[%s5262_s24 + $0x2c8] sm:$0xf0] }
 0x2ad   : > { %2238 = vmatmul.bf16.gmra.mxu0 %v4041_v5  ;;  %2558 = vmatmul.bf16.gmra.mxu2 %v4553_v6  ;;  %v4576_v5 = vld [vmem:[%s5262_s24 + $0x6c0] sm:$0xf]  ;;  %v5083_v6 = vld [vmem:[%s5262_s24 + $0x6c4] sm:$0xf0] }
 0x2ae   : > { %3390 = vst.msk [vmem:[%s5361_s30 + $0x210] sm:$0xff] %vm3323_vm1, %v2849_v12  ;;  %4775 = vmatmul.msk.bf16.gmra.mxu1 %vm1637_vm0, %v4045_v9  ;;  %4839 = vmatmul.msk.bf16.gmra.mxu3 %vm1637_vm0, %v4557_v10  ;;  %v5082_v9 = vld [vmem:[%s5262_s24 + $0x6c4] sm:$0xf]  ;;  %v4578_v10 = vld [vmem:[%s5262_s24 + $0x6c8] sm:$0xf0] }
 0x2b0   : > { %v2519_v13 = vpop.f32.mrf.mxu2 }
 0x2b1   : > { %v3168_v14 = vpop.f32.mrf.mxu3 }
 0x2b2   : > { %v3169_v15 = vadd.f32 %v3168_v14, %v2519_v13  ;;  %v2201_v16 = vpop.f32.mrf.mxu0  ;;  %v4065_v13 = vor.u32 %v4955_v4, %v4064_v3  ;;  %v4577_v14 = vor.u32 %v5083_v6, %v4576_v5 }
 0x2b3   : > { %v2850_v17 = vpop.f32.mrf.mxu1 }
 0x2b4   : > { %3518 = vst.msk [vmem:[%s5361_s30 + $0x610] sm:$0xff] %vm3323_vm1, %v3169_v15  ;;  %v2851_v18 = vadd.f32 %v2850_v17, %v2201_v16  ;;  %v4069_v17 = vor.u32 %v4954_v7, %v4066_v8 }
 0x2b6   : > { %3391 = vst.msk [vmem:[%s5361_s30 + $0x218] sm:$0xff] %vm3323_vm1, %v2851_v18  ;;  %v4581_v18 = vor.u32 %v5082_v9, %v4578_v10 }
 0x2b8   : > { %v2521_v27 = vpop.f32.mrf.mxu2 }
 0x2b9   : > { %v3170_v28 = vpop.f32.mrf.mxu3 }
 0x2ba   : > { %v3171_v31 = vadd.f32 %v3170_v28, %v2521_v27  ;;  %v2204_v32 = vpop.f32.mrf.mxu0  ;;  %v4072_v27 = vld [vmem:[%s5262_s24 + $0x2d0] sm:$0xf]  ;;  %v4957_v28 = vld [vmem:[%s5262_s24 + $0x2d4] sm:$0xf0] }
 0x2bb   : > { %v2853_v35 = vpop.f32.mrf.mxu1 }
 0x2bc   : > { %3519 = vst.msk [vmem:[%s5361_s30 + $0x618] sm:$0xff] %vm3323_vm1, %v3171_v31  ;;  %v2854_v36 = vadd.f32 %v2853_v35, %v2204_v32  ;;  %v4956_v31 = vld [vmem:[%s5262_s24 + $0x2d4] sm:$0xf]  ;;  %v4074_v32 = vld [vmem:[%s5262_s24 + $0x2d8] sm:$0xf0] }
 0x2bd   : > { %2243 = vmatmul.bf16.gmra.mxu0 %v4049_v29  ;;  %2563 = vmatmul.bf16.gmra.mxu2 %v4561_v30  ;;  %v4584_v29 = vld [vmem:[%s5262_s24 + $0x6d0] sm:$0xf]  ;;  %v5085_v30 = vld [vmem:[%s5262_s24 + $0x6d4] sm:$0xf0] }
 0x2be   : > { %3392 = vst.msk [vmem:[%s5361_s30 + $0x220] sm:$0xff] %vm3323_vm1, %v2854_v36  ;;  %4776 = vmatmul.msk.bf16.gmra.mxu1 %vm1637_vm0, %v4053_v33  ;;  %4840 = vmatmul.msk.bf16.gmra.mxu3 %vm1637_vm0, %v4565_v34  ;;  %v5084_v33 = vld [vmem:[%s5262_s24 + $0x6d4] sm:$0xf]  ;;  %v4586_v34 = vld [vmem:[%s5262_s24 + $0x6d8] sm:$0xf0] }
 0x2c0   : > { %v2524_v37 = vpop.f32.mrf.mxu2 }
 0x2c1   : > { %v3173_v38 = vpop.f32.mrf.mxu3 }
 0x2c2   : > { %v3174_v39 = vadd.f32 %v3173_v38, %v2524_v37  ;;  %v2206_v40 = vpop.f32.mrf.mxu0  ;;  %v4073_v37 = vor.u32 %v4957_v28, %v4072_v27  ;;  %v4585_v38 = vor.u32 %v5085_v30, %v4584_v29 }
 0x2c3   : > { %v2855_v41 = vpop.f32.mrf.mxu1 }
 0x2c4   : > { %3520 = vst.msk [vmem:[%s5361_s30 + $0x620] sm:$0xff] %vm3323_vm1, %v3174_v39  ;;  %v2856_v42 = vadd.f32 %v2855_v41, %v2206_v40  ;;  %v4077_v41 = vor.u32 %v4956_v31, %v4074_v32 }
 0x2c6   : > { %3393 = vst.msk [vmem:[%s5361_s30 + $0x228] sm:$0xff] %vm3323_vm1, %v2856_v42  ;;  %v4589_v42 = vor.u32 %v5084_v33, %v4586_v34 }
 0x2c8   : > { %v2526_v51 = vpop.f32.mrf.mxu2 }
 0x2c9   : > { %v3175_v52 = vpop.f32.mrf.mxu3 }
 0x2ca   : > { %v3176_v55 = vadd.f32 %v3175_v52, %v2526_v51  ;;  %v2209_v56 = vpop.f32.mrf.mxu0  ;;  %v4080_v51 = vld [vmem:[%s5262_s24 + $0x2e0] sm:$0xf]  ;;  %v4959_v52 = vld [vmem:[%s5262_s24 + $0x2e4] sm:$0xf0] }
 0x2cb   : > { %v2858_v59 = vpop.f32.mrf.mxu1 }
 0x2cc   : > { %3521 = vst.msk [vmem:[%s5361_s30 + $0x628] sm:$0xff] %vm3323_vm1, %v3176_v55  ;;  %v2859_v60 = vadd.f32 %v2858_v59, %v2209_v56  ;;  %v4958_v55 = vld [vmem:[%s5262_s24 + $0x2e4] sm:$0xf]  ;;  %v4082_v56 = vld [vmem:[%s5262_s24 + $0x2e8] sm:$0xf0] }
 0x2cd   : > { %2248 = vmatmul.bf16.gmra.mxu0 %v4057_v53  ;;  %2568 = vmatmul.bf16.gmra.mxu2 %v4569_v54  ;;  %v4592_v53 = vld [vmem:[%s5262_s24 + $0x6e0] sm:$0xf]  ;;  %v5087_v54 = vld [vmem:[%s5262_s24 + $0x6e4] sm:$0xf0] }
 0x2ce   : > { %3394 = vst.msk [vmem:[%s5361_s30 + $0x230] sm:$0xff] %vm3323_vm1, %v2859_v60  ;;  %4777 = vmatmul.msk.bf16.gmra.mxu1 %vm1637_vm0, %v4061_v57  ;;  %4841 = vmatmul.msk.bf16.gmra.mxu3 %vm1637_vm0, %v4573_v58  ;;  %v5086_v57 = vld [vmem:[%s5262_s24 + $0x6e4] sm:$0xf]  ;;  %v4594_v58 = vld [vmem:[%s5262_s24 + $0x6e8] sm:$0xf0] }
 0x2d0   : > { %v2529_v61 = vpop.f32.mrf.mxu2 }
 0x2d1   : > { %v3178_v62 = vpop.f32.mrf.mxu3 }
 0x2d2   : > { %v3179_v63 = vadd.f32 %v3178_v62, %v2529_v61  ;;  %v2211_v0 = vpop.f32.mrf.mxu0  ;;  %v4081_v61 = vor.u32 %v4959_v52, %v4080_v51  ;;  %v4593_v62 = vor.u32 %v5087_v54, %v4592_v53 }
 0x2d3   : > { %v2860_v1 = vpop.f32.mrf.mxu1 }
 0x2d4   : > { %3522 = vst.msk [vmem:[%s5361_s30 + $0x630] sm:$0xff] %vm3323_vm1, %v3179_v63  ;;  %v2861_v2 = vadd.f32 %v2860_v1, %v2211_v0  ;;  %v4085_v1 = vor.u32 %v4958_v55, %v4082_v56 }
 0x2d6   : > { %3395 = vst.msk [vmem:[%s5361_s30 + $0x238] sm:$0xff] %vm3323_vm1, %v2861_v2  ;;  %v4597_v2 = vor.u32 %v5086_v57, %v4594_v58 }
 0x2d8   : > { %v2531_v11 = vpop.f32.mrf.mxu2 }
 0x2d9   : > { %v3180_v12 = vpop.f32.mrf.mxu3 }
 0x2da   : > { %v3181_v15 = vadd.f32 %v3180_v12, %v2531_v11  ;;  %v2214_v16 = vpop.f32.mrf.mxu0  ;;  %v4088_v11 = vld [vmem:[%s5262_s24 + $0x2f0] sm:$0xf]  ;;  %v4961_v12 = vld [vmem:[%s5262_s24 + $0x2f4] sm:$0xf0] }
 0x2db   : > { %v2863_v19 = vpop.f32.mrf.mxu1 }
 0x2dc   : > { %3523 = vst.msk [vmem:[%s5361_s30 + $0x638] sm:$0xff] %vm3323_vm1, %v3181_v15  ;;  %v2864_v20 = vadd.f32 %v2863_v19, %v2214_v16  ;;  %v4960_v15 = vld [vmem:[%s5262_s24 + $0x2f4] sm:$0xf]  ;;  %v4090_v16 = vld [vmem:[%s5262_s24 + $0x2f8] sm:$0xf0] }
 0x2dd   : > { %2253 = vmatmul.bf16.gmra.mxu0 %v4065_v13  ;;  %2573 = vmatmul.bf16.gmra.mxu2 %v4577_v14  ;;  %v4600_v13 = vld [vmem:[%s5262_s24 + $0x6f0] sm:$0xf]  ;;  %v5089_v14 = vld [vmem:[%s5262_s24 + $0x6f4] sm:$0xf0] }
 0x2de   : > { %3396 = vst.msk [vmem:[%s5361_s30 + $0x240] sm:$0xff] %vm3323_vm1, %v2864_v20  ;;  %4778 = vmatmul.msk.bf16.gmra.mxu1 %vm1637_vm0, %v4069_v17  ;;  %4842 = vmatmul.msk.bf16.gmra.mxu3 %vm1637_vm0, %v4581_v18  ;;  %v5088_v17 = vld [vmem:[%s5262_s24 + $0x6f4] sm:$0xf]  ;;  %v4602_v18 = vld [vmem:[%s5262_s24 + $0x6f8] sm:$0xf0] }
 0x2e0   : > { %v2534_v21 = vpop.f32.mrf.mxu2 }
 0x2e1   : > { %v3183_v22 = vpop.f32.mrf.mxu3 }
 0x2e2   : > { %v3184_v23 = vadd.f32 %v3183_v22, %v2534_v21  ;;  %v2216_v24 = vpop.f32.mrf.mxu0  ;;  %v4089_v21 = vor.u32 %v4961_v12, %v4088_v11  ;;  %v4601_v22 = vor.u32 %v5089_v14, %v4600_v13 }
 0x2e3   : > { %v2865_v25 = vpop.f32.mrf.mxu1 }
 0x2e4   : > { %3524 = vst.msk [vmem:[%s5361_s30 + $0x640] sm:$0xff] %vm3323_vm1, %v3184_v23  ;;  %v2866_v26 = vadd.f32 %v2865_v25, %v2216_v24  ;;  %v4093_v25 = vor.u32 %v4960_v15, %v4090_v16 }
 0x2e6   : > { %3397 = vst.msk [vmem:[%s5361_s30 + $0x248] sm:$0xff] %vm3323_vm1, %v2866_v26  ;;  %v4605_v26 = vor.u32 %v5088_v17, %v4602_v18 }
 0x2e8   : > { %v2536_v35 = vpop.f32.mrf.mxu2 }
 0x2e9   : > { %v3185_v36 = vpop.f32.mrf.mxu3 }
 0x2ea   : > { %v3186_v39 = vadd.f32 %v3185_v36, %v2536_v35  ;;  %v2219_v40 = vpop.f32.mrf.mxu0  ;;  %v4096_v35 = vld [vmem:[%s5262_s24 + $0x300] sm:$0xf]  ;;  %v4963_v36 = vld [vmem:[%s5262_s24 + $0x304] sm:$0xf0] }
 0x2eb   : > { %v2868_v43 = vpop.f32.mrf.mxu1 }
 0x2ec   : > { %3525 = vst.msk [vmem:[%s5361_s30 + $0x648] sm:$0xff] %vm3323_vm1, %v3186_v39  ;;  %v2869_v44 = vadd.f32 %v2868_v43, %v2219_v40  ;;  %v4962_v39 = vld [vmem:[%s5262_s24 + $0x304] sm:$0xf]  ;;  %v4098_v40 = vld [vmem:[%s5262_s24 + $0x308] sm:$0xf0] }
 0x2ed   : > { %2258 = vmatmul.bf16.gmra.mxu0 %v4073_v37  ;;  %2578 = vmatmul.bf16.gmra.mxu2 %v4585_v38  ;;  %v4608_v37 = vld [vmem:[%s5262_s24 + $0x700] sm:$0xf]  ;;  %v5091_v38 = vld [vmem:[%s5262_s24 + $0x704] sm:$0xf0] }
 0x2ee   : > { %3398 = vst.msk [vmem:[%s5361_s30 + $0x250] sm:$0xff] %vm3323_vm1, %v2869_v44  ;;  %4779 = vmatmul.msk.bf16.gmra.mxu1 %vm1637_vm0, %v4077_v41  ;;  %4843 = vmatmul.msk.bf16.gmra.mxu3 %vm1637_vm0, %v4589_v42  ;;  %v5090_v41 = vld [vmem:[%s5262_s24 + $0x704] sm:$0xf]  ;;  %v4610_v42 = vld [vmem:[%s5262_s24 + $0x708] sm:$0xf0] }
 0x2f0   : > { %v2539_v45 = vpop.f32.mrf.mxu2 }
 0x2f1   : > { %v3188_v46 = vpop.f32.mrf.mxu3 }
 0x2f2   : > { %v3189_v47 = vadd.f32 %v3188_v46, %v2539_v45  ;;  %v2221_v48 = vpop.f32.mrf.mxu0  ;;  %v4097_v45 = vor.u32 %v4963_v36, %v4096_v35  ;;  %v4609_v46 = vor.u32 %v5091_v38, %v4608_v37 }
 0x2f3   : > { %v2870_v49 = vpop.f32.mrf.mxu1 }
 0x2f4   : > { %3526 = vst.msk [vmem:[%s5361_s30 + $0x650] sm:$0xff] %vm3323_vm1, %v3189_v47  ;;  %v2871_v50 = vadd.f32 %v2870_v49, %v2221_v48  ;;  %v4101_v49 = vor.u32 %v4962_v39, %v4098_v40 }
 0x2f6   : > { %3399 = vst.msk [vmem:[%s5361_s30 + $0x258] sm:$0xff] %vm3323_vm1, %v2871_v50  ;;  %v4613_v50 = vor.u32 %v5090_v41, %v4610_v42 }
 0x2f8   : > { %v2541_v59 = vpop.f32.mrf.mxu2 }
 0x2f9   : > { %v3190_v60 = vpop.f32.mrf.mxu3 }
 0x2fa   : > { %v3191_v63 = vadd.f32 %v3190_v60, %v2541_v59  ;;  %v2224_v0 = vpop.f32.mrf.mxu0  ;;  %v4104_v59 = vld [vmem:[%s5262_s24 + $0x310] sm:$0xf]  ;;  %v4965_v60 = vld [vmem:[%s5262_s24 + $0x314] sm:$0xf0] }
 0x2fb   : > { %v2873_v3 = vpop.f32.mrf.mxu1 }
 0x2fc   : > { %3527 = vst.msk [vmem:[%s5361_s30 + $0x658] sm:$0xff] %vm3323_vm1, %v3191_v63  ;;  %v2874_v4 = vadd.f32 %v2873_v3, %v2224_v0  ;;  %v4964_v63 = vld [vmem:[%s5262_s24 + $0x314] sm:$0xf]  ;;  %v4106_v0 = vld [vmem:[%s5262_s24 + $0x318] sm:$0xf0] }
 0x2fd   : > { %2263 = vmatmul.bf16.gmra.mxu0 %v4081_v61  ;;  %2583 = vmatmul.bf16.gmra.mxu2 %v4593_v62  ;;  %v4616_v61 = vld [vmem:[%s5262_s24 + $0x710] sm:$0xf]  ;;  %v5093_v62 = vld [vmem:[%s5262_s24 + $0x714] sm:$0xf0] }
 0x2fe   : > { %3400 = vst.msk [vmem:[%s5361_s30 + $0x260] sm:$0xff] %vm3323_vm1, %v2874_v4  ;;  %4780 = vmatmul.msk.bf16.gmra.mxu1 %vm1637_vm0, %v4085_v1  ;;  %4844 = vmatmul.msk.bf16.gmra.mxu3 %vm1637_vm0, %v4597_v2  ;;  %v5092_v1 = vld [vmem:[%s5262_s24 + $0x714] sm:$0xf]  ;;  %v4618_v2 = vld [vmem:[%s5262_s24 + $0x718] sm:$0xf0] }
 0x300   : > { %v2544_v5 = vpop.f32.mrf.mxu2 }
 0x301   : > { %v3193_v6 = vpop.f32.mrf.mxu3 }
 0x302   : > { %v3194_v7 = vadd.f32 %v3193_v6, %v2544_v5  ;;  %v2226_v8 = vpop.f32.mrf.mxu0  ;;  %v4105_v5 = vor.u32 %v4965_v60, %v4104_v59  ;;  %v4617_v6 = vor.u32 %v5093_v62, %v4616_v61 }
 0x303   : > { %v2875_v9 = vpop.f32.mrf.mxu1 }
 0x304   : > { %3528 = vst.msk [vmem:[%s5361_s30 + $0x660] sm:$0xff] %vm3323_vm1, %v3194_v7  ;;  %v2876_v10 = vadd.f32 %v2875_v9, %v2226_v8  ;;  %v4109_v9 = vor.u32 %v4964_v63, %v4106_v0 }
 0x306   : > { %3401 = vst.msk [vmem:[%s5361_s30 + $0x268] sm:$0xff] %vm3323_vm1, %v2876_v10  ;;  %v4621_v10 = vor.u32 %v5092_v1, %v4618_v2 }
 0x308   : > { %v2546_v19 = vpop.f32.mrf.mxu2 }
 0x309   : > { %v3195_v20 = vpop.f32.mrf.mxu3 }
 0x30a   : > { %v3196_v23 = vadd.f32 %v3195_v20, %v2546_v19  ;;  %v2229_v24 = vpop.f32.mrf.mxu0  ;;  %v4112_v19 = vld [vmem:[%s5262_s24 + $0x320] sm:$0xf]  ;;  %v4967_v20 = vld [vmem:[%s5262_s24 + $0x324] sm:$0xf0] }
 0x30b   : > { %v2878_v27 = vpop.f32.mrf.mxu1 }
 0x30c   : > { %3529 = vst.msk [vmem:[%s5361_s30 + $0x668] sm:$0xff] %vm3323_vm1, %v3196_v23  ;;  %v2879_v28 = vadd.f32 %v2878_v27, %v2229_v24  ;;  %v4966_v23 = vld [vmem:[%s5262_s24 + $0x324] sm:$0xf]  ;;  %v4114_v24 = vld [vmem:[%s5262_s24 + $0x328] sm:$0xf0] }
 0x30d   : > { %2268 = vmatmul.bf16.gmra.mxu0 %v4089_v21  ;;  %2588 = vmatmul.bf16.gmra.mxu2 %v4601_v22  ;;  %v4624_v21 = vld [vmem:[%s5262_s24 + $0x720] sm:$0xf]  ;;  %v5095_v22 = vld [vmem:[%s5262_s24 + $0x724] sm:$0xf0] }
 0x30e   : > { %3402 = vst.msk [vmem:[%s5361_s30 + $0x270] sm:$0xff] %vm3323_vm1, %v2879_v28  ;;  %4781 = vmatmul.msk.bf16.gmra.mxu1 %vm1637_vm0, %v4093_v25  ;;  %4845 = vmatmul.msk.bf16.gmra.mxu3 %vm1637_vm0, %v4605_v26  ;;  %v5094_v25 = vld [vmem:[%s5262_s24 + $0x724] sm:$0xf]  ;;  %v4626_v26 = vld [vmem:[%s5262_s24 + $0x728] sm:$0xf0] }
 0x310   : > { %v2549_v29 = vpop.f32.mrf.mxu2 }
 0x311   : > { %v3198_v30 = vpop.f32.mrf.mxu3 }
 0x312   : > { %v3199_v31 = vadd.f32 %v3198_v30, %v2549_v29  ;;  %v2231_v32 = vpop.f32.mrf.mxu0  ;;  %v4113_v29 = vor.u32 %v4967_v20, %v4112_v19  ;;  %v4625_v30 = vor.u32 %v5095_v22, %v4624_v21 }
 0x313   : > { %v2880_v33 = vpop.f32.mrf.mxu1 }
 0x314   : > { %3530 = vst.msk [vmem:[%s5361_s30 + $0x670] sm:$0xff] %vm3323_vm1, %v3199_v31  ;;  %v2881_v34 = vadd.f32 %v2880_v33, %v2231_v32  ;;  %v4117_v33 = vor.u32 %v4966_v23, %v4114_v24 }
 0x316   : > { %3403 = vst.msk [vmem:[%s5361_s30 + $0x278] sm:$0xff] %vm3323_vm1, %v2881_v34  ;;  %v4629_v34 = vor.u32 %v5094_v25, %v4626_v26 }
 0x318   : > { %v2551_v43 = vpop.f32.mrf.mxu2 }
 0x319   : > { %v3200_v44 = vpop.f32.mrf.mxu3 }
 0x31a   : > { %v3201_v47 = vadd.f32 %v3200_v44, %v2551_v43  ;;  %v2234_v48 = vpop.f32.mrf.mxu0  ;;  %v4120_v43 = vld [vmem:[%s5262_s24 + $0x330] sm:$0xf]  ;;  %v4969_v44 = vld [vmem:[%s5262_s24 + $0x334] sm:$0xf0] }
 0x31b   : > { %v2883_v51 = vpop.f32.mrf.mxu1 }
 0x31c   : > { %3531 = vst.msk [vmem:[%s5361_s30 + $0x678] sm:$0xff] %vm3323_vm1, %v3201_v47  ;;  %v2884_v52 = vadd.f32 %v2883_v51, %v2234_v48  ;;  %v4968_v47 = vld [vmem:[%s5262_s24 + $0x334] sm:$0xf]  ;;  %v4122_v48 = vld [vmem:[%s5262_s24 + $0x338] sm:$0xf0] }
 0x31d   : > { %2273 = vmatmul.bf16.gmra.mxu0 %v4097_v45  ;;  %2593 = vmatmul.bf16.gmra.mxu2 %v4609_v46  ;;  %v4632_v45 = vld [vmem:[%s5262_s24 + $0x730] sm:$0xf]  ;;  %v5097_v46 = vld [vmem:[%s5262_s24 + $0x734] sm:$0xf0] }
 0x31e   : > { %3404 = vst.msk [vmem:[%s5361_s30 + $0x280] sm:$0xff] %vm3323_vm1, %v2884_v52  ;;  %4782 = vmatmul.msk.bf16.gmra.mxu1 %vm1637_vm0, %v4101_v49  ;;  %4846 = vmatmul.msk.bf16.gmra.mxu3 %vm1637_vm0, %v4613_v50  ;;  %v5096_v49 = vld [vmem:[%s5262_s24 + $0x734] sm:$0xf]  ;;  %v4634_v50 = vld [vmem:[%s5262_s24 + $0x738] sm:$0xf0] }
 0x320   : > { %v2554_v53 = vpop.f32.mrf.mxu2 }
 0x321   : > { %v3203_v54 = vpop.f32.mrf.mxu3 }
 0x322   : > { %v3204_v55 = vadd.f32 %v3203_v54, %v2554_v53  ;;  %v2236_v56 = vpop.f32.mrf.mxu0  ;;  %v4121_v53 = vor.u32 %v4969_v44, %v4120_v43  ;;  %v4633_v54 = vor.u32 %v5097_v46, %v4632_v45 }
 0x323   : > { %v2885_v57 = vpop.f32.mrf.mxu1 }
 0x324   : > { %3532 = vst.msk [vmem:[%s5361_s30 + $0x680] sm:$0xff] %vm3323_vm1, %v3204_v55  ;;  %v2886_v58 = vadd.f32 %v2885_v57, %v2236_v56  ;;  %v4125_v57 = vor.u32 %v4968_v47, %v4122_v48 }
 0x326   : > { %3405 = vst.msk [vmem:[%s5361_s30 + $0x288] sm:$0xff] %vm3323_vm1, %v2886_v58  ;;  %v4637_v58 = vor.u32 %v5096_v49, %v4634_v50 }
 0x328   : > { %v2556_v3 = vpop.f32.mrf.mxu2 }
 0x329   : > { %v3205_v4 = vpop.f32.mrf.mxu3 }
 0x32a   : > { %v3206_v7 = vadd.f32 %v3205_v4, %v2556_v3  ;;  %v2239_v8 = vpop.f32.mrf.mxu0  ;;  %v4128_v3 = vld [vmem:[%s5262_s24 + $0x340] sm:$0xf]  ;;  %v4971_v4 = vld [vmem:[%s5262_s24 + $0x344] sm:$0xf0] }
 0x32b   : > { %v2888_v11 = vpop.f32.mrf.mxu1 }
 0x32c   : > { %3533 = vst.msk [vmem:[%s5361_s30 + $0x688] sm:$0xff] %vm3323_vm1, %v3206_v7  ;;  %v2889_v12 = vadd.f32 %v2888_v11, %v2239_v8  ;;  %v4970_v7 = vld [vmem:[%s5262_s24 + $0x344] sm:$0xf]  ;;  %v4130_v8 = vld [vmem:[%s5262_s24 + $0x348] sm:$0xf0] }
 0x32d   : > { %2278 = vmatmul.bf16.gmra.mxu0 %v4105_v5  ;;  %2598 = vmatmul.bf16.gmra.mxu2 %v4617_v6  ;;  %v4640_v5 = vld [vmem:[%s5262_s24 + $0x740] sm:$0xf]  ;;  %v5099_v6 = vld [vmem:[%s5262_s24 + $0x744] sm:$0xf0] }
 0x32e   : > { %3406 = vst.msk [vmem:[%s5361_s30 + $0x290] sm:$0xff] %vm3323_vm1, %v2889_v12  ;;  %4783 = vmatmul.msk.bf16.gmra.mxu1 %vm1637_vm0, %v4109_v9  ;;  %4847 = vmatmul.msk.bf16.gmra.mxu3 %vm1637_vm0, %v4621_v10  ;;  %v5098_v9 = vld [vmem:[%s5262_s24 + $0x744] sm:$0xf]  ;;  %v4642_v10 = vld [vmem:[%s5262_s24 + $0x748] sm:$0xf0] }
 0x330   : > { %v2559_v13 = vpop.f32.mrf.mxu2 }
 0x331   : > { %v3208_v14 = vpop.f32.mrf.mxu3 }
 0x332   : > { %v3209_v15 = vadd.f32 %v3208_v14, %v2559_v13  ;;  %v2241_v16 = vpop.f32.mrf.mxu0  ;;  %v4129_v13 = vor.u32 %v4971_v4, %v4128_v3  ;;  %v4641_v14 = vor.u32 %v5099_v6, %v4640_v5 }
 0x333   : > { %v2890_v17 = vpop.f32.mrf.mxu1 }
 0x334   : > { %3534 = vst.msk [vmem:[%s5361_s30 + $0x690] sm:$0xff] %vm3323_vm1, %v3209_v15  ;;  %v2891_v18 = vadd.f32 %v2890_v17, %v2241_v16  ;;  %v4133_v17 = vor.u32 %v4970_v7, %v4130_v8 }
 0x336   : > { %3407 = vst.msk [vmem:[%s5361_s30 + $0x298] sm:$0xff] %vm3323_vm1, %v2891_v18  ;;  %v4645_v18 = vor.u32 %v5098_v9, %v4642_v10 }
 0x338   : > { %v2561_v27 = vpop.f32.mrf.mxu2 }
 0x339   : > { %v3210_v28 = vpop.f32.mrf.mxu3 }
 0x33a   : > { %v3211_v31 = vadd.f32 %v3210_v28, %v2561_v27  ;;  %v2244_v32 = vpop.f32.mrf.mxu0  ;;  %v4136_v27 = vld [vmem:[%s5262_s24 + $0x350] sm:$0xf]  ;;  %v4973_v28 = vld [vmem:[%s5262_s24 + $0x354] sm:$0xf0] }
 0x33b   : > { %v2893_v35 = vpop.f32.mrf.mxu1 }
 0x33c   : > { %3535 = vst.msk [vmem:[%s5361_s30 + $0x698] sm:$0xff] %vm3323_vm1, %v3211_v31  ;;  %v2894_v36 = vadd.f32 %v2893_v35, %v2244_v32  ;;  %v4972_v31 = vld [vmem:[%s5262_s24 + $0x354] sm:$0xf]  ;;  %v4138_v32 = vld [vmem:[%s5262_s24 + $0x358] sm:$0xf0] }
 0x33d   : > { %2283 = vmatmul.bf16.gmra.mxu0 %v4113_v29  ;;  %2603 = vmatmul.bf16.gmra.mxu2 %v4625_v30  ;;  %v4648_v29 = vld [vmem:[%s5262_s24 + $0x750] sm:$0xf]  ;;  %v5101_v30 = vld [vmem:[%s5262_s24 + $0x754] sm:$0xf0] }
 0x33e   : > { %3408 = vst.msk [vmem:[%s5361_s30 + $0x2a0] sm:$0xff] %vm3323_vm1, %v2894_v36  ;;  %4784 = vmatmul.msk.bf16.gmra.mxu1 %vm1637_vm0, %v4117_v33  ;;  %4848 = vmatmul.msk.bf16.gmra.mxu3 %vm1637_vm0, %v4629_v34  ;;  %v5100_v33 = vld [vmem:[%s5262_s24 + $0x754] sm:$0xf]  ;;  %v4650_v34 = vld [vmem:[%s5262_s24 + $0x758] sm:$0xf0] }
 0x340   : > { %v2564_v37 = vpop.f32.mrf.mxu2 }
 0x341   : > { %v3213_v38 = vpop.f32.mrf.mxu3 }
 0x342   : > { %v3214_v39 = vadd.f32 %v3213_v38, %v2564_v37  ;;  %v2246_v40 = vpop.f32.mrf.mxu0  ;;  %v4137_v37 = vor.u32 %v4973_v28, %v4136_v27  ;;  %v4649_v38 = vor.u32 %v5101_v30, %v4648_v29 }
 0x343   : > { %v2895_v41 = vpop.f32.mrf.mxu1 }
 0x344   : > { %3536 = vst.msk [vmem:[%s5361_s30 + $0x6a0] sm:$0xff] %vm3323_vm1, %v3214_v39  ;;  %v2896_v42 = vadd.f32 %v2895_v41, %v2246_v40  ;;  %v4141_v41 = vor.u32 %v4972_v31, %v4138_v32 }
 0x346   : > { %3409 = vst.msk [vmem:[%s5361_s30 + $0x2a8] sm:$0xff] %vm3323_vm1, %v2896_v42  ;;  %v4653_v42 = vor.u32 %v5100_v33, %v4650_v34 }
 0x348   : > { %v2566_v51 = vpop.f32.mrf.mxu2 }
 0x349   : > { %v3215_v52 = vpop.f32.mrf.mxu3 }
 0x34a   : > { %v3216_v55 = vadd.f32 %v3215_v52, %v2566_v51  ;;  %v2249_v56 = vpop.f32.mrf.mxu0  ;;  %v4144_v51 = vld [vmem:[%s5262_s24 + $0x360] sm:$0xf]  ;;  %v4975_v52 = vld [vmem:[%s5262_s24 + $0x364] sm:$0xf0] }
 0x34b   : > { %v2898_v59 = vpop.f32.mrf.mxu1 }
 0x34c   : > { %3537 = vst.msk [vmem:[%s5361_s30 + $0x6a8] sm:$0xff] %vm3323_vm1, %v3216_v55  ;;  %v2899_v60 = vadd.f32 %v2898_v59, %v2249_v56  ;;  %v4974_v55 = vld [vmem:[%s5262_s24 + $0x364] sm:$0xf]  ;;  %v4146_v56 = vld [vmem:[%s5262_s24 + $0x368] sm:$0xf0] }
 0x34d   : > { %2288 = vmatmul.bf16.gmra.mxu0 %v4121_v53  ;;  %2608 = vmatmul.bf16.gmra.mxu2 %v4633_v54  ;;  %v4656_v53 = vld [vmem:[%s5262_s24 + $0x760] sm:$0xf]  ;;  %v5103_v54 = vld [vmem:[%s5262_s24 + $0x764] sm:$0xf0] }
 0x34e   : > { %3410 = vst.msk [vmem:[%s5361_s30 + $0x2b0] sm:$0xff] %vm3323_vm1, %v2899_v60  ;;  %4785 = vmatmul.msk.bf16.gmra.mxu1 %vm1637_vm0, %v4125_v57  ;;  %4849 = vmatmul.msk.bf16.gmra.mxu3 %vm1637_vm0, %v4637_v58  ;;  %v5102_v57 = vld [vmem:[%s5262_s24 + $0x764] sm:$0xf]  ;;  %v4658_v58 = vld [vmem:[%s5262_s24 + $0x768] sm:$0xf0] }
 0x350   : > { %v2569_v61 = vpop.f32.mrf.mxu2 }
 0x351   : > { %v3218_v62 = vpop.f32.mrf.mxu3 }
 0x352   : > { %v3219_v63 = vadd.f32 %v3218_v62, %v2569_v61  ;;  %v2251_v0 = vpop.f32.mrf.mxu0  ;;  %v4145_v61 = vor.u32 %v4975_v52, %v4144_v51  ;;  %v4657_v62 = vor.u32 %v5103_v54, %v4656_v53 }
 0x353   : > { %v2900_v1 = vpop.f32.mrf.mxu1 }
 0x354   : > { %3538 = vst.msk [vmem:[%s5361_s30 + $0x6b0] sm:$0xff] %vm3323_vm1, %v3219_v63  ;;  %v2901_v2 = vadd.f32 %v2900_v1, %v2251_v0  ;;  %v4149_v1 = vor.u32 %v4974_v55, %v4146_v56 }
 0x356   : > { %3411 = vst.msk [vmem:[%s5361_s30 + $0x2b8] sm:$0xff] %vm3323_vm1, %v2901_v2  ;;  %v4661_v2 = vor.u32 %v5102_v57, %v4658_v58 }
 0x358   : > { %v2571_v11 = vpop.f32.mrf.mxu2 }
 0x359   : > { %v3220_v12 = vpop.f32.mrf.mxu3 }
 0x35a   : > { %v3221_v15 = vadd.f32 %v3220_v12, %v2571_v11  ;;  %v2254_v16 = vpop.f32.mrf.mxu0  ;;  %v4152_v11 = vld [vmem:[%s5262_s24 + $0x370] sm:$0xf]  ;;  %v4977_v12 = vld [vmem:[%s5262_s24 + $0x374] sm:$0xf0] }
 0x35b   : > { %v2903_v19 = vpop.f32.mrf.mxu1 }
 0x35c   : > { %3539 = vst.msk [vmem:[%s5361_s30 + $0x6b8] sm:$0xff] %vm3323_vm1, %v3221_v15  ;;  %v2904_v20 = vadd.f32 %v2903_v19, %v2254_v16  ;;  %v4976_v15 = vld [vmem:[%s5262_s24 + $0x374] sm:$0xf]  ;;  %v4154_v16 = vld [vmem:[%s5262_s24 + $0x378] sm:$0xf0] }
 0x35d   : > { %2293 = vmatmul.bf16.gmra.mxu0 %v4129_v13  ;;  %2613 = vmatmul.bf16.gmra.mxu2 %v4641_v14  ;;  %v4664_v13 = vld [vmem:[%s5262_s24 + $0x770] sm:$0xf]  ;;  %v5105_v14 = vld [vmem:[%s5262_s24 + $0x774] sm:$0xf0] }
 0x35e   : > { %3412 = vst.msk [vmem:[%s5361_s30 + $0x2c0] sm:$0xff] %vm3323_vm1, %v2904_v20  ;;  %4786 = vmatmul.msk.bf16.gmra.mxu1 %vm1637_vm0, %v4133_v17  ;;  %4850 = vmatmul.msk.bf16.gmra.mxu3 %vm1637_vm0, %v4645_v18  ;;  %v5104_v17 = vld [vmem:[%s5262_s24 + $0x774] sm:$0xf]  ;;  %v4666_v18 = vld [vmem:[%s5262_s24 + $0x778] sm:$0xf0] }
 0x360   : > { %v2574_v21 = vpop.f32.mrf.mxu2 }
 0x361   : > { %v3223_v22 = vpop.f32.mrf.mxu3 }
 0x362   : > { %v3224_v23 = vadd.f32 %v3223_v22, %v2574_v21  ;;  %v2256_v24 = vpop.f32.mrf.mxu0  ;;  %v4153_v21 = vor.u32 %v4977_v12, %v4152_v11  ;;  %v4665_v22 = vor.u32 %v5105_v14, %v4664_v13 }
 0x363   : > { %v2905_v25 = vpop.f32.mrf.mxu1 }
 0x364   : > { %3540 = vst.msk [vmem:[%s5361_s30 + $0x6c0] sm:$0xff] %vm3323_vm1, %v3224_v23  ;;  %v2906_v26 = vadd.f32 %v2905_v25, %v2256_v24  ;;  %v4157_v25 = vor.u32 %v4976_v15, %v4154_v16 }
 0x366   : > { %3413 = vst.msk [vmem:[%s5361_s30 + $0x2c8] sm:$0xff] %vm3323_vm1, %v2906_v26  ;;  %v4669_v26 = vor.u32 %v5104_v17, %v4666_v18 }
 0x368   : > { %v2576_v35 = vpop.f32.mrf.mxu2 }
 0x369   : > { %v3225_v36 = vpop.f32.mrf.mxu3 }
 0x36a   : > { %v3226_v39 = vadd.f32 %v3225_v36, %v2576_v35  ;;  %v2259_v40 = vpop.f32.mrf.mxu0  ;;  %v4160_v35 = vld [vmem:[%s5262_s24 + $0x380] sm:$0xf]  ;;  %v4979_v36 = vld [vmem:[%s5262_s24 + $0x384] sm:$0xf0] }
 0x36b   : > { %v2908_v43 = vpop.f32.mrf.mxu1 }
 0x36c   : > { %3541 = vst.msk [vmem:[%s5361_s30 + $0x6c8] sm:$0xff] %vm3323_vm1, %v3226_v39  ;;  %v2909_v44 = vadd.f32 %v2908_v43, %v2259_v40  ;;  %v4978_v39 = vld [vmem:[%s5262_s24 + $0x384] sm:$0xf]  ;;  %v4162_v40 = vld [vmem:[%s5262_s24 + $0x388] sm:$0xf0] }
 0x36d   : > { %2298 = vmatmul.bf16.gmra.mxu0 %v4137_v37  ;;  %2618 = vmatmul.bf16.gmra.mxu2 %v4649_v38  ;;  %v4672_v37 = vld [vmem:[%s5262_s24 + $0x780] sm:$0xf]  ;;  %v5107_v38 = vld [vmem:[%s5262_s24 + $0x784] sm:$0xf0] }
 0x36e   : > { %3414 = vst.msk [vmem:[%s5361_s30 + $0x2d0] sm:$0xff] %vm3323_vm1, %v2909_v44  ;;  %4787 = vmatmul.msk.bf16.gmra.mxu1 %vm1637_vm0, %v4141_v41  ;;  %4851 = vmatmul.msk.bf16.gmra.mxu3 %vm1637_vm0, %v4653_v42  ;;  %v5106_v41 = vld [vmem:[%s5262_s24 + $0x784] sm:$0xf]  ;;  %v4674_v42 = vld [vmem:[%s5262_s24 + $0x788] sm:$0xf0] }
 0x370   : > { %v2579_v45 = vpop.f32.mrf.mxu2 }
 0x371   : > { %v3228_v46 = vpop.f32.mrf.mxu3 }
 0x372   : > { %v3229_v47 = vadd.f32 %v3228_v46, %v2579_v45  ;;  %v2261_v48 = vpop.f32.mrf.mxu0  ;;  %v4161_v45 = vor.u32 %v4979_v36, %v4160_v35  ;;  %v4673_v46 = vor.u32 %v5107_v38, %v4672_v37 }
 0x373   : > { %v2910_v49 = vpop.f32.mrf.mxu1 }
 0x374   : > { %3542 = vst.msk [vmem:[%s5361_s30 + $0x6d0] sm:$0xff] %vm3323_vm1, %v3229_v47  ;;  %v2911_v50 = vadd.f32 %v2910_v49, %v2261_v48  ;;  %v4165_v49 = vor.u32 %v4978_v39, %v4162_v40 }
 0x376   : > { %3415 = vst.msk [vmem:[%s5361_s30 + $0x2d8] sm:$0xff] %vm3323_vm1, %v2911_v50  ;;  %v4677_v50 = vor.u32 %v5106_v41, %v4674_v42 }
 0x378   : > { %v2581_v59 = vpop.f32.mrf.mxu2 }
 0x379   : > { %v3230_v60 = vpop.f32.mrf.mxu3 }
 0x37a   : > { %v3231_v63 = vadd.f32 %v3230_v60, %v2581_v59  ;;  %v2264_v0 = vpop.f32.mrf.mxu0  ;;  %v4168_v59 = vld [vmem:[%s5262_s24 + $0x390] sm:$0xf]  ;;  %v4981_v60 = vld [vmem:[%s5262_s24 + $0x394] sm:$0xf0] }
 0x37b   : > { %v2913_v3 = vpop.f32.mrf.mxu1 }
 0x37c   : > { %3543 = vst.msk [vmem:[%s5361_s30 + $0x6d8] sm:$0xff] %vm3323_vm1, %v3231_v63  ;;  %v2914_v4 = vadd.f32 %v2913_v3, %v2264_v0  ;;  %v4980_v63 = vld [vmem:[%s5262_s24 + $0x394] sm:$0xf]  ;;  %v4170_v0 = vld [vmem:[%s5262_s24 + $0x398] sm:$0xf0] }
 0x37d   : > { %2303 = vmatmul.bf16.gmra.mxu0 %v4145_v61  ;;  %2623 = vmatmul.bf16.gmra.mxu2 %v4657_v62  ;;  %v4680_v61 = vld [vmem:[%s5262_s24 + $0x790] sm:$0xf]  ;;  %v5109_v62 = vld [vmem:[%s5262_s24 + $0x794] sm:$0xf0] }
 0x37e   : > { %3416 = vst.msk [vmem:[%s5361_s30 + $0x2e0] sm:$0xff] %vm3323_vm1, %v2914_v4  ;;  %4788 = vmatmul.msk.bf16.gmra.mxu1 %vm1637_vm0, %v4149_v1  ;;  %4852 = vmatmul.msk.bf16.gmra.mxu3 %vm1637_vm0, %v4661_v2  ;;  %v5108_v1 = vld [vmem:[%s5262_s24 + $0x794] sm:$0xf]  ;;  %v4682_v2 = vld [vmem:[%s5262_s24 + $0x798] sm:$0xf0] }
 0x380   : > { %v2584_v5 = vpop.f32.mrf.mxu2 }
 0x381   : > { %v3233_v6 = vpop.f32.mrf.mxu3 }
 0x382   : > { %v3234_v7 = vadd.f32 %v3233_v6, %v2584_v5  ;;  %v2266_v8 = vpop.f32.mrf.mxu0  ;;  %v4169_v5 = vor.u32 %v4981_v60, %v4168_v59  ;;  %v4681_v6 = vor.u32 %v5109_v62, %v4680_v61 }
 0x383   : > { %v2915_v9 = vpop.f32.mrf.mxu1 }
 0x384   : > { %3544 = vst.msk [vmem:[%s5361_s30 + $0x6e0] sm:$0xff] %vm3323_vm1, %v3234_v7  ;;  %v2916_v10 = vadd.f32 %v2915_v9, %v2266_v8  ;;  %v4173_v9 = vor.u32 %v4980_v63, %v4170_v0 }
 0x386   : > { %3417 = vst.msk [vmem:[%s5361_s30 + $0x2e8] sm:$0xff] %vm3323_vm1, %v2916_v10  ;;  %v4685_v10 = vor.u32 %v5108_v1, %v4682_v2 }
 0x388   : > { %v2586_v19 = vpop.f32.mrf.mxu2 }
 0x389   : > { %v3235_v20 = vpop.f32.mrf.mxu3 }
 0x38a   : > { %v3236_v23 = vadd.f32 %v3235_v20, %v2586_v19  ;;  %v2269_v24 = vpop.f32.mrf.mxu0  ;;  %v4176_v19 = vld [vmem:[%s5262_s24 + $0x3a0] sm:$0xf]  ;;  %v4983_v20 = vld [vmem:[%s5262_s24 + $0x3a4] sm:$0xf0] }
 0x38b   : > { %v2918_v27 = vpop.f32.mrf.mxu1 }
 0x38c   : > { %3545 = vst.msk [vmem:[%s5361_s30 + $0x6e8] sm:$0xff] %vm3323_vm1, %v3236_v23  ;;  %v2919_v28 = vadd.f32 %v2918_v27, %v2269_v24  ;;  %v4982_v23 = vld [vmem:[%s5262_s24 + $0x3a4] sm:$0xf]  ;;  %v4178_v24 = vld [vmem:[%s5262_s24 + $0x3a8] sm:$0xf0] }
 0x38d   : > { %2308 = vmatmul.bf16.gmra.mxu0 %v4153_v21  ;;  %2628 = vmatmul.bf16.gmra.mxu2 %v4665_v22  ;;  %v4688_v21 = vld [vmem:[%s5262_s24 + $0x7a0] sm:$0xf]  ;;  %v5111_v22 = vld [vmem:[%s5262_s24 + $0x7a4] sm:$0xf0] }
 0x38e   : > { %3418 = vst.msk [vmem:[%s5361_s30 + $0x2f0] sm:$0xff] %vm3323_vm1, %v2919_v28  ;;  %4789 = vmatmul.msk.bf16.gmra.mxu1 %vm1637_vm0, %v4157_v25  ;;  %4853 = vmatmul.msk.bf16.gmra.mxu3 %vm1637_vm0, %v4669_v26  ;;  %v5110_v25 = vld [vmem:[%s5262_s24 + $0x7a4] sm:$0xf]  ;;  %v4690_v26 = vld [vmem:[%s5262_s24 + $0x7a8] sm:$0xf0] }
 0x390   : > { %v2589_v29 = vpop.f32.mrf.mxu2 }
 0x391   : > { %v3238_v30 = vpop.f32.mrf.mxu3 }
 0x392   : > { %v3239_v31 = vadd.f32 %v3238_v30, %v2589_v29  ;;  %v2271_v32 = vpop.f32.mrf.mxu0  ;;  %v4177_v29 = vor.u32 %v4983_v20, %v4176_v19  ;;  %v4689_v30 = vor.u32 %v5111_v22, %v4688_v21 }
 0x393   : > { %v2920_v33 = vpop.f32.mrf.mxu1 }
 0x394   : > { %3546 = vst.msk [vmem:[%s5361_s30 + $0x6f0] sm:$0xff] %vm3323_vm1, %v3239_v31  ;;  %v2921_v34 = vadd.f32 %v2920_v33, %v2271_v32  ;;  %v4181_v33 = vor.u32 %v4982_v23, %v4178_v24 }
 0x396   : > { %3419 = vst.msk [vmem:[%s5361_s30 + $0x2f8] sm:$0xff] %vm3323_vm1, %v2921_v34  ;;  %v4693_v34 = vor.u32 %v5110_v25, %v4690_v26 }
 0x398   : > { %v2591_v43 = vpop.f32.mrf.mxu2 }
 0x399   : > { %v3240_v44 = vpop.f32.mrf.mxu3 }
 0x39a   : > { %v3241_v47 = vadd.f32 %v3240_v44, %v2591_v43  ;;  %v2274_v48 = vpop.f32.mrf.mxu0  ;;  %v4184_v43 = vld [vmem:[%s5262_s24 + $0x3b0] sm:$0xf]  ;;  %v4985_v44 = vld [vmem:[%s5262_s24 + $0x3b4] sm:$0xf0] }
 0x39b   : > { %v2923_v51 = vpop.f32.mrf.mxu1 }
 0x39c   : > { %3547 = vst.msk [vmem:[%s5361_s30 + $0x6f8] sm:$0xff] %vm3323_vm1, %v3241_v47  ;;  %v2924_v52 = vadd.f32 %v2923_v51, %v2274_v48  ;;  %v4984_v47 = vld [vmem:[%s5262_s24 + $0x3b4] sm:$0xf]  ;;  %v4186_v48 = vld [vmem:[%s5262_s24 + $0x3b8] sm:$0xf0] }
 0x39d   : > { %2313 = vmatmul.bf16.gmra.mxu0 %v4161_v45  ;;  %2633 = vmatmul.bf16.gmra.mxu2 %v4673_v46  ;;  %v4696_v45 = vld [vmem:[%s5262_s24 + $0x7b0] sm:$0xf]  ;;  %v5113_v46 = vld [vmem:[%s5262_s24 + $0x7b4] sm:$0xf0] }
 0x39e   : > { %3420 = vst.msk [vmem:[%s5361_s30 + $0x300] sm:$0xff] %vm3323_vm1, %v2924_v52  ;;  %4790 = vmatmul.msk.bf16.gmra.mxu1 %vm1637_vm0, %v4165_v49  ;;  %4854 = vmatmul.msk.bf16.gmra.mxu3 %vm1637_vm0, %v4677_v50  ;;  %v5112_v49 = vld [vmem:[%s5262_s24 + $0x7b4] sm:$0xf]  ;;  %v4698_v50 = vld [vmem:[%s5262_s24 + $0x7b8] sm:$0xf0] }
 0x3a0   : > { %v2594_v53 = vpop.f32.mrf.mxu2 }
 0x3a1   : > { %v3243_v54 = vpop.f32.mrf.mxu3 }
 0x3a2   : > { %v3244_v55 = vadd.f32 %v3243_v54, %v2594_v53  ;;  %v2276_v56 = vpop.f32.mrf.mxu0  ;;  %v4185_v53 = vor.u32 %v4985_v44, %v4184_v43  ;;  %v4697_v54 = vor.u32 %v5113_v46, %v4696_v45 }
 0x3a3   : > { %v2925_v57 = vpop.f32.mrf.mxu1 }
 0x3a4   : > { %3548 = vst.msk [vmem:[%s5361_s30 + $0x700] sm:$0xff] %vm3323_vm1, %v3244_v55  ;;  %v2926_v58 = vadd.f32 %v2925_v57, %v2276_v56  ;;  %v4189_v57 = vor.u32 %v4984_v47, %v4186_v48 }
 0x3a6   : > { %3421 = vst.msk [vmem:[%s5361_s30 + $0x308] sm:$0xff] %vm3323_vm1, %v2926_v58  ;;  %v4701_v58 = vor.u32 %v5112_v49, %v4698_v50 }
 0x3a8   : > { %v2596_v3 = vpop.f32.mrf.mxu2 }
 0x3a9   : > { %v3245_v4 = vpop.f32.mrf.mxu3 }
 0x3aa   : > { %v3246_v7 = vadd.f32 %v3245_v4, %v2596_v3  ;;  %v2279_v8 = vpop.f32.mrf.mxu0  ;;  %v4192_v3 = vld [vmem:[%s5262_s24 + $0x3c0] sm:$0xf]  ;;  %v4987_v4 = vld [vmem:[%s5262_s24 + $0x3c4] sm:$0xf0] }
 0x3ab   : > { %v2928_v11 = vpop.f32.mrf.mxu1 }
 0x3ac   : > { %3549 = vst.msk [vmem:[%s5361_s30 + $0x708] sm:$0xff] %vm3323_vm1, %v3246_v7  ;;  %v2929_v12 = vadd.f32 %v2928_v11, %v2279_v8  ;;  %v4986_v7 = vld [vmem:[%s5262_s24 + $0x3c4] sm:$0xf]  ;;  %v4194_v8 = vld [vmem:[%s5262_s24 + $0x3c8] sm:$0xf0] }
 0x3ad   : > { %2318 = vmatmul.bf16.gmra.mxu0 %v4169_v5  ;;  %2638 = vmatmul.bf16.gmra.mxu2 %v4681_v6  ;;  %v4704_v5 = vld [vmem:[%s5262_s24 + $0x7c0] sm:$0xf]  ;;  %v5115_v6 = vld [vmem:[%s5262_s24 + $0x7c4] sm:$0xf0] }
 0x3ae   : > { %3422 = vst.msk [vmem:[%s5361_s30 + $0x310] sm:$0xff] %vm3323_vm1, %v2929_v12  ;;  %4791 = vmatmul.msk.bf16.gmra.mxu1 %vm1637_vm0, %v4173_v9  ;;  %4855 = vmatmul.msk.bf16.gmra.mxu3 %vm1637_vm0, %v4685_v10  ;;  %v5114_v9 = vld [vmem:[%s5262_s24 + $0x7c4] sm:$0xf]  ;;  %v4706_v10 = vld [vmem:[%s5262_s24 + $0x7c8] sm:$0xf0] }
 0x3b0   : > { %v2599_v13 = vpop.f32.mrf.mxu2 }
 0x3b1   : > { %v3248_v14 = vpop.f32.mrf.mxu3 }
 0x3b2   : > { %v3249_v15 = vadd.f32 %v3248_v14, %v2599_v13  ;;  %v2281_v16 = vpop.f32.mrf.mxu0  ;;  %v4193_v13 = vor.u32 %v4987_v4, %v4192_v3  ;;  %v4705_v14 = vor.u32 %v5115_v6, %v4704_v5 }
 0x3b3   : > { %v2930_v17 = vpop.f32.mrf.mxu1 }
 0x3b4   : > { %3550 = vst.msk [vmem:[%s5361_s30 + $0x710] sm:$0xff] %vm3323_vm1, %v3249_v15  ;;  %v2931_v18 = vadd.f32 %v2930_v17, %v2281_v16  ;;  %v4197_v17 = vor.u32 %v4986_v7, %v4194_v8 }
 0x3b6   : > { %3423 = vst.msk [vmem:[%s5361_s30 + $0x318] sm:$0xff] %vm3323_vm1, %v2931_v18  ;;  %v4709_v18 = vor.u32 %v5114_v9, %v4706_v10 }
 0x3b8   : > { %v2601_v27 = vpop.f32.mrf.mxu2 }
 0x3b9   : > { %v3250_v28 = vpop.f32.mrf.mxu3 }
 0x3ba   : > { %v3251_v31 = vadd.f32 %v3250_v28, %v2601_v27  ;;  %v2284_v32 = vpop.f32.mrf.mxu0  ;;  %v4200_v27 = vld [vmem:[%s5262_s24 + $0x3d0] sm:$0xf]  ;;  %v4989_v28 = vld [vmem:[%s5262_s24 + $0x3d4] sm:$0xf0] }
 0x3bb   : > { %v2933_v35 = vpop.f32.mrf.mxu1 }
 0x3bc   : > { %3551 = vst.msk [vmem:[%s5361_s30 + $0x718] sm:$0xff] %vm3323_vm1, %v3251_v31  ;;  %v2934_v36 = vadd.f32 %v2933_v35, %v2284_v32  ;;  %v4988_v31 = vld [vmem:[%s5262_s24 + $0x3d4] sm:$0xf]  ;;  %v4202_v32 = vld [vmem:[%s5262_s24 + $0x3d8] sm:$0xf0] }
 0x3bd   : > { %2323 = vmatmul.bf16.gmra.mxu0 %v4177_v29  ;;  %2643 = vmatmul.bf16.gmra.mxu2 %v4689_v30  ;;  %v4712_v29 = vld [vmem:[%s5262_s24 + $0x7d0] sm:$0xf]  ;;  %v5117_v30 = vld [vmem:[%s5262_s24 + $0x7d4] sm:$0xf0] }
 0x3be   : > { %3424 = vst.msk [vmem:[%s5361_s30 + $0x320] sm:$0xff] %vm3323_vm1, %v2934_v36  ;;  %4792 = vmatmul.msk.bf16.gmra.mxu1 %vm1637_vm0, %v4181_v33  ;;  %4856 = vmatmul.msk.bf16.gmra.mxu3 %vm1637_vm0, %v4693_v34  ;;  %v5116_v33 = vld [vmem:[%s5262_s24 + $0x7d4] sm:$0xf]  ;;  %v4714_v34 = vld [vmem:[%s5262_s24 + $0x7d8] sm:$0xf0] }
 0x3c0   : > { %v2604_v37 = vpop.f32.mrf.mxu2 }
 0x3c1   : > { %v3253_v38 = vpop.f32.mrf.mxu3 }
 0x3c2   : > { %v3254_v39 = vadd.f32 %v3253_v38, %v2604_v37  ;;  %v2286_v40 = vpop.f32.mrf.mxu0  ;;  %v4201_v37 = vor.u32 %v4989_v28, %v4200_v27  ;;  %v4713_v38 = vor.u32 %v5117_v30, %v4712_v29 }
 0x3c3   : > { %v2935_v41 = vpop.f32.mrf.mxu1 }
 0x3c4   : > { %3552 = vst.msk [vmem:[%s5361_s30 + $0x720] sm:$0xff] %vm3323_vm1, %v3254_v39  ;;  %v2936_v42 = vadd.f32 %v2935_v41, %v2286_v40  ;;  %v4205_v41 = vor.u32 %v4988_v31, %v4202_v32 }
 0x3c6   : > { %3425 = vst.msk [vmem:[%s5361_s30 + $0x328] sm:$0xff] %vm3323_vm1, %v2936_v42  ;;  %v4717_v42 = vor.u32 %v5116_v33, %v4714_v34 }
 0x3c8   : > { %v2606_v51 = vpop.f32.mrf.mxu2 }
 0x3c9   : > { %v3255_v52 = vpop.f32.mrf.mxu3 }
 0x3ca   : > { %v3256_v55 = vadd.f32 %v3255_v52, %v2606_v51  ;;  %v2289_v56 = vpop.f32.mrf.mxu0  ;;  %v4208_v51 = vld [vmem:[%s5262_s24 + $0x3e0] sm:$0xf]  ;;  %v4991_v52 = vld [vmem:[%s5262_s24 + $0x3e4] sm:$0xf0] }
 0x3cb   : > { %v2938_v59 = vpop.f32.mrf.mxu1 }
 0x3cc   : > { %3553 = vst.msk [vmem:[%s5361_s30 + $0x728] sm:$0xff] %vm3323_vm1, %v3256_v55  ;;  %v2939_v60 = vadd.f32 %v2938_v59, %v2289_v56  ;;  %v4990_v55 = vld [vmem:[%s5262_s24 + $0x3e4] sm:$0xf]  ;;  %v4210_v56 = vld [vmem:[%s5262_s24 + $0x3e8] sm:$0xf0] }
 0x3cd   : > { %2328 = vmatmul.bf16.gmra.mxu0 %v4185_v53  ;;  %2648 = vmatmul.bf16.gmra.mxu2 %v4697_v54  ;;  %v4720_v53 = vld [vmem:[%s5262_s24 + $0x7e0] sm:$0xf]  ;;  %v5119_v54 = vld [vmem:[%s5262_s24 + $0x7e4] sm:$0xf0] }
 0x3ce   : > { %3426 = vst.msk [vmem:[%s5361_s30 + $0x330] sm:$0xff] %vm3323_vm1, %v2939_v60  ;;  %4793 = vmatmul.msk.bf16.gmra.mxu1 %vm1637_vm0, %v4189_v57  ;;  %4857 = vmatmul.msk.bf16.gmra.mxu3 %vm1637_vm0, %v4701_v58  ;;  %v5118_v57 = vld [vmem:[%s5262_s24 + $0x7e4] sm:$0xf]  ;;  %v4722_v58 = vld [vmem:[%s5262_s24 + $0x7e8] sm:$0xf0] }
 0x3d0   : > { %v2609_v61 = vpop.f32.mrf.mxu2 }
 0x3d1   : > { %v3258_v62 = vpop.f32.mrf.mxu3 }
 0x3d2   : > { %v3259_v63 = vadd.f32 %v3258_v62, %v2609_v61  ;;  %v2291_v0 = vpop.f32.mrf.mxu0  ;;  %v4209_v61 = vor.u32 %v4991_v52, %v4208_v51  ;;  %v4721_v62 = vor.u32 %v5119_v54, %v4720_v53 }
 0x3d3   : > { %v2940_v1 = vpop.f32.mrf.mxu1 }
 0x3d4   : > { %3554 = vst.msk [vmem:[%s5361_s30 + $0x730] sm:$0xff] %vm3323_vm1, %v3259_v63  ;;  %v2941_v2 = vadd.f32 %v2940_v1, %v2291_v0  ;;  %v4213_v1 = vor.u32 %v4990_v55, %v4210_v56 }
 0x3d6   : > { %3427 = vst.msk [vmem:[%s5361_s30 + $0x338] sm:$0xff] %vm3323_vm1, %v2941_v2  ;;  %v4725_v2 = vor.u32 %v5118_v57, %v4722_v58 }
 0x3d8   : > { %v2611_v11 = vpop.f32.mrf.mxu2 }
 0x3d9   : > { %v3260_v12 = vpop.f32.mrf.mxu3 }
 0x3da   : > { %v3261_v15 = vadd.f32 %v3260_v12, %v2611_v11  ;;  %v2294_v16 = vpop.f32.mrf.mxu0  ;;  %v4216_v11 = vld [vmem:[%s5262_s24 + $0x3f0] sm:$0xf]  ;;  %v4993_v12 = vld [vmem:[%s5262_s24 + $0x3f4] sm:$0xf0] }
 0x3db   : > { %v2943_v19 = vpop.f32.mrf.mxu1 }
 0x3dc   : > { %3555 = vst.msk [vmem:[%s5361_s30 + $0x738] sm:$0xff] %vm3323_vm1, %v3261_v15  ;;  %v2944_v20 = vadd.f32 %v2943_v19, %v2294_v16  ;;  %v4992_v15 = vld [vmem:[%s5262_s24 + $0x3f4] sm:$0xf]  ;;  %v4218_v16 = vld [vmem:[%s5262_s24 + $0x3f8] sm:$0xf0] }
 0x3dd   : > { %2333 = vmatmul.bf16.gmra.mxu0 %v4193_v13  ;;  %2653 = vmatmul.bf16.gmra.mxu2 %v4705_v14  ;;  %v4728_v13 = vld [vmem:[%s5262_s24 + $0x7f0] sm:$0xf]  ;;  %v5121_v14 = vld [vmem:[%s5262_s24 + $0x7f4] sm:$0xf0] }
 0x3de   : > { %3428 = vst.msk [vmem:[%s5361_s30 + $0x340] sm:$0xff] %vm3323_vm1, %v2944_v20  ;;  %4794 = vmatmul.msk.bf16.gmra.mxu1 %vm1637_vm0, %v4197_v17  ;;  %4858 = vmatmul.msk.bf16.gmra.mxu3 %vm1637_vm0, %v4709_v18  ;;  %v5120_v17 = vld [vmem:[%s5262_s24 + $0x7f4] sm:$0xf]  ;;  %v4730_v18 = vld [vmem:[%s5262_s24 + $0x7f8] sm:$0xf0] }
 0x3e0   : > { %v2614_v21 = vpop.f32.mrf.mxu2 }
 0x3e1   : > { %v3263_v22 = vpop.f32.mrf.mxu3 }
 0x3e2   : > { %v3264_v23 = vadd.f32 %v3263_v22, %v2614_v21  ;;  %v2296_v24 = vpop.f32.mrf.mxu0  ;;  %v4217_v21 = vor.u32 %v4993_v12, %v4216_v11  ;;  %v4729_v22 = vor.u32 %v5121_v14, %v4728_v13 }
 0x3e3   : > { %v2945_v25 = vpop.f32.mrf.mxu1 }
 0x3e4   : > { %3556 = vst.msk [vmem:[%s5361_s30 + $0x740] sm:$0xff] %vm3323_vm1, %v3264_v23  ;;  %v2946_v26 = vadd.f32 %v2945_v25, %v2296_v24  ;;  %v4221_v25 = vor.u32 %v4992_v15, %v4218_v16 }
 0x3e6   : > { %3429 = vst.msk [vmem:[%s5361_s30 + $0x348] sm:$0xff] %vm3323_vm1, %v2946_v26  ;;  %v4733_v26 = vor.u32 %v5120_v17, %v4730_v18 }
 0x3e8   : > { %v2616_v35 = vpop.f32.mrf.mxu2 }
 0x3e9   : > { %v3265_v36 = vpop.f32.mrf.mxu3 }
 0x3ea   : > { %v3266_v39 = vadd.f32 %v3265_v36, %v2616_v35  ;;  %v2299_v40 = vpop.f32.mrf.mxu0 }
 0x3eb   : > { %v2948_v43 = vpop.f32.mrf.mxu1 }
 0x3ec   : > { %3557 = vst.msk [vmem:[%s5361_s30 + $0x748] sm:$0xff] %vm3323_vm1, %v3266_v39  ;;  %v2949_v44 = vadd.f32 %v2948_v43, %v2299_v40 }
 0x3ed   : > { %2338 = vmatmul.bf16.gmra.mxu0 %v4201_v37  ;;  %2658 = vmatmul.bf16.gmra.mxu2 %v4713_v38 }
 0x3ee   : > { %3430 = vst.msk [vmem:[%s5361_s30 + $0x350] sm:$0xff] %vm3323_vm1, %v2949_v44  ;;  %4795 = vmatmul.msk.bf16.gmra.mxu1 %vm1637_vm0, %v4205_v41  ;;  %4859 = vmatmul.msk.bf16.gmra.mxu3 %vm1637_vm0, %v4717_v42 }
 0x3f0   : > { %v2619_v45 = vpop.f32.mrf.mxu2 }
 0x3f1   : > { %v3268_v46 = vpop.f32.mrf.mxu3 }
 0x3f2   : > { %v3269_v47 = vadd.f32 %v3268_v46, %v2619_v45  ;;  %v2301_v48 = vpop.f32.mrf.mxu0 }
 0x3f3   : > { %v2950_v49 = vpop.f32.mrf.mxu1 }
 0x3f4   : > { %3558 = vst.msk [vmem:[%s5361_s30 + $0x750] sm:$0xff] %vm3323_vm1, %v3269_v47  ;;  %v2951_v50 = vadd.f32 %v2950_v49, %v2301_v48 }
 0x3f6   : > { %3431 = vst.msk [vmem:[%s5361_s30 + $0x358] sm:$0xff] %vm3323_vm1, %v2951_v50 }
 0x3f8   : > { %v2621_v59 = vpop.f32.mrf.mxu2 }
 0x3f9   : > { %v3270_v60 = vpop.f32.mrf.mxu3 }
 0x3fa   : > { %v3271_v63 = vadd.f32 %v3270_v60, %v2621_v59  ;;  %v2304_v0 = vpop.f32.mrf.mxu0 }
 0x3fb   : > { %v2953_v3 = vpop.f32.mrf.mxu1 }
 0x3fc   : > { %3559 = vst.msk [vmem:[%s5361_s30 + $0x758] sm:$0xff] %vm3323_vm1, %v3271_v63  ;;  %v2954_v4 = vadd.f32 %v2953_v3, %v2304_v0 }
 0x3fd   : > { %2343 = vmatmul.bf16.gmra.mxu0 %v4209_v61  ;;  %2663 = vmatmul.bf16.gmra.mxu2 %v4721_v62 }
 0x3fe   : > { %3432 = vst.msk [vmem:[%s5361_s30 + $0x360] sm:$0xff] %vm3323_vm1, %v2954_v4  ;;  %4796 = vmatmul.msk.bf16.gmra.mxu1 %vm1637_vm0, %v4213_v1  ;;  %4860 = vmatmul.msk.bf16.gmra.mxu3 %vm1637_vm0, %v4725_v2 }
 0x400   : > { %v2624_v5 = vpop.f32.mrf.mxu2 }
 0x401   : > { %v3273_v6 = vpop.f32.mrf.mxu3 }
 0x402   : > { %v3274_v7 = vadd.f32 %v3273_v6, %v2624_v5  ;;  %v2306_v8 = vpop.f32.mrf.mxu0 }
 0x403   : > { %v2955_v9 = vpop.f32.mrf.mxu1 }
 0x404   : > { %3560 = vst.msk [vmem:[%s5361_s30 + $0x760] sm:$0xff] %vm3323_vm1, %v3274_v7  ;;  %v2956_v10 = vadd.f32 %v2955_v9, %v2306_v8 }
 0x406   : > { %3433 = vst.msk [vmem:[%s5361_s30 + $0x368] sm:$0xff] %vm3323_vm1, %v2956_v10 }
 0x408   : > { %v2626_v19 = vpop.f32.mrf.mxu2 }
 0x409   : > { %v3275_v20 = vpop.f32.mrf.mxu3 }
 0x40a   : > { %v3276_v23 = vadd.f32 %v3275_v20, %v2626_v19  ;;  %v2309_v24 = vpop.f32.mrf.mxu0 }
 0x40b   : > { %v2958_v27 = vpop.f32.mrf.mxu1 }
 0x40c   : > { %3561 = vst.msk [vmem:[%s5361_s30 + $0x768] sm:$0xff] %vm3323_vm1, %v3276_v23  ;;  %v2959_v28 = vadd.f32 %v2958_v27, %v2309_v24 }
 0x40d   : > { %2348 = vmatmul.bf16.gmra.mxu0 %v4217_v21  ;;  %2668 = vmatmul.bf16.gmra.mxu2 %v4729_v22 }
 0x40e   : > { %3434 = vst.msk [vmem:[%s5361_s30 + $0x370] sm:$0xff] %vm3323_vm1, %v2959_v28  ;;  %4797 = vmatmul.msk.bf16.gmra.mxu1 %vm1637_vm0, %v4221_v25  ;;  %4861 = vmatmul.msk.bf16.gmra.mxu3 %vm1637_vm0, %v4733_v26 }
 0x410   : > { %v2629_v29 = vpop.f32.mrf.mxu2 }
 0x411   : > { %v3278_v30 = vpop.f32.mrf.mxu3 }
 0x412   : > { %v3279_v31 = vadd.f32 %v3278_v30, %v2629_v29  ;;  %v2311_v32 = vpop.f32.mrf.mxu0 }
 0x413   : > { %v2960_v33 = vpop.f32.mrf.mxu1 }
 0x414   : > { %3562 = vst.msk [vmem:[%s5361_s30 + $0x770] sm:$0xff] %vm3323_vm1, %v3279_v31  ;;  %v2961_v34 = vadd.f32 %v2960_v33, %v2311_v32 }
 0x416   : > { %3435 = vst.msk [vmem:[%s5361_s30 + $0x378] sm:$0xff] %vm3323_vm1, %v2961_v34 }
 0x418   : > { %v2631_v35 = vpop.f32.mrf.mxu2 }
 0x419   : > { %v3280_v36 = vpop.f32.mrf.mxu3 }
 0x41a   : > { %v3281_v37 = vadd.f32 %v3280_v36, %v2631_v35  ;;  %v2314_v38 = vpop.f32.mrf.mxu0 }
 0x41b   : > { %v2963_v39 = vpop.f32.mrf.mxu1 }
 0x41c   : > { %3563 = vst.msk [vmem:[%s5361_s30 + $0x778] sm:$0xff] %vm3323_vm1, %v3281_v37  ;;  %v2964_v40 = vadd.f32 %v2963_v39, %v2314_v38 }
 0x41e   : > { %3436 = vst.msk [vmem:[%s5361_s30 + $0x380] sm:$0xff] %vm3323_vm1, %v2964_v40 }
 0x420   : > { %v2634_v41 = vpop.f32.mrf.mxu2 }
 0x421   : > { %v3283_v42 = vpop.f32.mrf.mxu3 }
 0x422   : > { %v3284_v43 = vadd.f32 %v3283_v42, %v2634_v41  ;;  %v2316_v44 = vpop.f32.mrf.mxu0 }
 0x423   : > { %v2965_v45 = vpop.f32.mrf.mxu1 }
 0x424   : > { %3564 = vst.msk [vmem:[%s5361_s30 + $0x780] sm:$0xff] %vm3323_vm1, %v3284_v43  ;;  %v2966_v46 = vadd.f32 %v2965_v45, %v2316_v44 }
 0x426   : > { %3437 = vst.msk [vmem:[%s5361_s30 + $0x388] sm:$0xff] %vm3323_vm1, %v2966_v46 }
 0x428   : > { %v2636_v47 = vpop.f32.mrf.mxu2 }
 0x429   : > { %v3285_v48 = vpop.f32.mrf.mxu3 }
 0x42a   : > { %v3286_v49 = vadd.f32 %v3285_v48, %v2636_v47  ;;  %v2319_v50 = vpop.f32.mrf.mxu0 }
 0x42b   : > { %v2968_v51 = vpop.f32.mrf.mxu1 }
 0x42c   : > { %3565 = vst.msk [vmem:[%s5361_s30 + $0x788] sm:$0xff] %vm3323_vm1, %v3286_v49  ;;  %v2969_v52 = vadd.f32 %v2968_v51, %v2319_v50 }
 0x42e   : > { %3438 = vst.msk [vmem:[%s5361_s30 + $0x390] sm:$0xff] %vm3323_vm1, %v2969_v52 }
 0x430   : > { %v2639_v53 = vpop.f32.mrf.mxu2 }
 0x431   : > { %v3288_v54 = vpop.f32.mrf.mxu3 }
 0x432   : > { %v3289_v55 = vadd.f32 %v3288_v54, %v2639_v53  ;;  %v2321_v56 = vpop.f32.mrf.mxu0 }
 0x433   : > { %v2970_v57 = vpop.f32.mrf.mxu1 }
 0x434   : > { %3566 = vst.msk [vmem:[%s5361_s30 + $0x790] sm:$0xff] %vm3323_vm1, %v3289_v55  ;;  %v2971_v58 = vadd.f32 %v2970_v57, %v2321_v56 }
 0x436   : > { %3439 = vst.msk [vmem:[%s5361_s30 + $0x398] sm:$0xff] %vm3323_vm1, %v2971_v58 }
 0x438   : > { %v2641_v59 = vpop.f32.mrf.mxu2 }
 0x439   : > { %v3290_v60 = vpop.f32.mrf.mxu3 }
 0x43a   : > { %v3291_v61 = vadd.f32 %v3290_v60, %v2641_v59  ;;  %v2324_v62 = vpop.f32.mrf.mxu0 }
 0x43b   : > { %v2973_v63 = vpop.f32.mrf.mxu1 }
 0x43c   : > { %3567 = vst.msk [vmem:[%s5361_s30 + $0x798] sm:$0xff] %vm3323_vm1, %v3291_v61  ;;  %v2974_v0 = vadd.f32 %v2973_v63, %v2324_v62 }
 0x43e   : > { %3440 = vst.msk [vmem:[%s5361_s30 + $0x3a0] sm:$0xff] %vm3323_vm1, %v2974_v0 }
 0x440   : > { %v2644_v1 = vpop.f32.mrf.mxu2 }
 0x441   : > { %v3293_v2 = vpop.f32.mrf.mxu3 }
 0x442   : > { %v3294_v3 = vadd.f32 %v3293_v2, %v2644_v1  ;;  %v2326_v4 = vpop.f32.mrf.mxu0 }
 0x443   : > { %v2975_v5 = vpop.f32.mrf.mxu1 }
 0x444   : > { %3568 = vst.msk [vmem:[%s5361_s30 + $0x7a0] sm:$0xff] %vm3323_vm1, %v3294_v3  ;;  %v2976_v6 = vadd.f32 %v2975_v5, %v2326_v4 }
 0x446   : > { %3441 = vst.msk [vmem:[%s5361_s30 + $0x3a8] sm:$0xff] %vm3323_vm1, %v2976_v6 }
 0x448   : > { %v2646_v7 = vpop.f32.mrf.mxu2 }
 0x449   : > { %v3295_v8 = vpop.f32.mrf.mxu3 }
 0x44a   : > { %v3296_v9 = vadd.f32 %v3295_v8, %v2646_v7  ;;  %v2329_v10 = vpop.f32.mrf.mxu0 }
 0x44b   : > { %v2978_v11 = vpop.f32.mrf.mxu1 }
 0x44c   : > { %3569 = vst.msk [vmem:[%s5361_s30 + $0x7a8] sm:$0xff] %vm3323_vm1, %v3296_v9  ;;  %v2979_v12 = vadd.f32 %v2978_v11, %v2329_v10 }
 0x44e   : > { %3442 = vst.msk [vmem:[%s5361_s30 + $0x3b0] sm:$0xff] %vm3323_vm1, %v2979_v12 }
 0x450   : > { %v2649_v13 = vpop.f32.mrf.mxu2 }
 0x451   : > { %v3298_v14 = vpop.f32.mrf.mxu3 }
 0x452   : > { %v3299_v15 = vadd.f32 %v3298_v14, %v2649_v13  ;;  %v2331_v16 = vpop.f32.mrf.mxu0 }
 0x453   : > { %v2980_v17 = vpop.f32.mrf.mxu1 }
 0x454   : > { %3570 = vst.msk [vmem:[%s5361_s30 + $0x7b0] sm:$0xff] %vm3323_vm1, %v3299_v15  ;;  %v2981_v18 = vadd.f32 %v2980_v17, %v2331_v16 }
 0x456   : > { %3443 = vst.msk [vmem:[%s5361_s30 + $0x3b8] sm:$0xff] %vm3323_vm1, %v2981_v18 }
 0x458   : > { %v2651_v19 = vpop.f32.mrf.mxu2 }
 0x459   : > { %v3300_v20 = vpop.f32.mrf.mxu3 }
 0x45a   : > { %v3301_v21 = vadd.f32 %v3300_v20, %v2651_v19  ;;  %v2334_v22 = vpop.f32.mrf.mxu0 }
 0x45b   : > { %v2983_v23 = vpop.f32.mrf.mxu1 }
 0x45c   : > { %3571 = vst.msk [vmem:[%s5361_s30 + $0x7b8] sm:$0xff] %vm3323_vm1, %v3301_v21  ;;  %v2984_v24 = vadd.f32 %v2983_v23, %v2334_v22 }
 0x45e   : > { %3444 = vst.msk [vmem:[%s5361_s30 + $0x3c0] sm:$0xff] %vm3323_vm1, %v2984_v24 }
 0x460   : > { %v2654_v25 = vpop.f32.mrf.mxu2 }
 0x461   : > { %v3303_v26 = vpop.f32.mrf.mxu3 }
 0x462   : > { %v3304_v27 = vadd.f32 %v3303_v26, %v2654_v25  ;;  %v2336_v28 = vpop.f32.mrf.mxu0 }
 0x463   : > { %v2985_v29 = vpop.f32.mrf.mxu1 }
 0x464   : > { %3572 = vst.msk [vmem:[%s5361_s30 + $0x7c0] sm:$0xff] %vm3323_vm1, %v3304_v27  ;;  %v2986_v30 = vadd.f32 %v2985_v29, %v2336_v28 }
 0x466   : > { %3445 = vst.msk [vmem:[%s5361_s30 + $0x3c8] sm:$0xff] %vm3323_vm1, %v2986_v30 }
 0x468   : > { %v2656_v31 = vpop.f32.mrf.mxu2 }
 0x469   : > { %v3305_v32 = vpop.f32.mrf.mxu3 }
 0x46a   : > { %v3306_v33 = vadd.f32 %v3305_v32, %v2656_v31  ;;  %v2339_v34 = vpop.f32.mrf.mxu0 }
 0x46b   : > { %v2988_v35 = vpop.f32.mrf.mxu1 }
 0x46c   : > { %3573 = vst.msk [vmem:[%s5361_s30 + $0x7c8] sm:$0xff] %vm3323_vm1, %v3306_v33  ;;  %v2989_v36 = vadd.f32 %v2988_v35, %v2339_v34 }
 0x46e   : > { %3446 = vst.msk [vmem:[%s5361_s30 + $0x3d0] sm:$0xff] %vm3323_vm1, %v2989_v36 }
 0x470   : > { %v2659_v37 = vpop.f32.mrf.mxu2 }
 0x471   : > { %v3308_v38 = vpop.f32.mrf.mxu3 }
 0x472   : > { %v3309_v39 = vadd.f32 %v3308_v38, %v2659_v37  ;;  %v2341_v40 = vpop.f32.mrf.mxu0 }
 0x473   : > { %v2990_v41 = vpop.f32.mrf.mxu1 }
 0x474   : > { %3574 = vst.msk [vmem:[%s5361_s30 + $0x7d0] sm:$0xff] %vm3323_vm1, %v3309_v39  ;;  %v2991_v42 = vadd.f32 %v2990_v41, %v2341_v40 }
 0x476   : > { %3447 = vst.msk [vmem:[%s5361_s30 + $0x3d8] sm:$0xff] %vm3323_vm1, %v2991_v42 }
 0x478   : > { %v2661_v43 = vpop.f32.mrf.mxu2 }
 0x479   : > { %v3310_v44 = vpop.f32.mrf.mxu3 }
 0x47a   : > { %v3311_v45 = vadd.f32 %v3310_v44, %v2661_v43  ;;  %v2344_v46 = vpop.f32.mrf.mxu0 }
 0x47b   : > { %v2993_v47 = vpop.f32.mrf.mxu1 }
 0x47c   : > { %3575 = vst.msk [vmem:[%s5361_s30 + $0x7d8] sm:$0xff] %vm3323_vm1, %v3311_v45  ;;  %v2994_v48 = vadd.f32 %v2993_v47, %v2344_v46 }
 0x47e   : > { %3448 = vst.msk [vmem:[%s5361_s30 + $0x3e0] sm:$0xff] %vm3323_vm1, %v2994_v48 }
 0x480   : > { %v2664_v49 = vpop.f32.mrf.mxu2 }
 0x481   : > { %v3313_v50 = vpop.f32.mrf.mxu3 }
 0x482   : > { %v3314_v51 = vadd.f32 %v3313_v50, %v2664_v49  ;;  %v2346_v52 = vpop.f32.mrf.mxu0 }
 0x483   : > { %v2995_v53 = vpop.f32.mrf.mxu1 }
 0x484   : > { %3576 = vst.msk [vmem:[%s5361_s30 + $0x7e0] sm:$0xff] %vm3323_vm1, %v3314_v51  ;;  %v2996_v54 = vadd.f32 %v2995_v53, %v2346_v52 }
 0x486   : > { %3449 = vst.msk [vmem:[%s5361_s30 + $0x3e8] sm:$0xff] %vm3323_vm1, %v2996_v54 }
 0x488   : > { %v2666_v55 = vpop.f32.mrf.mxu2 }
 0x489   : > { %v3315_v56 = vpop.f32.mrf.mxu3 }
 0x48a   : > { %v3316_v57 = vadd.f32 %v3315_v56, %v2666_v55  ;;  %v2349_v58 = vpop.f32.mrf.mxu0 }
 0x48b   : > { %v2998_v59 = vpop.f32.mrf.mxu1 }
 0x48c   : > { %3577 = vst.msk [vmem:[%s5361_s30 + $0x7e8] sm:$0xff] %vm3323_vm1, %v3316_v57  ;;  %v2999_v60 = vadd.f32 %v2998_v59, %v2349_v58 }
 0x48e   : > { %3450 = vst.msk [vmem:[%s5361_s30 + $0x3f0] sm:$0xff] %vm3323_vm1, %v2999_v60 }
 0x490   : > { %v2669_v61 = vpop.f32.mrf.mxu2 }
 0x491   : > { %v3318_v62 = vpop.f32.mrf.mxu3 }
 0x492   : > { %v3319_v63 = vadd.f32 %v3318_v62, %v2669_v61  ;;  %v2351_v0 = vpop.f32.mrf.mxu0 }
 0x493   : > { %v3000_v1 = vpop.f32.mrf.mxu1 }
 0x494   : > { %3578 = vst.msk [vmem:[%s5361_s30 + $0x7f0] sm:$0xff] %vm3323_vm1, %v3319_v63  ;;  %v3001_v2 = vadd.f32 %v3000_v1, %v2351_v0 }
 0x496   : > { %3451 = vst.msk [vmem:[%s5361_s30 + $0x3f8] sm:$0xff] %vm3323_vm1, %v3001_v2 }
 0x498   : > { %v2671_v3 = vpop.f32.mrf.mxu2 }
 0x499   : > { %v3320_v4 = vpop.f32.mrf.mxu3 }
 0x49a   : > { %v3321_v5 = vadd.f32 %v3320_v4, %v2671_v3 }
 0x49c   : > { %3579 = vst.msk [vmem:[%s5361_s30 + $0x7f8] sm:$0xff] %vm3323_vm1, %v3321_v5 }
 0x49d PF: > { %s12_s13 = sadd.s32 1, %s5203_s13   ;;  %s6445_s9 = smov %s5195_s11 }
 0x49e   : > { %p9_p7 = scmp.ge.s32.totalorder %s12_s13, 26   ;;  %s6446_s10 = smov %s5199_s12 }
 0x49f   : > { %s6447_s11 = smov %s6450_s14  ;;  %s6448_s12 = smov %s6454_s15 }
 0x4a0   :  { %11 = sbr.rel (!%p9_p7) target bundleno = 3 (0x3), region = 61 }

</bundles_post_ra>
